<compile_context>
chip_gen: v6e
topology: v6e:2x2x1
jax: 0.10.0
libtpu: 0.0.40
codegen_flags: <defaults>
</compile_context>

<pallas_src>
import functools

import jax
import jax.numpy as jnp
import numpy as np
from jax.experimental import pallas as pl
from jax.experimental.pallas import tpu as pltpu

LANE = 128  # TPU lane width; channel padding granularity


def _round_up(x, m):
    return (x + m - 1) // m * m


def _fold_bn(gamma, beta, mean, var, eps=1e-5):
    scale = gamma / jnp.sqrt(var + eps)
    bias = beta - mean * scale
    return scale, bias


# ---------------------------------------------------------------------------
# Fused Bottleneck kernel
# ---------------------------------------------------------------------------
def _bottleneck_kernel(x_main_ref, x_top_ref, x_bot_ref,
                       w1_ref, b1_ref, w2_ref, b2_ref, w3_ref, b3_ref,
                       o_ref, y1_ref, *, TH, W, WP):
    """One (batch, row-block) grid step of the fused Bottleneck."""
    j = pl.program_id(1)
    nb = pl.num_programs(1)
    c_p = w1_ref.shape[1]

    def conv1(x2d):
        # 1x1 conv (BN scale pre-folded into w1) + bias + ReLU, bf16 out.
        y = jnp.dot(x2d, w1_ref[...], preferred_element_type=jnp.float32)
        return jnp.maximum(y + b1_ref[...], 0.0).astype(jnp.bfloat16)

    # ---- conv1 + BN + ReLU into the halo'd bf16 y1 scratch -----------------
    # Scratch layout: row 0 = halo above, rows 1..TH = this block's rows,
    # row TH+1 = halo below; valid data in columns [1, W+1), zeros in column 0
    # and columns [W+1, WP) (this is the 3x3 conv's SAME padding).
    y1_ref[1:TH + 1, 1:W + 1, :] = conv1(x_main_ref[0]).reshape(TH, W, c_p)

    @pl.when(j > 0)
    def _():
        y1_ref[0, 1:W + 1, :] = conv1(x_top_ref[0])

    @pl.when(j == 0)
    def _():
        y1_ref[0, 1:W + 1, :] = jnp.zeros((W, c_p), jnp.bfloat16)

    @pl.when(j < nb - 1)
    def _():
        y1_ref[TH + 1, 1:W + 1, :] = conv1(x_bot_ref[0])

    @pl.when(j == nb - 1)
    def _():
        y1_ref[TH + 1, 1:W + 1, :] = jnp.zeros((W, c_p), jnp.bfloat16)

    # Zero-pad columns of the window (small masked stores).
    y1_ref[:, 0:1, :] = jnp.zeros((TH + 2, 1, c_p), jnp.bfloat16)
    y1_ref[:, W + 1:WP, :] = jnp.zeros((TH + 2, WP - W - 1, c_p), jnp.bfloat16)

    # ---- conv2 (3x3, stride 1, SAME): 9 matmuls over full-width row slabs --
    # Taps are grouped by kernel column dx into three f32 accumulators so
    # every slab load is a contiguous leading-dim slice of the scratch (no
    # per-tap relayout copies); the dx shift is applied once after the loop.
    M = TH * WP
    a0 = jnp.zeros((M, c_p), jnp.float32)
    a1 = jnp.zeros((M, c_p), jnp.float32)
    a2 = jnp.zeros((M, c_p), jnp.float32)
    for dy in range(3):
        slab = y1_ref[dy:dy + TH, :, :].reshape(M, c_p)
        a0 = a0 + jnp.dot(slab, w2_ref[3 * dy + 0],
                          preferred_element_type=jnp.float32)
        a1 = a1 + jnp.dot(slab, w2_ref[3 * dy + 1],
                          preferred_element_type=jnp.float32)
        a2 = a2 + jnp.dot(slab, w2_ref[3 * dy + 2],
                          preferred_element_type=jnp.float32)
    a0 = a0.reshape(TH, WP, c_p)
    a1 = a1.reshape(TH, WP, c_p)
    a2 = a2.reshape(TH, WP, c_p)
    # out[r, x] = a0[r, x] + a1[r, x+1] + a2[r, x+2]  (data lives at cols 1..W)
    y2 = a0[:, 0:W, :] + a1[:, 1:W + 1, :] + a2[:, 2:W + 2, :]
    y2 = y2.reshape(TH * W, c_p)
    y2 = jnp.maximum(y2 + b2_ref[...], 0.0).astype(jnp.bfloat16)

    # ---- conv3 (1x1) + BN bias, residual add (f32), ReLU -------------------
    y3 = jnp.dot(y2, w3_ref[...], preferred_element_type=jnp.float32) + b3_ref[...]
    res = x_main_ref[0].astype(jnp.float32)      # identity shortcut, read late
    o_ref[0] = jnp.maximum(y3 + res, 0.0).astype(o_ref.dtype)


# ---------------------------------------------------------------------------
# Wrapper: tiling choice + pallas_call
# ---------------------------------------------------------------------------
def _vmem_estimate(TH, W, WP, cin_p, c_p, cout_p):
    bf2, f4 = 2, 4
    est = 2 * TH * W * cin_p * bf2            # main input block (double-buffered)
    est += 2 * 2 * W * cin_p * bf2            # two halo row blocks
    est += 2 * TH * W * cout_p * bf2          # output block
    est += 2 * ((cin_p * c_p + 9 * c_p * c_p + c_p * cout_p) * bf2
                + (2 * c_p + cout_p) * f4)    # weights / biases
    est += (TH + 2) * WP * c_p * bf2          # y1 scratch
    est += 3 * TH * WP * c_p * f4             # conv2 accumulators
    est += TH * W * (c_p * (f4 + bf2) + 2 * cout_p * f4)  # y2 / y3 / residual
    return est


def _pick_row_tile(H, W, cin_p, c_p, cout_p, budget):
    WP = _round_up(W + 2, 8)
    best = 1
    for th in range(1, H + 1):
        if H % th:
            continue
        if _vmem_estimate(th, W, WP, cin_p, c_p, cout_p) <= budget:
            best = th
    return best


def bottleneck_forward(x_nhwc, kparams, *, row_tile=None,
                       vmem_budget_bytes=48 * 1024 * 1024):
    """Fused Bottleneck forward (stride=1, identity shortcut) on NHWC input."""
    N, H, W, Cin = x_nhwc.shape
    cin_ref, _, cout, cin_p, c_p, cout_p = kparams["dims"]
    assert Cin == cin_ref and cout == Cin, \
        "identity residual requires Cin == 4*out_channels"
    assert cout_p == cin_p
    # TODO(synk): the 1-row halo BlockSpecs need W % 8 == 0 (Pallas (8,128)
    # block rule); stage widths 28/14/7 need an Element-indexed halo fetch.
    assert W % 8 == 0, "halo BlockSpec requires W to be a multiple of 8"

    if row_tile is None:
        TH = _pick_row_tile(H, W, cin_p, c_p, cout_p, vmem_budget_bytes)
    else:
        assert H % row_tile == 0, "row_tile must divide H"
        TH = row_tile
    nb = H // TH
    WP = _round_up(W + 2, 8)   # scratch width: 1 left pad + W + >=1 right pad

    # Flat (N, H*W, C) channels-last view: conv1 / conv3 / residual / output
    # all see plain 2-D (rows, channels) tiles.  No spatial pre-pad in HBM.
    x_flat = x_nhwc.reshape(N, H * W, Cin)
    if cin_p != Cin:
        # Lane padding; a no-op for real ResNet widths (256/512/1024/2048).
        x_flat = jnp.pad(x_flat, ((0, 0), (0, 0), (0, cin_p - Cin)))
    x_flat = x_flat.astype(jnp.bfloat16)

    kernel = functools.partial(_bottleneck_kernel, TH=TH, W=W, WP=WP)

    def main_map(n, j):
        return (n, j, 0)

    def top_map(n, j):      # image row j*TH - 1, clamped (zeroed in-kernel at j==0)
        return (n, jnp.maximum(j * TH - 1, 0), 0)

    def bot_map(n, j):      # image row (j+1)*TH, clamped (zeroed at last block)
        return (n, jnp.minimum((j + 1) * TH, H - 1), 0)

    out = pl.pallas_call(
        kernel,
        out_shape=jax.ShapeDtypeStruct((N, H * W, cout_p), jnp.bfloat16),
        grid_spec=pltpu.PrefetchScalarGridSpec(
            num_scalar_prefetch=0,
            grid=(N, nb),
            in_specs=[
                pl.BlockSpec((1, TH * W, cin_p), main_map),   # main rows
                pl.BlockSpec((1, W, cin_p), top_map),         # top halo row
                pl.BlockSpec((1, W, cin_p), bot_map),         # bottom halo row
                pl.BlockSpec((cin_p, c_p), lambda n, j: (0, 0)),      # w1
                pl.BlockSpec((1, c_p), lambda n, j: (0, 0)),          # b1
                pl.BlockSpec((9, c_p, c_p), lambda n, j: (0, 0, 0)),  # w2 taps
                pl.BlockSpec((1, c_p), lambda n, j: (0, 0)),          # b2
                pl.BlockSpec((c_p, cout_p), lambda n, j: (0, 0)),     # w3
                pl.BlockSpec((1, cout_p), lambda n, j: (0, 0)),       # b3
            ],
            out_specs=pl.BlockSpec((1, TH * W, cout_p), main_map),
            scratch_shapes=[pltpu.VMEM((TH + 2, WP, c_p), jnp.bfloat16)],
        ),
        compiler_params=pltpu.CompilerParams(
            dimension_semantics=("parallel", "parallel"),
            # Large enough for big tiles on v5e/v6e (128 MiB physical); actual
            # usage is budgeted per-tile above so it also fits v7x's 64 MiB.
            vmem_limit_bytes=64 * 1024 * 1024,
        ),
    )(x_flat, x_flat, x_flat,
      kparams["w1"], kparams["b1"], kparams["w2"], kparams["b2"],
      kparams["w3"], kparams["b3"])

    return out.reshape(N, H, W, cout_p)[..., :cout]


# ---------------------------------------------------------------------------
# Deterministic synthetic parameters (PyTorch-equivalent layouts)
# ---------------------------------------------------------------------------
def make_params(key, in_channels, out_channels):
    """conv1x1 weights as (Cin, Cout); conv3x3 as (3, 3, Cin, Cout) HWIO;
    BatchNorm given as gamma/beta/running_mean/running_var (inference mode)."""
    C = out_channels
    k = jax.random.split(key, 3)
    w1 = jax.random.normal(k[0], (in_channels, C), jnp.float32) * 0.1
    w2 = jax.random.normal(k[1], (3, 3, C, C), jnp.float32) * 0.1
    w3 = jax.random.normal(k[2], (C, C * 4), jnp.float32) * 0.1

    def bn(n, off):
        gamma = 1.0 + 0.01 * jnp.arange(n, dtype=jnp.float32)
        beta = 0.05 * jnp.arange(n, dtype=jnp.float32) - 0.1 * off
        mean = 0.02 * jnp.arange(n, dtype=jnp.float32)
        var = 1.0 + 0.03 * jnp.arange(n, dtype=jnp.float32)
        return dict(gamma=gamma, beta=beta, mean=mean, var=var)

    return dict(w1=w1, w2=w2, w3=w3, bn1=bn(C, 1), bn2=bn(C, 2), bn3=bn(C * 4, 3))


def prepare_kernel_params(params):
    """Fold BN scale into the conv weights, pad channels to lane multiples,
    cast weights to bf16 for the MXU; biases stay f32."""
    w1, w2, w3 = params["w1"], params["w2"], params["w3"]
    Cin, C = w1.shape
    Cout = w3.shape[1]
    s1, b1 = _fold_bn(**params["bn1"])
    s2, b2 = _fold_bn(**params["bn2"])
    s3, b3 = _fold_bn(**params["bn3"])

    cin_p = _round_up(Cin, LANE)
    c_p = _round_up(C, LANE)
    cout_p = _round_up(Cout, LANE)

    def pad2(w, rows, cols):
        return jnp.zeros((rows, cols), jnp.float32).at[:w.shape[0], :w.shape[1]].set(w)

    def padb(b, n):
        return jnp.zeros((1, n), jnp.float32).at[0, :b.shape[0]].set(b)

    w1f = pad2(w1 * s1[None, :], cin_p, c_p).astype(jnp.bfloat16)
    w2s = (w2 * s2[None, None, None, :]).reshape(9, C, C)
    w2f = jnp.zeros((9, c_p, c_p), jnp.float32).at[:, :C, :C].set(w2s).astype(jnp.bfloat16)
    w3f = pad2(w3 * s3[None, :], c_p, cout_p).astype(jnp.bfloat16)

    return dict(w1=w1f, b1=padb(b1, c_p),
                w2=w2f, b2=padb(b2, c_p),
                w3=w3f, b3=padb(b3, cout_p),
                dims=(Cin, C, Cout, cin_p, c_p, cout_p))


# ---------------------------------------------------------------------------
# Pure-JAX f32 reference (module semantics, for correctness checking only)
# ---------------------------------------------------------------------------
def _reference(x_nhwc, params):
    def bn(x, p):
        s, b = _fold_bn(**p)
        return x * s + b

    y1 = jax.nn.relu(bn(jnp.einsum("nhwc,cd->nhwd", x_nhwc, params["w1"]), params["bn1"]))
    y2 = jax.lax.conv_general_dilated(
        y1, params["w2"], window_strides=(1, 1), padding="SAME",
        dimension_numbers=("NHWC", "HWIO", "NHWC"))
    y2 = jax.nn.relu(bn(y2, params["bn2"]))
    y3 = bn(jnp.einsum("nhwc,cd->nhwd", y2, params["w3"]), params["bn3"])
    return jax.nn.relu(y3 + x_nhwc)


if __name__ == "__main__":
    key = jax.random.PRNGKey(0)
    kx, kp = jax.random.split(key)

    N, H, W = 2, 16, 16
    out_channels = 4
    in_channels = out_channels * 4      # identity residual (downsample=None)
    x = jax.random.normal(kx, (N, H, W, in_channels), jnp.float32)

    params = make_params(kp, in_channels, out_channels)
    kparams = prepare_kernel_params(params)

    fwd = jax.jit(lambda xx: bottleneck_forward(xx, kparams))
    out = jax.block_until_ready(fwd(x))

    ref = _reference(x, params)
    # bf16 activations + bf16 MXU operands (f32 accumulate) vs pure-f32 ref.
    np.testing.assert_allclose(np.asarray(out.astype(jnp.float32)),
                               np.asarray(ref), rtol=5e-2, atol=1e-1)

    print("KERNEL_OK")
</pallas_src>

<mosaic_0001>
module attributes {stable_mosaic.version = 11 : i64} {
  func.func @_bottleneck_kernel(%arg0: i32, %arg1: i32, %arg2: memref<1x256x128xbf16, #tpu.memory_space<vmem>>, %arg3: memref<1x16x128xbf16, #tpu.memory_space<vmem>>, %arg4: memref<1x16x128xbf16, #tpu.memory_space<vmem>>, %arg5: memref<128x128xbf16, #tpu.memory_space<vmem>>, %arg6: memref<1x128xf32, #tpu.memory_space<vmem>>, %arg7: memref<9x128x128xbf16, #tpu.memory_space<vmem>>, %arg8: memref<1x128xf32, #tpu.memory_space<vmem>>, %arg9: memref<128x128xbf16, #tpu.memory_space<vmem>>, %arg10: memref<1x128xf32, #tpu.memory_space<vmem>>, %arg11: memref<1x256x128xbf16, #tpu.memory_space<vmem>>, %arg12: memref<18x24x128xbf16, #tpu.memory_space<vmem>>) attributes {dimension_semantics = [#tpu.dimension_semantics<parallel>, #tpu.dimension_semantics<parallel>], iteration_bounds = array<i64: 2, 1>, scalar_prefetch = 0 : i64, scratch_operands = 1 : i64, tpu.core_type = #tpu.core_type<tc>, window_params = [{transform_indices = @transform_0, window_bounds = array<i64: 1, 256, 128>}, {transform_indices = @transform_1, window_bounds = array<i64: 1, 16, 128>}, {transform_indices = @transform_2, window_bounds = array<i64: 1, 16, 128>}, {pipeline_mode = #tpu.pipeline_mode<synchronous>, transform_indices = @transform_3, window_bounds = array<i64: 128, 128>}, {pipeline_mode = #tpu.pipeline_mode<synchronous>, transform_indices = @transform_4, window_bounds = array<i64: 1, 128>}, {pipeline_mode = #tpu.pipeline_mode<synchronous>, transform_indices = @transform_5, window_bounds = array<i64: 9, 128, 128>}, {pipeline_mode = #tpu.pipeline_mode<synchronous>, transform_indices = @transform_6, window_bounds = array<i64: 1, 128>}, {pipeline_mode = #tpu.pipeline_mode<synchronous>, transform_indices = @transform_7, window_bounds = array<i64: 128, 128>}, {pipeline_mode = #tpu.pipeline_mode<synchronous>, transform_indices = @transform_8, window_bounds = array<i64: 1, 128>}, {transform_indices = @transform_9, window_bounds = array<i64: 1, 256, 128>}]} {
    %c0 = arith.constant 0 : index
    %c0_0 = arith.constant 0 : index
    %c0_1 = arith.constant 0 : index
    %0 = vector.load %arg2[%c0, %c0_0, %c0_1] : memref<1x256x128xbf16, #tpu.memory_space<vmem>>, vector<1x256x128xbf16>
    %1 = vector.shape_cast %0 : vector<1x256x128xbf16> to vector<256x128xbf16>
    %c0_2 = arith.constant 0 : index
    %c0_3 = arith.constant 0 : index
    %2 = vector.load %arg5[%c0_2, %c0_3] : memref<128x128xbf16, #tpu.memory_space<vmem>>, vector<128x128xbf16>
    %cst = arith.constant dense<0.000000e+00> : vector<256x128xf32>
    %3 = tpu.matmul %1, %2, %cst {dimension_numbers = #tpu.dot_dimension_numbers<[1], [0], [0], [1], [0, 0, 1, 1], [], []>} : vector<256x128xbf16>, vector<128x128xbf16>, vector<256x128xf32> -> vector<256x128xf32>
    %c0_4 = arith.constant 0 : index
    %c0_5 = arith.constant 0 : index
    %4 = vector.load %arg6[%c0_4, %c0_5] : memref<1x128xf32, #tpu.memory_space<vmem>>, vector<1x128xf32>
    %5 = vector.broadcast %4 : vector<1x128xf32> to vector<256x128xf32>
    %6 = arith.addf %3, %5 : vector<256x128xf32>
    %cst_6 = arith.constant 0.000000e+00 : f32
    %7 = vector.broadcast %cst_6 : f32 to vector<256x128xf32>
    %8 = arith.maximumf %6, %7 : vector<256x128xf32>
    %9 = arith.truncf %8 : vector<256x128xf32> to vector<256x128xbf16>
    %10 = vector.shape_cast %9 : vector<256x128xbf16> to vector<16x16x128xbf16>
    %c1 = arith.constant 1 : index
    %c1_7 = arith.constant 1 : index
    %c0_8 = arith.constant 0 : index
    %11 = vector.load %arg12[%c1, %c1_7, %c0_8] : memref<18x24x128xbf16, #tpu.memory_space<vmem>>, vector<16x16x128xbf16>
    tpu.vector_store %arg12[%c1, %c1_7, %c0_8], %10 {strides = array<i32>} : memref<18x24x128xbf16, #tpu.memory_space<vmem>>, vector<16x16x128xbf16>,
    %c0_i32 = arith.constant 0 : i32
    %12 = arith.cmpi sgt, %arg1, %c0_i32 : i32
    %13 = arith.extui %12 : i1 to i32
    %c0_i32_9 = arith.constant 0 : i32
    %14 = arith.cmpi ne, %13, %c0_i32_9 : i32
    scf.if %14 {
      %c0_79 = arith.constant 0 : index
      %c0_80 = arith.constant 0 : index
      %c0_81 = arith.constant 0 : index
      %103 = vector.load %arg3[%c0_79, %c0_80, %c0_81] : memref<1x16x128xbf16, #tpu.memory_space<vmem>>, vector<1x16x128xbf16>
      %104 = vector.shape_cast %103 : vector<1x16x128xbf16> to vector<16x128xbf16>
      %c0_82 = arith.constant 0 : index
      %c0_83 = arith.constant 0 : index
      %105 = vector.load %arg5[%c0_82, %c0_83] : memref<128x128xbf16, #tpu.memory_space<vmem>>, vector<128x128xbf16>
      %cst_84 = arith.constant dense<0.000000e+00> : vector<16x128xf32>
      %106 = tpu.matmul %104, %105, %cst_84 {dimension_numbers = #tpu.dot_dimension_numbers<[1], [0], [0], [1], [0, 0, 1, 1], [], []>} : vector<16x128xbf16>, vector<128x128xbf16>, vector<16x128xf32> -> vector<16x128xf32>
      %c0_85 = arith.constant 0 : index
      %c0_86 = arith.constant 0 : index
      %107 = vector.load %arg6[%c0_85, %c0_86] : memref<1x128xf32, #tpu.memory_space<vmem>>, vector<1x128xf32>
      %108 = vector.broadcast %107 : vector<1x128xf32> to vector<16x128xf32>
      %109 = arith.addf %106, %108 : vector<16x128xf32>
      %cst_87 = arith.constant 0.000000e+00 : f32
      %110 = vector.broadcast %cst_87 : f32 to vector<16x128xf32>
      %111 = arith.maximumf %109, %110 : vector<16x128xf32>
      %112 = arith.truncf %111 : vector<16x128xf32> to vector<16x128xbf16>
      %c0_88 = arith.constant 0 : index
      %c1_89 = arith.constant 1 : index
      %c0_90 = arith.constant 0 : index
      %113 = vector.load %arg12[%c0_88, %c1_89, %c0_90] : memref<18x24x128xbf16, #tpu.memory_space<vmem>>, vector<1x16x128xbf16>
      %114 = vector.shape_cast %113 : vector<1x16x128xbf16> to vector<16x128xbf16>
      %115 = vector.shape_cast %112 : vector<16x128xbf16> to vector<1x16x128xbf16>
      tpu.vector_store %arg12[%c0_88, %c1_89, %c0_90], %115 {strides = array<i32>} : memref<18x24x128xbf16, #tpu.memory_space<vmem>>, vector<1x16x128xbf16>,
    } else {
    }
    %c0_i32_10 = arith.constant 0 : i32
    %15 = arith.cmpi eq, %arg1, %c0_i32_10 : i32
    %16 = arith.extui %15 : i1 to i32
    %c0_i32_11 = arith.constant 0 : i32
    %17 = arith.cmpi ne, %16, %c0_i32_11 : i32
    scf.if %17 {
      %cst_79 = arith.constant 0.000000e+00 : bf16
      %103 = vector.broadcast %cst_79 : bf16 to vector<16x128xbf16>
      %c0_80 = arith.constant 0 : index
      %c1_81 = arith.constant 1 : index
      %c0_82 = arith.constant 0 : index
      %104 = vector.load %arg12[%c0_80, %c1_81, %c0_82] : memref<18x24x128xbf16, #tpu.memory_space<vmem>>, vector<1x16x128xbf16>
      %105 = vector.shape_cast %104 : vector<1x16x128xbf16> to vector<16x128xbf16>
      %106 = vector.shape_cast %103 : vector<16x128xbf16> to vector<1x16x128xbf16>
      tpu.vector_store %arg12[%c0_80, %c1_81, %c0_82], %106 {strides = array<i32>} : memref<18x24x128xbf16, #tpu.memory_space<vmem>>, vector<1x16x128xbf16>,
    } else {
    }
    %c0_i32_12 = arith.constant 0 : i32
    %18 = arith.cmpi slt, %arg1, %c0_i32_12 : i32
    %19 = arith.extui %18 : i1 to i32
    %c0_i32_13 = arith.constant 0 : i32
    %20 = arith.cmpi ne, %19, %c0_i32_13 : i32
    scf.if %20 {
      %c0_79 = arith.constant 0 : index
      %c0_80 = arith.constant 0 : index
      %c0_81 = arith.constant 0 : index
      %103 = vector.load %arg4[%c0_79, %c0_80, %c0_81] : memref<1x16x128xbf16, #tpu.memory_space<vmem>>, vector<1x16x128xbf16>
      %104 = vector.shape_cast %103 : vector<1x16x128xbf16> to vector<16x128xbf16>
      %c0_82 = arith.constant 0 : index
      %c0_83 = arith.constant 0 : index
      %105 = vector.load %arg5[%c0_82, %c0_83] : memref<128x128xbf16, #tpu.memory_space<vmem>>, vector<128x128xbf16>
      %cst_84 = arith.constant dense<0.000000e+00> : vector<16x128xf32>
      %106 = tpu.matmul %104, %105, %cst_84 {dimension_numbers = #tpu.dot_dimension_numbers<[1], [0], [0], [1], [0, 0, 1, 1], [], []>} : vector<16x128xbf16>, vector<128x128xbf16>, vector<16x128xf32> -> vector<16x128xf32>
      %c0_85 = arith.constant 0 : index
      %c0_86 = arith.constant 0 : index
      %107 = vector.load %arg6[%c0_85, %c0_86] : memref<1x128xf32, #tpu.memory_space<vmem>>, vector<1x128xf32>
      %108 = vector.broadcast %107 : vector<1x128xf32> to vector<16x128xf32>
      %109 = arith.addf %106, %108 : vector<16x128xf32>
      %cst_87 = arith.constant 0.000000e+00 : f32
      %110 = vector.broadcast %cst_87 : f32 to vector<16x128xf32>
      %111 = arith.maximumf %109, %110 : vector<16x128xf32>
      %112 = arith.truncf %111 : vector<16x128xf32> to vector<16x128xbf16>
      %c17_88 = arith.constant 17 : index
      %c1_89 = arith.constant 1 : index
      %c0_90 = arith.constant 0 : index
      %113 = vector.load %arg12[%c17_88, %c1_89, %c0_90] : memref<18x24x128xbf16, #tpu.memory_space<vmem>>, vector<1x16x128xbf16>
      %114 = vector.shape_cast %113 : vector<1x16x128xbf16> to vector<16x128xbf16>
      %115 = vector.shape_cast %112 : vector<16x128xbf16> to vector<1x16x128xbf16>
      tpu.vector_store %arg12[%c17_88, %c1_89, %c0_90], %115 {strides = array<i32>} : memref<18x24x128xbf16, #tpu.memory_space<vmem>>, vector<1x16x128xbf16>,
    } else {
    }
    %c0_i32_14 = arith.constant 0 : i32
    %21 = arith.cmpi eq, %arg1, %c0_i32_14 : i32
    %22 = arith.extui %21 : i1 to i32
    %c0_i32_15 = arith.constant 0 : i32
    %23 = arith.cmpi ne, %22, %c0_i32_15 : i32
    scf.if %23 {
      %cst_79 = arith.constant 0.000000e+00 : bf16
      %103 = vector.broadcast %cst_79 : bf16 to vector<16x128xbf16>
      %c17_80 = arith.constant 17 : index
      %c1_81 = arith.constant 1 : index
      %c0_82 = arith.constant 0 : index
      %104 = vector.load %arg12[%c17_80, %c1_81, %c0_82] : memref<18x24x128xbf16, #tpu.memory_space<vmem>>, vector<1x16x128xbf16>
      %105 = vector.shape_cast %104 : vector<1x16x128xbf16> to vector<16x128xbf16>
      %106 = vector.shape_cast %103 : vector<16x128xbf16> to vector<1x16x128xbf16>
      tpu.vector_store %arg12[%c17_80, %c1_81, %c0_82], %106 {strides = array<i32>} : memref<18x24x128xbf16, #tpu.memory_space<vmem>>, vector<1x16x128xbf16>,
    } else {
    }
    %cst_16 = arith.constant 0.000000e+00 : bf16
    %24 = vector.broadcast %cst_16 : bf16 to vector<18x1x128xbf16>
    %c0_17 = arith.constant 0 : index
    %c0_18 = arith.constant 0 : index
    %c0_19 = arith.constant 0 : index
    %25 = vector.load %arg12[%c0_17, %c0_18, %c0_19] : memref<18x24x128xbf16, #tpu.memory_space<vmem>>, vector<18x1x128xbf16>
    tpu.vector_store %arg12[%c0_17, %c0_18, %c0_19], %24 {strides = array<i32>} : memref<18x24x128xbf16, #tpu.memory_space<vmem>>, vector<18x1x128xbf16>,
    %cst_20 = arith.constant 0.000000e+00 : bf16
    %26 = vector.broadcast %cst_20 : bf16 to vector<18x7x128xbf16>
    %c0_21 = arith.constant 0 : index
    %c17 = arith.constant 17 : index
    %c0_22 = arith.constant 0 : index
    %27 = vector.load %arg12[%c0_21, %c17, %c0_22] : memref<18x24x128xbf16, #tpu.memory_space<vmem>>, vector<18x7x128xbf16>
    tpu.vector_store %arg12[%c0_21, %c17, %c0_22], %26 {strides = array<i32>} : memref<18x24x128xbf16, #tpu.memory_space<vmem>>, vector<18x7x128xbf16>,
    %cst_23 = arith.constant 0.000000e+00 : f32
    %28 = vector.broadcast %cst_23 : f32 to vector<384x128xf32>
    %cst_24 = arith.constant 0.000000e+00 : f32
    %29 = vector.broadcast %cst_24 : f32 to vector<384x128xf32>
    %cst_25 = arith.constant 0.000000e+00 : f32
    %30 = vector.broadcast %cst_25 : f32 to vector<384x128xf32>
    %c0_26 = arith.constant 0 : index
    %c0_27 = arith.constant 0 : index
    %c0_28 = arith.constant 0 : index
    %31 = vector.load %arg12[%c0_26, %c0_27, %c0_28] : memref<18x24x128xbf16, #tpu.memory_space<vmem>>, vector<16x24x128xbf16>
    %32 = vector.shape_cast %31 : vector<16x24x128xbf16> to vector<384x128xbf16>
    %c0_29 = arith.constant 0 : index
    %c0_30 = arith.constant 0 : index
    %c0_31 = arith.constant 0 : index
    %33 = vector.load %arg7[%c0_29, %c0_30, %c0_31] : memref<9x128x128xbf16, #tpu.memory_space<vmem>>, vector<1x128x128xbf16>
    %34 = vector.shape_cast %33 : vector<1x128x128xbf16> to vector<128x128xbf16>
    %cst_32 = arith.constant dense<0.000000e+00> : vector<384x128xf32>
    %35 = tpu.matmul %32, %34, %cst_32 {dimension_numbers = #tpu.dot_dimension_numbers<[1], [0], [0], [1], [0, 0, 1, 1], [], []>} : vector<384x128xbf16>, vector<128x128xbf16>, vector<384x128xf32> -> vector<384x128xf32>
    %36 = arith.addf %28, %35 : vector<384x128xf32>
    %c1_33 = arith.constant 1 : index
    %c0_34 = arith.constant 0 : index
    %c0_35 = arith.constant 0 : index
    %37 = vector.load %arg7[%c1_33, %c0_34, %c0_35] : memref<9x128x128xbf16, #tpu.memory_space<vmem>>, vector<1x128x128xbf16>
    %38 = vector.shape_cast %37 : vector<1x128x128xbf16> to vector<128x128xbf16>
    %cst_36 = arith.constant dense<0.000000e+00> : vector<384x128xf32>
    %39 = tpu.matmul %32, %38, %cst_36 {dimension_numbers = #tpu.dot_dimension_numbers<[1], [0], [0], [1], [0, 0, 1, 1], [], []>} : vector<384x128xbf16>, vector<128x128xbf16>, vector<384x128xf32> -> vector<384x128xf32>
    %40 = arith.addf %29, %39 : vector<384x128xf32>
    %c2 = arith.constant 2 : index
    %c0_37 = arith.constant 0 : index
    %c0_38 = arith.constant 0 : index
    %41 = vector.load %arg7[%c2, %c0_37, %c0_38] : memref<9x128x128xbf16, #tpu.memory_space<vmem>>, vector<1x128x128xbf16>
    %42 = vector.shape_cast %41 : vector<1x128x128xbf16> to vector<128x128xbf16>
    %cst_39 = arith.constant dense<0.000000e+00> : vector<384x128xf32>
    %43 = tpu.matmul %32, %42, %cst_39 {dimension_numbers = #tpu.dot_dimension_numbers<[1], [0], [0], [1], [0, 0, 1, 1], [], []>} : vector<384x128xbf16>, vector<128x128xbf16>, vector<384x128xf32> -> vector<384x128xf32>
    %44 = arith.addf %30, %43 : vector<384x128xf32>
    %c1_40 = arith.constant 1 : index
    %c0_41 = arith.constant 0 : index
    %c0_42 = arith.constant 0 : index
    %45 = vector.load %arg12[%c1_40, %c0_41, %c0_42] : memref<18x24x128xbf16, #tpu.memory_space<vmem>>, vector<16x24x128xbf16>
    %46 = vector.shape_cast %45 : vector<16x24x128xbf16> to vector<384x128xbf16>
    %c3 = arith.constant 3 : index
    %c0_43 = arith.constant 0 : index
    %c0_44 = arith.constant 0 : index
    %47 = vector.load %arg7[%c3, %c0_43, %c0_44] : memref<9x128x128xbf16, #tpu.memory_space<vmem>>, vector<1x128x128xbf16>
    %48 = vector.shape_cast %47 : vector<1x128x128xbf16> to vector<128x128xbf16>
    %cst_45 = arith.constant dense<0.000000e+00> : vector<384x128xf32>
    %49 = tpu.matmul %46, %48, %cst_45 {dimension_numbers = #tpu.dot_dimension_numbers<[1], [0], [0], [1], [0, 0, 1, 1], [], []>} : vector<384x128xbf16>, vector<128x128xbf16>, vector<384x128xf32> -> vector<384x128xf32>
    %50 = arith.addf %36, %49 : vector<384x128xf32>
    %c4 = arith.constant 4 : index
    %c0_46 = arith.constant 0 : index
    %c0_47 = arith.constant 0 : index
    %51 = vector.load %arg7[%c4, %c0_46, %c0_47] : memref<9x128x128xbf16, #tpu.memory_space<vmem>>, vector<1x128x128xbf16>
    %52 = vector.shape_cast %51 : vector<1x128x128xbf16> to vector<128x128xbf16>
    %cst_48 = arith.constant dense<0.000000e+00> : vector<384x128xf32>
    %53 = tpu.matmul %46, %52, %cst_48 {dimension_numbers = #tpu.dot_dimension_numbers<[1], [0], [0], [1], [0, 0, 1, 1], [], []>} : vector<384x128xbf16>, vector<128x128xbf16>, vector<384x128xf32> -> vector<384x128xf32>
    %54 = arith.addf %40, %53 : vector<384x128xf32>
    %c5 = arith.constant 5 : index
    %c0_49 = arith.constant 0 : index
    %c0_50 = arith.constant 0 : index
    %55 = vector.load %arg7[%c5, %c0_49, %c0_50] : memref<9x128x128xbf16, #tpu.memory_space<vmem>>, vector<1x128x128xbf16>
    %56 = vector.shape_cast %55 : vector<1x128x128xbf16> to vector<128x128xbf16>
    %cst_51 = arith.constant dense<0.000000e+00> : vector<384x128xf32>
    %57 = tpu.matmul %46, %56, %cst_51 {dimension_numbers = #tpu.dot_dimension_numbers<[1], [0], [0], [1], [0, 0, 1, 1], [], []>} : vector<384x128xbf16>, vector<128x128xbf16>, vector<384x128xf32> -> vector<384x128xf32>
    %58 = arith.addf %44, %57 : vector<384x128xf32>
    %c2_52 = arith.constant 2 : index
    %c0_53 = arith.constant 0 : index
    %c0_54 = arith.constant 0 : index
    %59 = vector.load %arg12[%c2_52, %c0_53, %c0_54] : memref<18x24x128xbf16, #tpu.memory_space<vmem>>, vector<16x24x128xbf16>
    %60 = vector.shape_cast %59 : vector<16x24x128xbf16> to vector<384x128xbf16>
    %c6 = arith.constant 6 : index
    %c0_55 = arith.constant 0 : index
    %c0_56 = arith.constant 0 : index
    %61 = vector.load %arg7[%c6, %c0_55, %c0_56] : memref<9x128x128xbf16, #tpu.memory_space<vmem>>, vector<1x128x128xbf16>
    %62 = vector.shape_cast %61 : vector<1x128x128xbf16> to vector<128x128xbf16>
    %cst_57 = arith.constant dense<0.000000e+00> : vector<384x128xf32>
    %63 = tpu.matmul %60, %62, %cst_57 {dimension_numbers = #tpu.dot_dimension_numbers<[1], [0], [0], [1], [0, 0, 1, 1], [], []>} : vector<384x128xbf16>, vector<128x128xbf16>, vector<384x128xf32> -> vector<384x128xf32>
    %64 = arith.addf %50, %63 : vector<384x128xf32>
    %c7 = arith.constant 7 : index
    %c0_58 = arith.constant 0 : index
    %c0_59 = arith.constant 0 : index
    %65 = vector.load %arg7[%c7, %c0_58, %c0_59] : memref<9x128x128xbf16, #tpu.memory_space<vmem>>, vector<1x128x128xbf16>
    %66 = vector.shape_cast %65 : vector<1x128x128xbf16> to vector<128x128xbf16>
    %cst_60 = arith.constant dense<0.000000e+00> : vector<384x128xf32>
    %67 = tpu.matmul %60, %66, %cst_60 {dimension_numbers = #tpu.dot_dimension_numbers<[1], [0], [0], [1], [0, 0, 1, 1], [], []>} : vector<384x128xbf16>, vector<128x128xbf16>, vector<384x128xf32> -> vector<384x128xf32>
    %68 = arith.addf %54, %67 : vector<384x128xf32>
    %c8 = arith.constant 8 : index
    %c0_61 = arith.constant 0 : index
    %c0_62 = arith.constant 0 : index
    %69 = vector.load %arg7[%c8, %c0_61, %c0_62] : memref<9x128x128xbf16, #tpu.memory_space<vmem>>, vector<1x128x128xbf16>
    %70 = vector.shape_cast %69 : vector<1x128x128xbf16> to vector<128x128xbf16>
    %cst_63 = arith.constant dense<0.000000e+00> : vector<384x128xf32>
    %71 = tpu.matmul %60, %70, %cst_63 {dimension_numbers = #tpu.dot_dimension_numbers<[1], [0], [0], [1], [0, 0, 1, 1], [], []>} : vector<384x128xbf16>, vector<128x128xbf16>, vector<384x128xf32> -> vector<384x128xf32>
    %72 = arith.addf %58, %71 : vector<384x128xf32>
    %73 = vector.shape_cast %64 : vector<384x128xf32> to vector<16x24x128xf32>
    %74 = vector.shape_cast %68 : vector<384x128xf32> to vector<16x24x128xf32>
    %75 = vector.shape_cast %72 : vector<384x128xf32> to vector<16x24x128xf32>
    %76 = vector.extract_strided_slice %73 {offsets = [0, 0, 0], sizes = [16, 16, 128], strides = [1, 1, 1]} : vector<16x24x128xf32> to vector<16x16x128xf32>
    %77 = vector.extract_strided_slice %74 {offsets = [0, 1, 0], sizes = [16, 16, 128], strides = [1, 1, 1]} : vector<16x24x128xf32> to vector<16x16x128xf32>
    %78 = arith.addf %76, %77 : vector<16x16x128xf32>
    %79 = vector.extract_strided_slice %75 {offsets = [0, 2, 0], sizes = [16, 16, 128], strides = [1, 1, 1]} : vector<16x24x128xf32> to vector<16x16x128xf32>
    %80 = arith.addf %78, %79 : vector<16x16x128xf32>
    %81 = vector.shape_cast %80 : vector<16x16x128xf32> to vector<256x128xf32>
    %c0_64 = arith.constant 0 : index
    %c0_65 = arith.constant 0 : index
    %82 = vector.load %arg8[%c0_64, %c0_65] : memref<1x128xf32, #tpu.memory_space<vmem>>, vector<1x128xf32>
    %83 = vector.broadcast %82 : vector<1x128xf32> to vector<256x128xf32>
    %84 = arith.addf %81, %83 : vector<256x128xf32>
    %cst_66 = arith.constant 0.000000e+00 : f32
    %85 = vector.broadcast %cst_66 : f32 to vector<256x128xf32>
    %86 = arith.maximumf %84, %85 : vector<256x128xf32>
    %87 = arith.truncf %86 : vector<256x128xf32> to vector<256x128xbf16>
    %c0_67 = arith.constant 0 : index
    %c0_68 = arith.constant 0 : index
    %88 = vector.load %arg9[%c0_67, %c0_68] : memref<128x128xbf16, #tpu.memory_space<vmem>>, vector<128x128xbf16>
    %cst_69 = arith.constant dense<0.000000e+00> : vector<256x128xf32>
    %89 = tpu.matmul %87, %88, %cst_69 {dimension_numbers = #tpu.dot_dimension_numbers<[1], [0], [0], [1], [0, 0, 1, 1], [], []>} : vector<256x128xbf16>, vector<128x128xbf16>, vector<256x128xf32> -> vector<256x128xf32>
    %c0_70 = arith.constant 0 : index
    %c0_71 = arith.constant 0 : index
    %90 = vector.load %arg10[%c0_70, %c0_71] : memref<1x128xf32, #tpu.memory_space<vmem>>, vector<1x128xf32>
    %91 = vector.broadcast %90 : vector<1x128xf32> to vector<256x128xf32>
    %92 = arith.addf %89, %91 : vector<256x128xf32>
    %c0_72 = arith.constant 0 : index
    %c0_73 = arith.constant 0 : index
    %c0_74 = arith.constant 0 : index
    %93 = vector.load %arg2[%c0_72, %c0_73, %c0_74] : memref<1x256x128xbf16, #tpu.memory_space<vmem>>, vector<1x256x128xbf16>
    %94 = vector.shape_cast %93 : vector<1x256x128xbf16> to vector<256x128xbf16>
    %95 = arith.extf %94 : vector<256x128xbf16> to vector<256x128xf32>
    %96 = arith.addf %92, %95 : vector<256x128xf32>
    %cst_75 = arith.constant 0.000000e+00 : f32
    %97 = vector.broadcast %cst_75 : f32 to vector<256x128xf32>
    %98 = arith.maximumf %96, %97 : vector<256x128xf32>
    %99 = arith.truncf %98 : vector<256x128xf32> to vector<256x128xbf16>
    %c0_76 = arith.constant 0 : index
    %c0_77 = arith.constant 0 : index
    %c0_78 = arith.constant 0 : index
    %100 = vector.load %arg11[%c0_76, %c0_77, %c0_78] : memref<1x256x128xbf16, #tpu.memory_space<vmem>>, vector<1x256x128xbf16>
    %101 = vector.shape_cast %100 : vector<1x256x128xbf16> to vector<256x128xbf16>
    %102 = vector.shape_cast %99 : vector<256x128xbf16> to vector<1x256x128xbf16>
    tpu.vector_store %arg11[%c0_76, %c0_77, %c0_78], %102 {strides = array<i32>} : memref<1x256x128xbf16, #tpu.memory_space<vmem>>, vector<1x256x128xbf16>,
    return
  }
  func.func @transform_0(%arg0: i32, %arg1: i32) -> (i32, i32, i32) {
    %c0_i32 = arith.constant 0 : i32
    %c0_i32_0 = arith.constant 0 : i32
    return %arg0, %arg1, %c0_i32 : i32, i32, i32
  }
  func.func @transform_1(%arg0: i32, %arg1: i32) -> (i32, i32, i32) {
    %c16_i32 = arith.constant 16 : i32
    %0 = arith.muli %arg1, %c16_i32 : i32
    %c1_i32 = arith.constant 1 : i32
    %1 = arith.subi %0, %c1_i32 : i32
    %c0_i32 = arith.constant 0 : i32
    %2 = arith.maxsi %1, %c0_i32 : i32
    %c0_i32_0 = arith.constant 0 : i32
    %c0_i32_1 = arith.constant 0 : i32
    return %arg0, %2, %c0_i32_0 : i32, i32, i32
  }
  func.func @transform_2(%arg0: i32, %arg1: i32) -> (i32, i32, i32) {
    %c1_i32 = arith.constant 1 : i32
    %0 = arith.addi %arg1, %c1_i32 : i32
    %c16_i32 = arith.constant 16 : i32
    %1 = arith.muli %0, %c16_i32 : i32
    %c15_i32 = arith.constant 15 : i32
    %2 = arith.minsi %1, %c15_i32 : i32
    %c0_i32 = arith.constant 0 : i32
    %c0_i32_0 = arith.constant 0 : i32
    return %arg0, %2, %c0_i32 : i32, i32, i32
  }
  func.func @transform_3(%arg0: i32, %arg1: i32) -> (i32, i32) {
    %c0_i32 = arith.constant 0 : i32
    %c0_i32_0 = arith.constant 0 : i32
    %c0_i32_1 = arith.constant 0 : i32
    return %c0_i32, %c0_i32_0 : i32, i32
  }
  func.func @transform_4(%arg0: i32, %arg1: i32) -> (i32, i32) {
    %c0_i32 = arith.constant 0 : i32
    %c0_i32_0 = arith.constant 0 : i32
    %c0_i32_1 = arith.constant 0 : i32
    return %c0_i32, %c0_i32_0 : i32, i32
  }
  func.func @transform_5(%arg0: i32, %arg1: i32) -> (i32, i32, i32) {
    %c0_i32 = arith.constant 0 : i32
    %c0_i32_0 = arith.constant 0 : i32
    %c0_i32_1 = arith.constant 0 : i32
    %c0_i32_2 = arith.constant 0 : i32
    return %c0_i32, %c0_i32_0, %c0_i32_1 : i32, i32, i32
  }
  func.func @transform_6(%arg0: i32, %arg1: i32) -> (i32, i32) {
    %c0_i32 = arith.constant 0 : i32
    %c0_i32_0 = arith.constant 0 : i32
    %c0_i32_1 = arith.constant 0 : i32
    return %c0_i32, %c0_i32_0 : i32, i32
  }
  func.func @transform_7(%arg0: i32, %arg1: i32) -> (i32, i32) {
    %c0_i32 = arith.constant 0 : i32
    %c0_i32_0 = arith.constant 0 : i32
    %c0_i32_1 = arith.constant 0 : i32
    return %c0_i32, %c0_i32_0 : i32, i32
  }
  func.func @transform_8(%arg0: i32, %arg1: i32) -> (i32, i32) {
    %c0_i32 = arith.constant 0 : i32
    %c0_i32_0 = arith.constant 0 : i32
    %c0_i32_1 = arith.constant 0 : i32
    return %c0_i32, %c0_i32_0 : i32, i32
  }
  func.func @transform_9(%arg0: i32, %arg1: i32) -> (i32, i32, i32) {
    %c0_i32 = arith.constant 0 : i32
    %c0_i32_0 = arith.constant 0 : i32
    return %arg0, %arg1, %c0_i32 : i32, i32, i32
  }
}

</mosaic_0001>

<bundles_post_ra>
// kernel: _lambda_.1
= control target key start
LH: loop header
LB: loop body
LE: loop exit
PB: predicated region body
PF: predicated region fallthrough
CT: control target
= control target key end

     0   :  { %14 = vsyncpa [#allocation4], 0  ;;  %s10124_s0 = inlined_call_operand.vmem [shape: bf16[2,256,128], index: 0, kind: input, shape index: {}, may-alias: {0,1,2}]   ;;  %s10125_s1 = inlined_call_operand.vmem [shape: bf16[2,256,128], index: 1, kind: input, shape index: {}, may-alias: {0,1,2}]   ;;  %s10126_s2 = inlined_call_operand.vmem [shape: bf16[2,256,128], index: 2, kind: input, shape index: {}, may-alias: {0,1,2}]   ;;  %s10127_s3 = inlined_call_operand.vmem [shape: bf16[128,128], index: 3, kind: input, shape index: {}]   ;;  %s10128_s4 = inlined_call_operand.vmem [shape: f32[1,128], index: 4, kind: input, shape index: {}]   ;;  %s10129_s5 = inlined_call_operand.vmem [shape: bf16[9,128,128], index: 5, kind: input, shape index: {}]   ;;  %s10130_s6 = inlined_call_operand.vmem [shape: f32[1,128], index: 6, kind: input, shape index: {}]   ;;  %s10131_s7 = inlined_call_operand.vmem [shape: bf16[128,128], index: 7, kind: input, shape index: {}]   ;;  %s10132_s8 = inlined_call_operand.vmem [shape: f32[1,128], index: 8, kind: input, shape index: {}]   ;;  %s10133_s9 = inlined_call_operand.hbm [shape: bf16[2,256,128], index: 9, kind: output, shape index: {}]  }
   0x1   :  { %16 = vsyncpa [#allocation4 + $0x1], 0  ;;  %s8329_s28 = smov 0   ;;  %s8331_s29 = smov 0  }
   0x2   :  { %s8333_s30 = smov 0   ;;  %s8335_s10 = smov 0  }
   0x3   :  { %s8337_s11 = smov 0   ;;  %s8339_s12 = smov 0  }
   0x4 LB: > { %s6259_s13 = sadd.s32 4294967295, %s8273_s12   ;;  %s6260_s14 = sadd.s32 4294967294, %s8273_s12   ;;  %s8273_s12 = sphi %s8339_s12, %s22_s12   ;;  %s8269_s11 = sphi %s8337_s11, %s10346_s11   ;;  %s8265_s10 = sphi %s8335_s10, %s10345_s10   ;;  %s8261_s30 = sphi %s8333_s30, %s10344_s30   ;;  %s8257_s29 = sphi %s8331_s29, %s10343_s29   ;;  %s8253_s28 = sphi %s8329_s28, %s10342_s28  }
   0x5   : > { %s34_s15 = sadd.s32 1, %s8269_s11  ;;  %s269_s16 = sadd.s32 1, %s8261_s30 }
   0x6   : > { %p36_p0 = scmp.ge.s32.totalorder %s34_s15, 2  ;;  %p279_p1 = scmp.ne.s32.totalorder %s8261_s30, %s8257_s29 }
   0x7   : > { %p280_p2 = scmp.eq.s32.totalorder %s6259_s13, 1  ;;  %p285_p3 = scmp.ne.s32.totalorder %s8257_s29, %s8253_s28 }
   0x8   : > { %s10348_s15 = smov (%p36_p0, %s34_s15), 0  ;;  %p286_p5 = scmp.eq.s32.totalorder %s6260_s14, 1 }
   0x9   : > { %p8369_p4 = por %p280_p2, %p279_p1  ;;  %s264_s18 = ssub.s32 %s8269_s11, %s10348_s15 }
   0xa   : > { %p6263_p6 = scmp.ge.s32.totalorder %s8273_s12, 1  ;;  %p267_p7 = scmp.eq.s32.totalorder %s264_s18, 0 }
   0xb   : > { %p8376_p8 = por %p286_p5, %p285_p3  ;;  %p377_p9 = scmp.lt.s32.totalorder %s8273_s12, 3 }
   0xc   : > { %s8382_s20 = scalar_select %p267_p7, %s8261_s30, %s269_s16  }
   0xd   : > { %p378_p10 = pnand %p6263_p6, %p377_p9 }
   0xf   : > { %381 = sbr.rel (%p378_p10) target bundleno = 1195 (0x4ab), region = 56 }
  0x14   : > { %v8000_v0 = vld [vmem:[%s10127_s3 + $0x38] sm:$0xff]   ;;  %p444_p11 = scmp.lt.s32.totalorder %s8265_s10, 1  ;;  %v8001_v1 = vld [vmem:[%s10127_s3 + $0x30] sm:$0xff]   ;;  %v8002_v2 = vld [vmem:[%s10127_s3 + $0x28] sm:$0xff]   ;;  %vm1303_vm0 = vcmask 1043456   ;;  %vm1310_vm3 = vcmask 1040384  }
  0x15   : > { %7254 = vmatprep.subr.bf16.mxu0 %v8000_v0  ;;  %v8003_v3 = vld [vmem:[%s10127_s3 + $0x20] sm:$0xff]   ;;  %v8004_v5 = vld [vmem:[%s10127_s3 + $0x18] sm:$0xff]   ;;  %v8005_v6 = vld [vmem:[%s10127_s3 + $0x10] sm:$0xff]   ;;  %vm1304_vm1 = vsmask.f32 7938  ;;  %v8275_v45 = vmov 0  }
  0x16   : > { %s445_s25 = scalar_select %p444_p11, %s8265_s10, 1  ;;  %7255 = vmatpush3.bf16.msra.mxu0 %v8000_v0  ;;  %v8006_v7 = vld [vmem:[%s10127_s3 + $0x8] sm:$0xff]   ;;  %v8007_v8 = vld [vmem:[%s10127_s3] sm:$0xff]   ;;  %v8024_v24 = vld [vmem:[%s10129_s5 + $0x38] sm:$0xff]   ;;  %vm979_vm2 = vsmask.f32 256 }
  0x17   : > { %7256 = vmatprep.subr.bf16.mxu0 %v8001_v1  ;;  %v8025_v25 = vld [vmem:[%s10129_s5 + $0xf8] sm:$0xff]   ;;  %v8026_v26 = vld [vmem:[%s10129_s5 + $0x30] sm:$0xff]   ;;  %v8028_v28 = vld [vmem:[%s10129_s5 + $0x28] sm:$0xff]   ;;  %1586 = vst [vmem:[#allocation2 + $0x4] sm:$0xf] %v8275_v45  ;;  %vm5183_vm8 = vcmask 1046528  }
  0x18   : > { %s6671_s27 = sshll.u32 %s445_s25, 7  ;;  %7302 = vmatprep.subr.bf16.mxu1 %v8025_v25  ;;  %v8027_v27 = vld [vmem:[%s10129_s5 + $0xf0] sm:$0xff]   ;;  %v8029_v29 = vld [vmem:[%s10129_s5 + $0xe8] sm:$0xff]   ;;  %v8030_v30 = vld [vmem:[%s10129_s5 + $0x20] sm:$0xff]   ;;  %1757 = vst [vmem:[#allocation2 + $0xd0] sm:$0xf] %v8275_v45 }
  0x19   : > { %s8398_s14 = scalar_lea.vmem %s10124_s0, %s6671_s27  ;;  %7303 = vmatpush3.bf16.msra.mxu1 %v8025_v25  ;;  %vm8452_vm4 = vmand %vm1303_vm0, %vm1304_vm1  ;;  %v8031_v32 = vld [vmem:[%s10129_s5 + $0xe0] sm:$0xff]   ;;  %v8032_v33 = vld [vmem:[%s10129_s5 + $0x18] sm:$0xff]   ;;  %vm980_vm6 = vsmask.f32 4368  ;;  %vm5376_vm9 = vcmask 1045504   ;;  %s440_s2 = sand.u32 1, %s8257_s29  }
  0x1a   : > { %7257 = vmatpush3.bf16.msra.mxu0 %v8001_v1  ;;  %v8008_v4 = vld [vmem:[%s8398_s14] sm:$0xff]   ;;  %v8009_v9 = vld [vmem:[%s8398_s14 + $0x8] sm:$0xff]   ;;  %v8010_v10 = vld [vmem:[%s8398_s14 + $0x10] sm:$0xff]   ;;  %7304 = vmatprep.subr.bf16.mxu1 %v8027_v27  ;;  %s6264_s13 = sshll.u32 %s440_s2, 7  ;;  %s10079_s24 = scalar_lea.sflag [#allocation4], %s440_s2 }
  0x1b   : > { %7258 = vmatprep.subr.bf16.mxu0 %v8002_v2  ;;  %7270 = vmatprep.mubr.bf16.mxu0 %v8008_v4  ;;  %v8011_v11 = vld [vmem:[%s8398_s14 + $0x18] sm:$0xff]   ;;  %v8012_v12 = vld [vmem:[%s8398_s14 + $0x20] sm:$0xff]   ;;  %v8013_v13 = vld [vmem:[%s8398_s14 + $0x28] sm:$0xff]   ;;  %s10012_s16 = scalar_lea.vmem [#allocation3], %s6264_s13  ;;  %s8276_s25 = smov [#allocation3]  }
  0x1c   : > { %v8014_v14 = vld [vmem:[%s8398_s14 + $0x30] sm:$0xff]   ;;  %v8015_v15 = vld [vmem:[%s8398_s14 + $0x38] sm:$0xff]   ;;  %v8016_v16 = vld [vmem:[%s8398_s14 + $0x40] sm:$0xff]   ;;  %s6144_s18 = sshll.u32 %s10012_s16, 4  ;;  %s8201_s26 = sshll.u32 %s8276_s25, 4  ;;  %s10073_s18 = int_to_ptr.vmem [resolvable:$true] %s6144_s18  ;;  %s8202_s26 = int_to_ptr.vmem [resolvable:$false] %s8201_s26 }
  0x1d   : > { %v8017_v17 = vld [vmem:[%s8398_s14 + $0x48] sm:$0xff]   ;;  %v8018_v18 = vld [vmem:[%s8398_s14 + $0x50] sm:$0xff]   ;;  %v8019_v19 = vld [vmem:[%s8398_s14 + $0x58] sm:$0xff]   ;;  %7305 = vmatpush3.bf16.msra.mxu1 %v8027_v27  ;;  %s8203_s1 = scalar_lea.vmem %s8202_s26, 4096  ;;  %p8204_p1 = scmp.lt.s32.totalorder %s10073_s18, %s8202_s26 }
  0x1e   : > { %7259 = vmatpush3.bf16.msra.mxu0 %v8002_v2  ;;  %v8020_v20 = vld [vmem:[%s8398_s14 + $0x60] sm:$0xff]   ;;  %v8021_v21 = vld [vmem:[%s8398_s14 + $0x68] sm:$0xff]   ;;  %v8022_v22 = vld [vmem:[%s8398_s14 + $0x70] sm:$0xff]   ;;  %7306 = vmatprep.subr.bf16.mxu1 %v8029_v29 }
  0x1f   : > { %7260 = vmatprep.subr.bf16.mxu0 %v8003_v3  ;;  %v8023_v23 = vld [vmem:[%s8398_s14 + $0x78] sm:$0xff]   ;;  %vm8463_vm5 = vmand %vm1310_vm3, %vm979_vm2  ;;  %v1583_v35 = vld [vmem:[#allocation2] sm:$0xf] }
  0x20   : > { %v1584_v36 = vsel %vm8452_vm4, 0, %v1583_v35  ;;  %v1587_v37 = vld [vmem:[#allocation2 + $0x8] sm:$0x1]  ;;  %v8033_v39 = vld [vmem:[%s10129_s5 + $0xd8] sm:$0xff]   ;;  %v8034_v40 = vld [vmem:[%s10129_s5 + $0x10] sm:$0xff]  }
  0x21   : > { %7307 = vmatpush3.bf16.msra.mxu1 %v8029_v29  ;;  %1585 = vst [vmem:[#allocation2] sm:$0xf] %v1584_v36  ;;  %v1588_v38 = vsel %vm8463_vm5, 0, %v1587_v37  ;;  %v8035_v42 = vld [vmem:[%s10129_s5 + $0xd0] sm:$0xff]   ;;  %v8036_v43 = vld [vmem:[%s10129_s5 + $0x8] sm:$0xff]   ;;  %v8038_v49 = vld [vmem:[%s10129_s5] sm:$0xff]  }
  0x22   : > { %7261 = vmatpush3.bf16.msra.mxu0 %v8003_v3  ;;  %7308 = vmatprep.subr.bf16.mxu1 %v8031_v32  ;;  %1589 = vst [vmem:[#allocation2 + $0x8] sm:$0x1] %v1588_v38  ;;  %v8037_v48 = vld [vmem:[%s10129_s5 + $0xc8] sm:$0xff]   ;;  %v8039_v50 = vld [vmem:[%s10129_s5 + $0xc0] sm:$0xff]   ;;  %v8499_v52 = vld [vmem:[%s10129_s5 + $0x138] sm:$0xff]  }
  0x23   : > { %7262 = vmatprep.subr.bf16.mxu0 %v8004_v5  ;;  %v8505_v53 = vld [vmem:[%s10129_s5 + $0x78] sm:$0xff]   ;;  %v8511_v54 = vld [vmem:[%s10128_s4] ss:$0 sm:$0xff]  ;;  %vm8523_vm7 = vmor %vm979_vm2, %vm980_vm6 }
  0x25   : > { %7309 = vmatpush3.bf16.msra.mxu1 %v8031_v32 }
  0x26   : > { %7263 = vmatpush3.bf16.msra.mxu0 %v8004_v5  ;;  %7310 = vmatprep.subr.bf16.mxu1 %v8033_v39 }
  0x27   : > { %7264 = vmatprep.subr.bf16.mxu0 %v8005_v6 }
  0x28   : > { %v1761_v41 = vld [vmem:[#allocation2] sm:$0x1] }
  0x29   : > { %7311 = vmatpush3.bf16.msra.mxu1 %v8033_v39  ;;  %v1762_v44 = vsel %vm8463_vm5, 0, %v1761_v41  ;;  %v1815_v46 = vld [vmem:[#allocation2 + $0x8] sm:$0xf] }
  0x2a   : > { %7265 = vmatpush3.bf16.msra.mxu0 %v8005_v6  ;;  %1763 = vst [vmem:[#allocation2] sm:$0x1] %v1762_v44  ;;  %7312 = vmatprep.subr.bf16.mxu1 %v8035_v42  ;;  %v1816_v47 = vsel %vm8452_vm4, 0, %v1815_v46 }
  0x2b   : > { %7266 = vmatprep.subr.bf16.mxu0 %v8006_v7  ;;  %1817 = vst [vmem:[#allocation2 + $0x8] sm:$0xf] %v1816_v47 }
  0x2d   : > { %7313 = vmatpush3.bf16.msra.mxu1 %v8035_v42 }
  0x2e   : > { %7267 = vmatpush3.bf16.msra.mxu0 %v8006_v7  ;;  %7314 = vmatprep.subr.bf16.mxu1 %v8037_v48 }
  0x2f   : > { %7268 = vmatprep.subr.bf16.mxu0 %v8007_v8 }
  0x31   : > { %7315 = vmatpush3.bf16.msra.mxu1 %v8037_v48  ;;  %v8040_v51 = vld [vmem:[#allocation2] sm:$0xff]  }
  0x32   : > { %7269 = vmatpush3.bf16.msra.mxu0 %v8007_v8  ;;  %7316 = vmatprep.subr.bf16.mxu1 %v8039_v50 }
  0x33   : > { %7366 = vmatprep.subr.bf16.mxu0 %v8024_v24 }
  0x35   : > { %7271 = vmatmul.mubr.bf16.vlgmr.msra.gmra.mxu0 %v8009_v9  ;;  %7317 = vmatpush3.bf16.msra.mxu1 %v8039_v50 }
  0x36   : > { %7274 = vmatprep.mubr.bf16.mxu0 %v8010_v10  ;;  %7367 = vmatpush3.bf16.msra.mxu0 %v8024_v24  ;;  %v1315_v10 = vld [vmem:[#allocation2 + $0x18] sm:$0xf] }
  0x37   : > { %7368 = vmatprep.subr.bf16.mxu0 %v8026_v26  ;;  %7430 = vmatprep.subr.bf16.mxu1 %v8499_v52 }
  0x3a   : > { %7369 = vmatpush3.bf16.msra.mxu0 %v8026_v26 }
  0x3b   : > { %7370 = vmatprep.subr.bf16.mxu0 %v8028_v28 }
  0x3d   : > { %7275 = vmatmul.mubr.bf16.gmra.mxu0 %v8011_v11 }
  0x3e   : > { %7278 = vmatprep.mubr.bf16.mxu0 %v8012_v12  ;;  %7371 = vmatpush3.bf16.msra.mxu0 %v8028_v28 }
  0x3f   : > { %7372 = vmatprep.subr.bf16.mxu0 %v8030_v30 }
  0x42   : > { %7373 = vmatpush3.bf16.msra.mxu0 %v8030_v30  ;;  %v1319_v30 = vld [vmem:[#allocation2 + $0x20] sm:$0x1] }
  0x43   : > { %7374 = vmatprep.subr.bf16.mxu0 %v8032_v33 }
  0x45   : > { %7279 = vmatmul.mubr.bf16.gmra.mxu0 %v8013_v13 }
  0x46   : > { %7282 = vmatprep.mubr.bf16.mxu0 %v8014_v14  ;;  %7375 = vmatpush3.bf16.msra.mxu0 %v8032_v33 }
  0x47   : > { %7376 = vmatprep.subr.bf16.mxu0 %v8034_v40 }
  0x4a   : > { %7377 = vmatpush3.bf16.msra.mxu0 %v8034_v40 }
  0x4b   : > { %7378 = vmatprep.subr.bf16.mxu0 %v8036_v43 }
  0x4d   : > { %7283 = vmatmul.mubr.bf16.gmra.mxu0 %v8015_v15 }
  0x4e   : > { %7286 = vmatprep.mubr.bf16.mxu0 %v8016_v16  ;;  %7379 = vmatpush3.bf16.msra.mxu0 %v8036_v43 }
  0x4f   : > { %7380 = vmatprep.subr.bf16.mxu0 %v8038_v49 }
  0x52   : > { %7381 = vmatpush3.bf16.msra.mxu0 %v8038_v49  ;;  %v1312_v49 = vld [vmem:[#allocation2 + $0x14] sm:$0x1] }
  0x53   : > { %7494 = vmatprep.subr.bf16.mxu0 %v8505_v53 }
  0x55   : > { %7287 = vmatmul.mubr.bf16.gmra.mxu0 %v8017_v17 }
  0x56   : > { %7290 = vmatprep.mubr.bf16.mxu0 %v8018_v18 }
  0x5d   : > { %7291 = vmatmul.mubr.bf16.gmra.mxu0 %v8019_v19  ;;  %v1306_v19 = vld [vmem:[#allocation2 + $0xc] sm:$0xf] }
  0x5e   : > { %7294 = vmatprep.mubr.bf16.mxu0 %v8020_v20 }
  0x65   : > { %7295 = vmatmul.mubr.bf16.gmra.mxu0 %v8021_v21 }
  0x66   : > { %7298 = vmatprep.mubr.bf16.mxu0 %v8022_v22 }
  0x6d   : > { %7299 = vmatmul.mubr.bf16.gmra.mxu0 %v8023_v23 }
  0x6e   : > { %7382 = vmatprep.mubr.bf16.mxu0 %v8040_v51 }
  0xf5   : > { %v7272_v55 = vpop.f32.mrf.mxu0 }
  0xf6   : > { %v733_v56 = vadd.f32 %v7272_v55, %v8511_v54 }
  0xf7   : > { %v724_v57 = vpop.f32.mrf.mxu0 }
  0xf8   : > { %v853_v58 = vmax.f32 %v733_v56, 0.0  ;;  %v725_v59 = vadd.f32 %v8511_v54, %v724_v57 }
  0xf9   : > { %v7273_v60 = vpop.f32.mrf.mxu0 }
  0xfa   : > { %v6677_v61 = vpack.c.bf16 %v853_v58, %v853_v58  ;;  %v851_v62 = vmax.f32 %v725_v59, 0.0  ;;  %v736_v63 = vadd.f32 %v7273_v60, %v8511_v54  ;;  %v1329_v60 = vld [vmem:[#allocation2 + $0x30] sm:$0xf] }
  0xfb   : > { %v727_v0 = vpop.f32.mrf.mxu0 }
  0xfc   : > { %v1000_v1 = vshrl.u32 %v6677_v61, 16  ;;  %v6675_v2 = vpack.c.bf16 %v851_v62, %v851_v62  ;;  %v854_v3 = vmax.f32 %v736_v63, 0.0  ;;  %v728_v4 = vadd.f32 %v8511_v54, %v727_v0 }
  0xfd   : > { %v7276_v5 = vpop.f32.mrf.mxu0  ;;  %v1003_v7 = vshll.u32 %v6677_v61, 16 }
  0xfe   : > { %v1002_v6 = vrot.slane %v1000_v1, 7  ;;  %v983_v8 = vshrl.u32 %v6675_v2, 16  ;;  %v6678_v9 = vpack.c.bf16 %v854_v3, %v854_v3  ;;  %v986_v11 = vshll.u32 %v6675_v2, 16 }
  0xff   : > { %v852_v12 = vmax.f32 %v728_v4, 0.0  ;;  %v749_v13 = vadd.f32 %v7276_v5, %v8511_v54  ;;  %v740_v14 = vpop.f32.mrf.mxu0 }
 0x100   : > { %v1005_v15 = vor.u32 %v1003_v7, %v1002_v6  ;;  %v1006_v16 = vrot.slane %v1002_v6, 4  ;;  %v985_v17 = vrot.slane %v983_v8, 7  ;;  %v1008_v18 = vshrl.u32 %v6678_v9, 16 }
 0x101   : > { %v1011_v20 = vshll.u32 %v6678_v9, 16  ;;  %v6676_v21 = vpack.c.bf16 %v852_v12, %v852_v12  ;;  %v857_v22 = vmax.f32 %v749_v13, 0.0  ;;  %v741_v23 = vadd.f32 %v8511_v54, %v740_v14  ;;  %v7277_v24 = vpop.f32.mrf.mxu0  ;;  %v1322_v13 = vld [vmem:[#allocation2 + $0x24] sm:$0xf]  ;;  %v1333_v14 = vld [vmem:[#allocation2 + $0x38] sm:$0x1] }
 0x102   : > { %v1316_v25 = vsel %vm8452_vm4, %v1005_v15, %v1315_v10  ;;  %v988_v26 = vor.u32 %v986_v11, %v985_v17  ;;  %v989_v27 = vrot.slane %v985_v17, 4  ;;  %v1010_v28 = vrot.slane %v1008_v18, 7 }
 0x103   : > { %1317 = vst [vmem:[#allocation2 + $0x18] sm:$0xf] %v1316_v25  ;;  %v991_v32 = vshrl.u32 %v6676_v21, 16  ;;  %v994_v33 = vshll.u32 %v6676_v21, 16  ;;  %v6681_v35 = vpack.c.bf16 %v857_v22, %v857_v22  ;;  %v855_v36 = vmax.f32 %v741_v23, 0.0  ;;  %v743_v37 = vpop.f32.mrf.mxu0 }
 0x104   : > { %v1307_v38 = vsel %vm8452_vm4, %v988_v26, %v1306_v19  ;;  %v1013_v39 = vor.u32 %v1011_v20, %v1010_v28  ;;  %v1015_v40 = vrot.slane %v1010_v28, 4  ;;  %v752_v41 = vadd.f32 %v7277_v24, %v8511_v54  ;;  %v1326_v25 = vld [vmem:[#allocation2 + $0x2c] sm:$0x1] }
 0x105   : > { %1308 = vst [vmem:[#allocation2 + $0xc] sm:$0xf] %v1307_v38  ;;  %v993_v42 = vrot.slane %v991_v32, 7  ;;  %v1034_v43 = vshrl.u32 %v6681_v35, 16  ;;  %v1037_v44 = vshll.u32 %v6681_v35, 16  ;;  %v6679_v45 = vpack.c.bf16 %v855_v36, %v855_v36  ;;  %v7280_v46 = vpop.f32.mrf.mxu0 }
 0x106   : > { %v1014_v47 = vsel %vm8523_vm7, %v1006_v16, %v1013_v39  ;;  %v1320_v48 = vsel %vm8463_vm5, %v1015_v40, %v1319_v30  ;;  %v858_v50 = vmax.f32 %v752_v41, 0.0  ;;  %v744_v51 = vadd.f32 %v8511_v54, %v743_v37 }
 0x107   : > { %1318 = vst [vmem:[#allocation2 + $0x1c] sm:$0xf] %v1014_v47  ;;  %1321 = vst [vmem:[#allocation2 + $0x20] sm:$0x1] %v1320_v48  ;;  %v996_v55 = vor.u32 %v994_v33, %v993_v42  ;;  %v998_v56 = vrot.slane %v993_v42, 4  ;;  %v1036_v57 = vrot.slane %v1034_v43, 7  ;;  %v756_v59 = vpop.f32.mrf.mxu0  ;;  %v765_v0 = vadd.f32 %v7280_v46, %v8511_v54 }
 0x108   : > { %v1017_v58 = vshrl.u32 %v6679_v45, 16  ;;  %v1020_v61 = vshll.u32 %v6679_v45, 16  ;;  %v6682_v62 = vpack.c.bf16 %v858_v50, %v858_v50  ;;  %v856_v63 = vmax.f32 %v744_v51, 0.0  ;;  %v1343_v46 = vld [vmem:[#allocation2 + $0x48] sm:$0xf] }
 0x109   : > { %v997_v1 = vsel %vm8523_vm7, %v989_v27, %v996_v55  ;;  %v1313_v2 = vsel %vm8463_vm5, %v998_v56, %v1312_v49  ;;  %v1039_v3 = vor.u32 %v1037_v44, %v1036_v57  ;;  %v1040_v4 = vrot.slane %v1036_v57, 4  ;;  %v7281_v5 = vpop.f32.mrf.mxu0 }
 0x10a   : > { %v1767_v6 = vld [vmem:[#allocation2 + $0x18] sm:$0x1]  ;;  %1309 = vst [vmem:[#allocation2 + $0x10] sm:$0xf] %v997_v1  ;;  %1314 = vst [vmem:[#allocation2 + $0x14] sm:$0x1] %v1313_v2  ;;  %v6680_v10 = vpack.c.bf16 %v856_v63, %v856_v63  ;;  %v757_v16 = vadd.f32 %v8511_v54, %v756_v59  ;;  %v768_v51 = vadd.f32 %v7281_v5, %v8511_v54 }
 0x10b   : > { %v1019_v7 = vrot.slane %v1017_v58, 7  ;;  %v1042_v8 = vshrl.u32 %v6682_v62, 16  ;;  %v1045_v9 = vshll.u32 %v6682_v62, 16  ;;  %v1768_v11 = vsel %vm8463_vm5, 0, %v1767_v6  ;;  %v759_v17 = vpop.f32.mrf.mxu0  ;;  %v1336_v59 = vld [vmem:[#allocation2 + $0x3c] sm:$0xf] }
 0x10c   : > { %v1330_v12 = vsel %vm8452_vm4, %v1039_v3, %v1329_v60  ;;  %v861_v15 = vmax.f32 %v765_v0, 0.0  ;;  %1769 = vst [vmem:[#allocation2 + $0x18] sm:$0x1] %v1768_v11  ;;  %v1764_v18 = vld [vmem:[#allocation2 + $0xc] sm:$0x1]  ;;  %v1025_v22 = vshrl.u32 %v6680_v10, 16  ;;  %v760_v60 = vadd.f32 %v8511_v54, %v759_v17 }
 0x10d   : > { %1331 = vst [vmem:[#allocation2 + $0x30] sm:$0xf] %v1330_v12  ;;  %v1022_v19 = vor.u32 %v1020_v61, %v1019_v7  ;;  %v1023_v20 = vrot.slane %v1019_v7, 4  ;;  %v1044_v21 = vrot.slane %v1042_v8, 7  ;;  %v1765_v23 = vsel %vm8463_vm5, 0, %v1764_v18  ;;  %v7284_v28 = vpop.f32.mrf.mxu0 }
 0x10e   : > { %v1028_v24 = vshll.u32 %v6680_v10, 16  ;;  %v6685_v26 = vpack.c.bf16 %v861_v15, %v861_v15  ;;  %v859_v27 = vmax.f32 %v757_v16, 0.0  ;;  %1766 = vst [vmem:[#allocation2 + $0xc] sm:$0x1] %v1765_v23  ;;  %v1821_v30 = vld [vmem:[#allocation2 + $0x20] sm:$0xf]  ;;  %v781_v5 = vadd.f32 %v7284_v28, %v8511_v54 }
 0x10f   : > { %v1323_v32 = vsel %vm8452_vm4, %v1022_v19, %v1322_v13  ;;  %v1047_v33 = vor.u32 %v1045_v9, %v1044_v21  ;;  %v1049_v35 = vrot.slane %v1044_v21, 4  ;;  %v1027_v36 = vrot.slane %v1025_v22, 7  ;;  %v772_v41 = vpop.f32.mrf.mxu0  ;;  %v8084_v19 = vld [vmem:[%s10129_s5 + $0x70] sm:$0xff]  }
 0x110   : > { %v1822_v37 = vsel %vm8452_vm4, 0, %v1821_v30  ;;  %1324 = vst [vmem:[#allocation2 + $0x24] sm:$0xf] %v1323_v32  ;;  %v1068_v38 = vshrl.u32 %v6685_v26, 16  ;;  %v1071_v39 = vshll.u32 %v6685_v26, 16  ;;  %v6683_v40 = vpack.c.bf16 %v859_v27, %v859_v27 }
 0x111   : > { %1823 = vst [vmem:[#allocation2 + $0x20] sm:$0xf] %v1822_v37  ;;  %v1048_v42 = vsel %vm8523_vm7, %v1040_v4, %v1047_v33  ;;  %v1334_v43 = vsel %vm8463_vm5, %v1049_v35, %v1333_v14  ;;  %v1030_v44 = vor.u32 %v1028_v24, %v1027_v36  ;;  %v1032_v45 = vrot.slane %v1027_v36, 4  ;;  %v1818_v47 = vld [vmem:[#allocation2 + $0x14] sm:$0xf]  ;;  %v7285_v55 = vpop.f32.mrf.mxu0 }
 0x112   : > { %1332 = vst [vmem:[#allocation2 + $0x34] sm:$0xf] %v1048_v42  ;;  %1335 = vst [vmem:[#allocation2 + $0x38] sm:$0x1] %v1334_v43  ;;  %v8555_v48 = vrot.slane %v1068_v38, 7  ;;  %v1051_v49 = vshrl.u32 %v6683_v40, 16  ;;  %v773_v6 = vadd.f32 %v8511_v54, %v772_v41  ;;  %v784_v17 = vadd.f32 %v7285_v55, %v8511_v54 }
 0x113   : > { %v1054_v50 = vshll.u32 %v6683_v40, 16  ;;  %v1819_v56 = vsel %vm8452_vm4, 0, %v1818_v47  ;;  %v1031_v57 = vsel %vm8523_vm7, %v1023_v20, %v1030_v44  ;;  %v1327_v58 = vsel %vm8463_vm5, %v1032_v45, %v1326_v25  ;;  %v775_v2 = vpop.f32.mrf.mxu0  ;;  %v1347_v26 = vld [vmem:[#allocation2 + $0x50] sm:$0x1]  ;;  %v1340_v36 = vld [vmem:[#allocation2 + $0x44] sm:$0x1] }
 0x114   : > { %1820 = vst [vmem:[#allocation2 + $0x14] sm:$0xf] %v1819_v56  ;;  %v1773_v61 = vld [vmem:[#allocation2 + $0x30] sm:$0x1]  ;;  %1325 = vst [vmem:[#allocation2 + $0x28] sm:$0xf] %v1031_v57  ;;  %v1073_v62 = vor.u32 %v1071_v39, %v8555_v48  ;;  %v8592_v38 = vadd.f32 %v8511_v54, %v775_v2 }
 0x115   : > { %1328 = vst [vmem:[#allocation2 + $0x2c] sm:$0x1] %v1327_v58  ;;  %v1074_v63 = vrot.slane %v8555_v48, 4  ;;  %v8567_v0 = vrot.slane %v1051_v49, 7  ;;  %v862_v1 = vmax.f32 %v768_v51, 0.0  ;;  %v1774_v3 = vsel %vm8463_vm5, 0, %v1773_v61  ;;  %v8577_v11 = vpop.f32.mrf.mxu0 }
 0x116   : > { %v860_v4 = vmax.f32 %v760_v60, 0.0  ;;  %1775 = vst [vmem:[#allocation2 + $0x30] sm:$0x1] %v1774_v3  ;;  %v1344_v7 = vsel %vm8452_vm4, %v1073_v62, %v1343_v46  ;;  %v8041_v12 = vld [vmem:[#allocation2 + $0xc] sm:$0xff]   ;;  %v865_v15 = vmax.f32 %v781_v5, 0.0  ;;  %v863_v16 = vmax.f32 %v773_v6, 0.0 }
 0x117   : > { %v1056_v8 = vor.u32 %v1054_v50, %v8567_v0  ;;  %v1057_v9 = vrot.slane %v8567_v0, 4  ;;  %v6686_v10 = vpack.c.bf16 %v862_v1, %v862_v1  ;;  %v1770_v13 = vld [vmem:[#allocation2 + $0x24] sm:$0x1]  ;;  %1345 = vst [vmem:[#allocation2 + $0x48] sm:$0xf] %v1344_v7  ;;  %v8042_v18 = vld [vmem:[#allocation2 + $0x8] sm:$0xff]   ;;  %v8587_v24 = vpop.f32.mrf.mxu0  ;;  %7318 = vmatprep.mubr.bf16.mxu1 %v8041_v12 }
 0x118   : > { %v6684_v14 = vpack.c.bf16 %v860_v4, %v860_v4  ;;  %v1771_v20 = vsel %vm8463_vm5, 0, %v1770_v13  ;;  %v6689_v30 = vpack.c.bf16 %v865_v15, %v865_v15  ;;  %v6687_v32 = vpack.c.bf16 %v863_v16, %v863_v16  ;;  %7383 = vmatmul.mubr.bf16.vlgmr.msra.gmra.mxu0 %v8042_v18  ;;  %v8599_v40 = vld [vmem:[%s10129_s5 + $0x130] sm:$0xff]   ;;  %v8087_v46 = vld [vmem:[%s10129_s5 + $0x68] sm:$0xff]   ;;  %v1357_v51 = vld [vmem:[#allocation2 + $0x60] sm:$0xf] }
 0x119   : > { %v1337_v21 = vsel %vm8452_vm4, %v1056_v8, %v1336_v59  ;;  %v1076_v22 = vshrl.u32 %v6686_v10, 16  ;;  %v1079_v23 = vshll.u32 %v6686_v10, 16  ;;  %1772 = vst [vmem:[#allocation2 + $0x24] sm:$0x1] %v1771_v20  ;;  %v1827_v25 = vld [vmem:[#allocation2 + $0x38] sm:$0xf]  ;;  %v8594_v39 = vpop.f32.mrf.mxu0  ;;  %7495 = vmatpush3.bf16.msra.mxu0 %v8505_v53 }
 0x11a   : > { %1338 = vst [vmem:[#allocation2 + $0x3c] sm:$0xf] %v1337_v21  ;;  %v1059_v27 = vshrl.u32 %v6684_v14, 16  ;;  %v1062_v28 = vshll.u32 %v6684_v14, 16  ;;  %v1828_v33 = vsel %vm8452_vm4, 0, %v1827_v25  ;;  %v866_v37 = vmax.f32 %v784_v17, 0.0  ;;  %7496 = vmatprep.subr.bf16.mxu0 %v8084_v19 }
 0x11b   : > { %v1078_v35 = vrot.slane %v1076_v22, 7  ;;  %1829 = vst [vmem:[#allocation2 + $0x38] sm:$0xf] %v1828_v33  ;;  %v1102_v43 = vshrl.u32 %v6689_v30, 16  ;;  %v1105_v44 = vshll.u32 %v6689_v30, 16  ;;  %v1085_v45 = vshrl.u32 %v6687_v32, 16  ;;  %v791_v56 = vpop.f32.mrf.mxu0 }
 0x11c   : > { %v1824_v41 = vld [vmem:[#allocation2 + $0x2c] sm:$0xf]  ;;  %v1061_v42 = vrot.slane %v1059_v27, 7  ;;  %v1088_v55 = vshll.u32 %v6687_v32, 16  ;;  %v8044_v53 = vld [vmem:[#allocation2 + $0x14] sm:$0xff]   ;;  %v8614_v1 = vld [vmem:[%s10129_s5 + $0x60] sm:$0xff]   ;;  %v6690_v5 = vpack.c.bf16 %v866_v37, %v866_v37  ;;  %v797_v27 = vadd.f32 %v8577_v11, %v8511_v54 }
 0x11d   : > { %v1825_v47 = vsel %vm8452_vm4, 0, %v1824_v41  ;;  %v1081_v49 = vor.u32 %v1079_v23, %v1078_v35  ;;  %v1083_v50 = vrot.slane %v1078_v35, 4  ;;  %v8607_v59 = vrot.slane %v1102_v43, 7  ;;  %v1350_v61 = vld [vmem:[#allocation2 + $0x54] sm:$0xf]  ;;  %7319 = vmatmul.mubr.bf16.vlgmr.msra.gmra.mxu1 %v8044_v53  ;;  %v8046_v7 = vld [vmem:[#allocation2 + $0x1c] sm:$0xff]   ;;  %v7292_v8 = vpop.f32.mrf.mxu0  ;;  %7497 = vmatpush3.bf16.msra.mxu0 %v8084_v19 }
 0x11e   : > { %1826 = vst [vmem:[#allocation2 + $0x2c] sm:$0xf] %v1825_v47  ;;  %v1064_v57 = vor.u32 %v1062_v28, %v1061_v42  ;;  %v1066_v58 = vrot.slane %v1061_v42, 4  ;;  %v8609_v60 = vrot.slane %v1085_v45, 7  ;;  %v8045_v62 = vld [vmem:[#allocation2 + $0x10] sm:$0xff]   ;;  %v864_v6 = vmax.f32 %v8592_v38, 0.0  ;;  %7431 = vmatpush3.bf16.msra.mxu1 %v8499_v52  ;;  %7322 = vmatprep.mubr.bf16.mxu1 %v8046_v7 }
 0x11f   : > { %v1779_v2 = vld [vmem:[#allocation2 + $0x48] sm:$0x1]  ;;  %v1082_v3 = vsel %vm8523_vm7, %v1074_v63, %v1081_v49  ;;  %v1348_v4 = vsel %vm8463_vm5, %v1083_v50, %v1347_v26  ;;  %v1107_v13 = vor.u32 %v1105_v44, %v8607_v59  ;;  %7386 = vmatprep.mubr.bf16.mxu0 %v8045_v62  ;;  %v8047_v14 = vld [vmem:[#allocation2 + $0x18] sm:$0xff]   ;;  %v1108_v16 = vrot.slane %v8607_v59, 4  ;;  %v8641_v19 = vpop.f32.mrf.mxu0  ;;  %7432 = vmatprep.subr.bf16.mxu1 %v8599_v40  ;;  %v8659_v32 = vld [vmem:[%s10129_s5 + $0x120] sm:$0xff]  }
 0x120   : > { %v8626_v10 = vld [vmem:[%s10129_s5 + $0x128] sm:$0xff]   ;;  %v1780_v48 = vsel %vm8463_vm5, 0, %v1779_v2  ;;  %1346 = vst [vmem:[#allocation2 + $0x4c] sm:$0xf] %v1082_v3  ;;  %1349 = vst [vmem:[#allocation2 + $0x50] sm:$0x1] %v1348_v4  ;;  %v1065_v63 = vsel %vm8523_vm7, %v1057_v9, %v1064_v57  ;;  %v1341_v12 = vsel %vm8463_vm5, %v1066_v58, %v1340_v36  ;;  %v1090_v0 = vor.u32 %v1088_v55, %v8609_v60 }
 0x121   : > { %1781 = vst [vmem:[#allocation2 + $0x48] sm:$0x1] %v1780_v48  ;;  %v1776_v15 = vld [vmem:[#allocation2 + $0x3c] sm:$0x1]  ;;  %1339 = vst [vmem:[#allocation2 + $0x40] sm:$0xf] %v1065_v63  ;;  %v1358_v20 = vsel %vm8452_vm4, %v1107_v13, %v1357_v51  ;;  %v6688_v23 = vpack.c.bf16 %v864_v6, %v864_v6  ;;  %7387 = vmatmul.mubr.bf16.gmra.mxu0 %v8047_v14  ;;  %7498 = vmatprep.subr.bf16.mxu0 %v8087_v46  ;;  %v8654_v30 = vpop.f32.mrf.mxu0 }
 0x122   : > { %1342 = vst [vmem:[#allocation2 + $0x44] sm:$0x1] %v1341_v12  ;;  %v1091_v17 = vrot.slane %v8609_v60, 4  ;;  %v1110_v9 = vshrl.u32 %v6690_v5, 16  ;;  %v8048_v18 = vld [vmem:[#allocation2 + $0x20] sm:$0xff]   ;;  %v1777_v52 = vsel %vm8463_vm5, 0, %v1776_v15  ;;  %v1351_v25 = vsel %vm8452_vm4, %v1090_v0, %v1350_v61  ;;  %7499 = vmatpush3.bf16.msra.mxu0 %v8087_v46  ;;  %7433 = vmatpush3.bf16.msra.mxu1 %v8599_v40 }
 0x123   : > { %v1113_v21 = vshll.u32 %v6690_v5, 16  ;;  %v1361_v22 = vld [vmem:[#allocation2 + $0x68] sm:$0x1]  ;;  %1778 = vst [vmem:[#allocation2 + $0x3c] sm:$0x1] %v1777_v52  ;;  %v789_v28 = vadd.f32 %v8511_v54, %v8587_v24  ;;  %7390 = vmatprep.mubr.bf16.mxu0 %v8048_v18  ;;  %v1093_v33 = vshrl.u32 %v6688_v23, 16  ;;  %v800_v36 = vadd.f32 %v8594_v39, %v8511_v54  ;;  %7500 = vmatprep.subr.bf16.mxu0 %v8614_v1  ;;  %v8678_v49 = vpop.f32.mrf.mxu0 }
 0x124   : > { %1359 = vst [vmem:[#allocation2 + $0x60] sm:$0xf] %v1358_v20  ;;  %v1112_v26 = vrot.slane %v1110_v9, 7  ;;  %1352 = vst [vmem:[#allocation2 + $0x54] sm:$0xf] %v1351_v25  ;;  %v1096_v35 = vshll.u32 %v6688_v23, 16  ;;  %v8664_v11 = vadd.f32 %v8511_v54, %v791_v56  ;;  %7434 = vmatprep.subr.bf16.mxu1 %v8626_v10  ;;  %v8676_v40 = vadd.f32 %v7292_v8, %v8511_v54 }
 0x125   : > { %v8049_v37 = vld [vmem:[#allocation2 + $0x24] sm:$0xff]   ;;  %v8671_v24 = vld [vmem:[%s10129_s5 + $0x58] sm:$0xff]   ;;  %v869_v43 = vmax.f32 %v797_v27, 0.0  ;;  %v867_v44 = vmax.f32 %v789_v28, 0.0  ;;  %v8050_v45 = vld [vmem:[#allocation2 + $0x2c] sm:$0xff]   ;;  %v1095_v39 = vrot.slane %v1093_v33, 7  ;;  %v8691_v5 = vpop.f32.mrf.mxu0 }
 0x126   : > { %v1115_v38 = vor.u32 %v1113_v21, %v1112_v26  ;;  %v1117_v41 = vrot.slane %v1112_v26, 4  ;;  %v1354_v42 = vld [vmem:[#allocation2 + $0x5c] sm:$0x1]  ;;  %v870_v46 = vmax.f32 %v800_v36, 0.0  ;;  %v868_v47 = vmax.f32 %v8664_v11, 0.0  ;;  %v8052_v50 = vld [vmem:[#allocation2 + $0x28] sm:$0xff]   ;;  %7323 = vmatmul.mubr.bf16.gmra.mxu1 %v8049_v37  ;;  %7501 = vmatpush3.bf16.msra.mxu0 %v8614_v1 }
 0x127   : > { %v1833_v51 = vld [vmem:[#allocation2 + $0x50] sm:$0xf]  ;;  %v6693_v53 = vpack.c.bf16 %v869_v43, %v869_v43  ;;  %v6691_v57 = vpack.c.bf16 %v867_v44, %v867_v44  ;;  %v8687_v59 = vld [vmem:[%s10129_s5 + $0x118] sm:$0xff]   ;;  %v1098_v2 = vor.u32 %v1096_v35, %v1095_v39  ;;  %v1100_v3 = vrot.slane %v1095_v39, 4  ;;  %7326 = vmatprep.mubr.bf16.mxu1 %v8050_v45  ;;  %7435 = vmatpush3.bf16.msra.mxu1 %v8626_v10  ;;  %v1375_v52 = vld [vmem:[#allocation2 + $0x80] sm:$0x1]  ;;  %v8717_v25 = vpop.f32.mrf.mxu0 }
 0x128   : > { %v1116_v55 = vsel %vm8523_vm7, %v1108_v16, %v1115_v38  ;;  %v1362_v56 = vsel %vm8463_vm5, %v1117_v41, %v1361_v22  ;;  %v8053_v58 = vld [vmem:[#allocation2 + $0x30] sm:$0xff]   ;;  %v1834_v61 = vsel %vm8452_vm4, 0, %v1833_v51  ;;  %v6694_v4 = vpack.c.bf16 %v870_v46, %v870_v46  ;;  %7436 = vmatprep.subr.bf16.mxu1 %v8659_v32  ;;  %v1371_v14 = vld [vmem:[#allocation2 + $0x78] sm:$0xf]  ;;  %v1364_v16 = vld [vmem:[#allocation2 + $0x6c] sm:$0xf]  ;;  %7502 = vmatprep.subr.bf16.mxu0 %v8671_v24 }
 0x129   : > { %v1830_v62 = vld [vmem:[#allocation2 + $0x44] sm:$0xf]  ;;  %1360 = vst [vmem:[#allocation2 + $0x64] sm:$0xf] %v1116_v55  ;;  %1363 = vst [vmem:[#allocation2 + $0x68] sm:$0x1] %v1362_v56  ;;  %v1099_v10 = vsel %vm8523_vm7, %v1091_v17, %v1098_v2  ;;  %v1355_v13 = vsel %vm8463_vm5, %v1100_v3, %v1354_v42  ;;  %7391 = vmatmul.mubr.bf16.gmra.mxu0 %v8052_v50  ;;  %v6692_v22 = vpack.c.bf16 %v868_v47, %v868_v47  ;;  %v7297_v55 = vpop.f32.mrf.mxu0 }
 0x12a   : > { %v8697_v6 = vld [vmem:[%s10129_s5 + $0x50] sm:$0xff]   ;;  %1835 = vst [vmem:[#allocation2 + $0x50] sm:$0xf] %v1834_v61  ;;  %v1831_v7 = vsel %vm8452_vm4, 0, %v1830_v62  ;;  %v1136_v8 = vshrl.u32 %v6693_v53, 16  ;;  %v1139_v48 = vshll.u32 %v6693_v53, 16  ;;  %7394 = vmatprep.mubr.bf16.mxu0 %v8053_v58  ;;  %7503 = vmatpush3.bf16.msra.mxu0 %v8671_v24  ;;  %v805_v46 = vadd.f32 %v8511_v54, %v8641_v19 }
 0x12b   : > { %v1119_v63 = vshrl.u32 %v6691_v57, 16  ;;  %1832 = vst [vmem:[#allocation2 + $0x44] sm:$0xf] %v1831_v7  ;;  %v1785_v12 = vld [vmem:[#allocation2 + $0x60] sm:$0x1]  ;;  %v1122_v15 = vshll.u32 %v6691_v57, 16  ;;  %7437 = vmatpush3.bf16.msra.mxu1 %v8659_v32  ;;  %7504 = vmatprep.subr.bf16.mxu0 %v8697_v6  ;;  %v816_v61 = vadd.f32 %v8654_v30, %v8511_v54  ;;  %v808_v7 = vadd.f32 %v8511_v54, %v8678_v49 }
 0x12c   : > { %v1144_v0 = vshrl.u32 %v6694_v4, 16  ;;  %v1786_v1 = vsel %vm8463_vm5, 0, %v1785_v12  ;;  %v1782_v9 = vld [vmem:[#allocation2 + $0x54] sm:$0x1]  ;;  %1353 = vst [vmem:[#allocation2 + $0x58] sm:$0xf] %v1099_v10  ;;  %7438 = vmatprep.subr.bf16.mxu1 %v8687_v59 }
 0x12d   : > { %1356 = vst [vmem:[#allocation2 + $0x5c] sm:$0x1] %v1355_v13  ;;  %v1138_v60 = vrot.slane %v1136_v8, 7  ;;  %v8712_v18 = vrot.slane %v1119_v63, 7  ;;  %v1147_v17 = vshll.u32 %v6694_v4, 16  ;;  %v1783_v20 = vsel %vm8463_vm5, 0, %v1782_v9 }
 0x12e   : > { %1787 = vst [vmem:[#allocation2 + $0x60] sm:$0x1] %v1786_v1  ;;  %v1146_v21 = vrot.slane %v1144_v0, 7  ;;  %v873_v23 = vmax.f32 %v8676_v40, 0.0  ;;  %v8723_v26 = vld [vmem:[%s10129_s5 + $0x110] sm:$0xff]   ;;  %v8734_v32 = vld [vmem:[%s10129_s5 + $0x48] sm:$0xff]   ;;  %7505 = vmatpush3.bf16.msra.mxu0 %v8697_v6  ;;  %v829_v8 = vadd.f32 %v8691_v5, %v8511_v54 }
 0x12f   : > { %1784 = vst [vmem:[#allocation2 + $0x54] sm:$0x1] %v1783_v20  ;;  %v1141_v27 = vor.u32 %v1139_v48, %v1138_v60  ;;  %v1142_v28 = vrot.slane %v1138_v60, 4  ;;  %v1124_v33 = vor.u32 %v1122_v15, %v8712_v18  ;;  %v1125_v35 = vrot.slane %v8712_v18, 4  ;;  %v8727_v36 = vld [vmem:[#allocation2 + $0x34] sm:$0xff]   ;;  %v8736_v42 = vld [vmem:[#allocation2 + $0x3c] sm:$0xff]   ;;  %7439 = vmatpush3.bf16.msra.mxu1 %v8687_v59  ;;  %7506 = vmatprep.subr.bf16.mxu0 %v8734_v32 }
 0x130   : > { %v1149_v11 = vor.u32 %v1147_v17, %v1146_v21  ;;  %v1151_v37 = vrot.slane %v1146_v21, 4  ;;  %v1127_v38 = vshrl.u32 %v6692_v22, 16  ;;  %v1130_v41 = vshll.u32 %v6692_v22, 16  ;;  %v1839_v43 = vld [vmem:[#allocation2 + $0x68] sm:$0xf]  ;;  %7327 = vmatmul.mubr.bf16.gmra.mxu1 %v8727_v36  ;;  %v8753_v56 = vld [vmem:[#allocation2 + $0x38] sm:$0xff]   ;;  %7440 = vmatprep.subr.bf16.mxu1 %v8723_v26 }
 0x131   : > { %v1372_v44 = vsel %vm8452_vm4, %v1141_v27, %v1371_v14  ;;  %v1365_v24 = vsel %vm8452_vm4, %v1124_v33, %v1364_v16  ;;  %v1368_v45 = vld [vmem:[#allocation2 + $0x74] sm:$0x1]  ;;  %v6697_v39 = vpack.c.bf16 %v873_v23, %v873_v23  ;;  %v1840_v47 = vsel %vm8452_vm4, 0, %v1839_v43  ;;  %7330 = vmatprep.mubr.bf16.mxu1 %v8736_v42  ;;  %v8759_v19 = vld [vmem:[%s10129_s5 + $0x108] sm:$0xff]   ;;  %v1385_v4 = vld [vmem:[#allocation2 + $0x90] sm:$0xf]  ;;  %7395 = vmatmul.mubr.bf16.gmra.mxu0 %v8753_v56  ;;  %v823_v14 = vpop.f32.mrf.mxu0 }
 0x132   : > { %1373 = vst [vmem:[#allocation2 + $0x78] sm:$0xf] %v1372_v44  ;;  %1366 = vst [vmem:[#allocation2 + $0x6c] sm:$0xf] %v1365_v24  ;;  %v1150_v40 = vsel %vm8523_vm7, %v1142_v28, %v1149_v11  ;;  %v1376_v50 = vsel %vm8463_vm5, %v1151_v37, %v1375_v52  ;;  %v1129_v51 = vrot.slane %v1127_v38, 7  ;;  %v871_v58 = vmax.f32 %v805_v46, 0.0  ;;  %7507 = vmatpush3.bf16.msra.mxu0 %v8734_v32 }
 0x133   : > { %1841 = vst [vmem:[#allocation2 + $0x68] sm:$0xf] %v1840_v47  ;;  %1374 = vst [vmem:[#allocation2 + $0x7c] sm:$0xf] %v1150_v40  ;;  %v1170_v53 = vshrl.u32 %v6697_v39, 16  ;;  %v1173_v57 = vshll.u32 %v6697_v39, 16  ;;  %7441 = vmatpush3.bf16.msra.mxu1 %v8723_v26  ;;  %v821_v22 = vadd.f32 %v8511_v54, %v8717_v25  ;;  %v8801_v23 = vpop.f32.mrf.mxu0  ;;  %v8811_v32 = vadd.f32 %v8511_v54, %v823_v14 }
 0x134   : > { %1377 = vst [vmem:[#allocation2 + $0x80] sm:$0x1] %v1376_v50  ;;  %v8763_v62 = vld [vmem:[#allocation2 + $0x40] sm:$0xff]   ;;  %v1836_v59 = vld [vmem:[#allocation2 + $0x5c] sm:$0xf]  ;;  %v1132_v2 = vor.u32 %v1130_v41, %v1129_v51  ;;  %v1134_v3 = vrot.slane %v1129_v51, 4  ;;  %v6695_v63 = vpack.c.bf16 %v871_v58, %v871_v58  ;;  %7442 = vmatprep.subr.bf16.mxu1 %v8759_v19 }
 0x135   : > { %v8103_v30 = vld [vmem:[%s10129_s5 + $0x40] sm:$0xff]   ;;  %v1837_v6 = vsel %vm8452_vm4, 0, %v1836_v59  ;;  %v8778_v48 = vrot.slane %v1170_v53, 7  ;;  %v874_v12 = vmax.f32 %v816_v61, 0.0  ;;  %7398 = vmatprep.mubr.bf16.mxu0 %v8763_v62  ;;  %v872_v10 = vmax.f32 %v808_v7, 0.0  ;;  %v8785_v15 = vld [vmem:[#allocation2 + $0x4c] sm:$0xff]   ;;  %v836_v53 = vpop.f32.mrf.mxu0 }
 0x136   : > { %1838 = vst [vmem:[#allocation2 + $0x5c] sm:$0xf] %v1837_v6  ;;  %v1133_v49 = vsel %vm8523_vm7, %v1125_v35, %v1132_v2  ;;  %v1369_v5 = vsel %vm8463_vm5, %v1134_v3, %v1368_v45  ;;  %v877_v13 = vmax.f32 %v829_v8, 0.0  ;;  %v8791_v16 = vld [vmem:[%s10129_s5 + $0x100] sm:$0xff]   ;;  %v1153_v9 = vshrl.u32 %v6695_v63, 16  ;;  %7508 = vmatprep.subr.bf16.mxu0 %v8103_v30  ;;  %v8814_v11 = vld [vmem:[#allocation2 + $0x48] sm:$0xff]  }
 0x137   : > { %1367 = vst [vmem:[#allocation2 + $0x70] sm:$0xf] %v1133_v49  ;;  %1370 = vst [vmem:[#allocation2 + $0x74] sm:$0x1] %v1369_v5  ;;  %v1175_v0 = vor.u32 %v1173_v57, %v8778_v48  ;;  %v1176_v1 = vrot.slane %v8778_v48, 4  ;;  %v1156_v60 = vshll.u32 %v6695_v63, 16  ;;  %v6698_v52 = vpack.c.bf16 %v874_v12, %v874_v12  ;;  %7443 = vmatpush3.bf16.msra.mxu1 %v8759_v19 }
 0x138   : > { %v8795_v18 = vld [vmem:[#allocation2 + $0x44] sm:$0xff]   ;;  %v6696_v20 = vpack.c.bf16 %v872_v10, %v872_v10  ;;  %v6701_v21 = vpack.c.bf16 %v877_v13, %v877_v13  ;;  %v8805_v33 = vrot.slane %v1153_v9, 7  ;;  %v8808_v35 = vadd.f32 %v7297_v55, %v8511_v54  ;;  %v8819_v25 = vld [vmem:[%s10129_s5 + $0x178] sm:$0xff]   ;;  %v8831_v47 = vld [vmem:[#allocation2 + $0x50] sm:$0xff]   ;;  %7444 = vmatprep.subr.bf16.mxu1 %v8791_v16  ;;  %7509 = vmatpush3.bf16.msra.mxu0 %v8103_v30 }
 0x139   : > { %v1378_v17 = vld [vmem:[#allocation2 + $0x84] sm:$0xf]  ;;  %v1791_v26 = vld [vmem:[#allocation2 + $0x78] sm:$0x1]  ;;  %v1788_v27 = vld [vmem:[#allocation2 + $0x6c] sm:$0x1]  ;;  %v1386_v28 = vsel %vm8452_vm4, %v1175_v0, %v1385_v4  ;;  %7331 = vmatmul.mubr.bf16.gmra.mxu1 %v8795_v18  ;;  %7399 = vmatmul.mubr.bf16.gmra.mxu0 %v8814_v11  ;;  %v7301_v0 = vpop.f32.mrf.mxu0 }
 0x13a   : > { %v1792_v37 = vsel %vm8463_vm5, 0, %v1791_v26  ;;  %v1789_v38 = vsel %vm8463_vm5, 0, %v1788_v27  ;;  %1387 = vst [vmem:[#allocation2 + $0x90] sm:$0xf] %v1386_v28  ;;  %v1178_v43 = vshrl.u32 %v6698_v52, 16  ;;  %v1181_v54 = vshll.u32 %v6698_v52, 16  ;;  %7334 = vmatprep.mubr.bf16.mxu1 %v8785_v15  ;;  %7402 = vmatprep.mubr.bf16.mxu0 %v8831_v47 }
 0x13b   : > { %v1845_v41 = vld [vmem:[#allocation2 + $0x80] sm:$0xf]  ;;  %1793 = vst [vmem:[#allocation2 + $0x78] sm:$0x1] %v1792_v37  ;;  %1790 = vst [vmem:[#allocation2 + $0x6c] sm:$0x1] %v1789_v38  ;;  %v1158_v24 = vor.u32 %v1156_v60, %v8805_v33  ;;  %7445 = vmatpush3.bf16.msra.mxu1 %v8791_v16 }
 0x13c   : > { %v1846_v44 = vsel %vm8452_vm4, 0, %v1845_v41  ;;  %v1159_v45 = vrot.slane %v8805_v33, 4  ;;  %v1389_v39 = vld [vmem:[#allocation2 + $0x98] sm:$0x1]  ;;  %v1161_v46 = vshrl.u32 %v6696_v20, 16  ;;  %v1180_v40 = vrot.slane %v1178_v43, 7  ;;  %7558 = vmatprep.subr.bf16.mxu1 %v8819_v25 }
 0x13d   : > { %1847 = vst [vmem:[#allocation2 + $0x80] sm:$0xf] %v1846_v44  ;;  %v1164_v50 = vshll.u32 %v6696_v20, 16  ;;  %v1382_v51 = vld [vmem:[#allocation2 + $0x8c] sm:$0x1]  ;;  %v1204_v55 = vshrl.u32 %v6701_v21, 16  ;;  %v1379_v57 = vsel %vm8452_vm4, %v1158_v24, %v1378_v17 }
 0x13e   : > { %v1207_v19 = vshll.u32 %v6701_v21, 16  ;;  %v1163_v58 = vrot.slane %v1161_v46, 7  ;;  %v1399_v61 = vld [vmem:[#allocation2 + $0xa8] sm:$0xf]  ;;  %v875_v59 = vmax.f32 %v821_v22, 0.0  ;;  %v878_v2 = vmax.f32 %v8808_v35, 0.0 }
 0x13f   : > { %v1842_v3 = vld [vmem:[#allocation2 + $0x74] sm:$0xf]  ;;  %1380 = vst [vmem:[#allocation2 + $0x84] sm:$0xf] %v1379_v57  ;;  %v1183_v4 = vor.u32 %v1181_v54, %v1180_v40  ;;  %v1185_v7 = vrot.slane %v1180_v40, 4  ;;  %v8839_v8 = vrot.slane %v1204_v55, 7 }
 0x140   : > { %v876_v30 = vmax.f32 %v8811_v32, 0.0  ;;  %v8842_v6 = vld [vmem:[#allocation2 + $0x54] sm:$0xff]   ;;  %v1843_v63 = vsel %vm8452_vm4, 0, %v1842_v3  ;;  %v1166_v12 = vor.u32 %v1164_v50, %v1163_v58  ;;  %v1168_v49 = vrot.slane %v1163_v58, 4  ;;  %v8856_v9 = vld [vmem:[#allocation2 + $0x5c] sm:$0xff]  }
 0x141   : > { %v6699_v5 = vpack.c.bf16 %v875_v59, %v875_v59  ;;  %1844 = vst [vmem:[#allocation2 + $0x74] sm:$0xf] %v1843_v63  ;;  %v1184_v10 = vsel %vm8523_vm7, %v1176_v1, %v1183_v4  ;;  %v1390_v13 = vsel %vm8463_vm5, %v1185_v7, %v1389_v39  ;;  %v1209_v14 = vor.u32 %v1207_v19, %v8839_v8  ;;  %v1797_v60 = vld [vmem:[#allocation2 + $0x90] sm:$0x1]  ;;  %v1392_v22 = vld [vmem:[#allocation2 + $0x9c] sm:$0xf] }
 0x142   : > { %v1210_v16 = vrot.slane %v8839_v8, 4  ;;  %1388 = vst [vmem:[#allocation2 + $0x94] sm:$0xf] %v1184_v10  ;;  %1391 = vst [vmem:[#allocation2 + $0x98] sm:$0x1] %v1390_v13  ;;  %v1167_v17 = vsel %vm8523_vm7, %v1159_v45, %v1166_v12  ;;  %v1383_v48 = vsel %vm8463_vm5, %v1168_v49, %v1382_v51  ;;  %7335 = vmatmul.mubr.bf16.gmra.mxu1 %v8842_v6  ;;  %v1798_v20 = vsel %vm8463_vm5, 0, %v1797_v60  ;;  %v839_v45 = vpop.f32.mrf.mxu0 }
 0x143   : > { %v1187_v1 = vshrl.u32 %v6699_v5, 16  ;;  %v1190_v52 = vshll.u32 %v6699_v5, 16  ;;  %1381 = vst [vmem:[#allocation2 + $0x88] sm:$0xf] %v1167_v17  ;;  %1384 = vst [vmem:[#allocation2 + $0x8c] sm:$0x1] %v1383_v48  ;;  %v1400_v21 = vsel %vm8452_vm4, %v1209_v14, %v1399_v61  ;;  %v6702_v26 = vpack.c.bf16 %v878_v2, %v878_v2  ;;  %7338 = vmatprep.mubr.bf16.mxu1 %v8856_v9 }
 0x144   : > { %v6700_v27 = vpack.c.bf16 %v876_v30, %v876_v30  ;;  %v8868_v28 = vld [vmem:[#allocation2 + $0x58] sm:$0xff]   ;;  %1799 = vst [vmem:[#allocation2 + $0x90] sm:$0x1] %v1798_v20  ;;  %1401 = vst [vmem:[#allocation2 + $0xa8] sm:$0xf] %v1400_v21  ;;  %v8876_v41 = vld [vmem:[#allocation2 + $0x60] sm:$0xff]  }
 0x145   : > { %v1189_v33 = vrot.slane %v1187_v1, 7  ;;  %v8176_v35 = vld [vmem:[%s10128_s4] ss:$0 sm:$0xff]  ;;  %v1212_v43 = vshrl.u32 %v6702_v26, 16  ;;  %v1215_v54 = vshll.u32 %v6702_v26, 16  ;;  %7403 = vmatmul.mubr.bf16.gmra.mxu0 %v8868_v28  ;;  %v8885_v4 = vld [vmem:[#allocation2 + $0x64] sm:$0xff]  }
 0x146   : > { %v845_v32 = vadd.f32 %v8176_v35, %v8801_v23  ;;  %v837_v37 = vadd.f32 %v8176_v35, %v836_v53  ;;  %v8874_v38 = vadd.f32 %v8176_v35, %v7301_v0  ;;  %v1195_v44 = vshrl.u32 %v6700_v27, 16  ;;  %v1794_v39 = vld [vmem:[#allocation2 + $0x84] sm:$0x1]  ;;  %v1403_v50 = vld [vmem:[#allocation2 + $0xb0] sm:$0x1]  ;;  %7406 = vmatprep.mubr.bf16.mxu0 %v8876_v41  ;;  %v8889_v10 = vld [vmem:[#allocation2 + $0x68] sm:$0xff]  }
 0x147   : > { %v1198_v24 = vshll.u32 %v6700_v27, 16  ;;  %v1192_v46 = vor.u32 %v1190_v52, %v1189_v33  ;;  %v1193_v40 = vrot.slane %v1189_v33, 4  ;;  %v1795_v23 = vsel %vm8463_vm5, 0, %v1794_v39  ;;  %v1396_v57 = vld [vmem:[#allocation2 + $0xa4] sm:$0x1]  ;;  %v8887_v5 = vld [vmem:[#allocation2 + $0x6c] sm:$0xff]  }
 0x148   : > { %v881_v51 = vmax.f32 %v845_v32, 0.0  ;;  %v879_v55 = vmax.f32 %v837_v37, 0.0  ;;  %v1214_v19 = vrot.slane %v1212_v43, 7  ;;  %v1197_v53 = vrot.slane %v1195_v44, 7  ;;  %1796 = vst [vmem:[#allocation2 + $0x84] sm:$0x1] %v1795_v23 }
 0x149   : > { %v882_v58 = vmax.f32 %v8874_v38, 0.0  ;;  %v1393_v61 = vsel %vm8452_vm4, %v1192_v46, %v1392_v22  ;;  %v840_v3 = vadd.f32 %v8176_v35, %v839_v45  ;;  %v1851_v7 = vld [vmem:[#allocation2 + $0x98] sm:$0xf]  ;;  %v1413_v22 = vld [vmem:[#allocation2 + $0xc0] sm:$0xf]  ;;  %v8905_v26 = vld [vmem:[#allocation2 + $0x70] sm:$0xff]  }
 0x14a   : > { %v6705_v59 = vpack.c.bf16 %v881_v51, %v881_v51  ;;  %v6703_v2 = vpack.c.bf16 %v879_v55, %v879_v55  ;;  %1394 = vst [vmem:[#allocation2 + $0x9c] sm:$0xf] %v1393_v61  ;;  %v1217_v30 = vor.u32 %v1215_v54, %v1214_v19  ;;  %v1219_v63 = vrot.slane %v1214_v19, 4  ;;  %v1848_v14 = vld [vmem:[#allocation2 + $0x8c] sm:$0xf]  ;;  %7339 = vmatmul.mubr.bf16.gmra.mxu1 %v8885_v4  ;;  %v8914_v32 = vld [vmem:[%s10129_s5 + $0xb8] sm:$0xff]  }
 0x14b   : > { %v1200_v12 = vor.u32 %v1198_v24, %v1197_v53  ;;  %v1202_v49 = vrot.slane %v1197_v53, 4  ;;  %v1852_v13 = vsel %vm8452_vm4, 0, %v1851_v7  ;;  %v1849_v48 = vsel %vm8452_vm4, 0, %v1848_v14  ;;  %v1803_v1 = vld [vmem:[#allocation2 + $0xa8] sm:$0x1]  ;;  %7342 = vmatprep.mubr.bf16.mxu1 %v8887_v5  ;;  %7622 = vmatprep.subr.bf16.mxu0 %v8914_v32  ;;  %v8929_v61 = vld [vmem:[#allocation2 + $0x78] sm:$0xff]  }
 0x14c   : > { %v1238_v0 = vshrl.u32 %v6705_v59, 16  ;;  %v1241_v60 = vshll.u32 %v6705_v59, 16  ;;  %v1221_v17 = vshrl.u32 %v6703_v2, 16  ;;  %1853 = vst [vmem:[#allocation2 + $0x98] sm:$0xf] %v1852_v13  ;;  %v1218_v52 = vsel %vm8523_vm7, %v1210_v16, %v1217_v30 }
 0x14d   : > { %v1404_v20 = vsel %vm8463_vm5, %v1219_v63, %v1403_v50  ;;  %v1201_v21 = vsel %vm8523_vm7, %v1193_v40, %v1200_v12  ;;  %1850 = vst [vmem:[#allocation2 + $0x8c] sm:$0xf] %v1849_v48  ;;  %v1804_v27 = vsel %vm8463_vm5, 0, %v1803_v1  ;;  %1402 = vst [vmem:[#allocation2 + $0xac] sm:$0xf] %v1218_v52  ;;  %v1397_v8 = vsel %vm8463_vm5, %v1202_v49, %v1396_v57  ;;  %v8919_v40 = vld [vmem:[#allocation2 + $0x74] sm:$0xff]  }
 0x14e   : > { %1405 = vst [vmem:[#allocation2 + $0xb0] sm:$0x1] %v1404_v20  ;;  %1395 = vst [vmem:[#allocation2 + $0xa0] sm:$0xf] %v1201_v21  ;;  %v1240_v16 = vrot.slane %v1238_v0, 7  ;;  %v1223_v33 = vrot.slane %v1221_v17, 7  ;;  %v6706_v38 = vpack.c.bf16 %v882_v58, %v882_v58  ;;  %7407 = vmatmul.mubr.bf16.gmra.mxu0 %v8889_v10 }
 0x14f   : > { %v1406_v35 = vld [vmem:[#allocation2 + $0xb4] sm:$0xf]  ;;  %1805 = vst [vmem:[#allocation2 + $0xa8] sm:$0x1] %v1804_v27  ;;  %1398 = vst [vmem:[#allocation2 + $0xa4] sm:$0x1] %v1397_v8  ;;  %7410 = vmatprep.mubr.bf16.mxu0 %v8905_v26 }
 0x150   : > { %v1224_v37 = vshll.u32 %v6703_v2, 16  ;;  %v880_v43 = vmax.f32 %v840_v3, 0.0  ;;  %v1243_v54 = vor.u32 %v1241_v60, %v1240_v16  ;;  %v1244_v44 = vrot.slane %v1240_v16, 4  ;;  %v8921_v50 = vld [vmem:[#allocation2 + $0x7c] sm:$0xff]   ;;  %v1417_v23 = vld [vmem:[#allocation2 + $0xc8] sm:$0x1] }
 0x151   : > { %v1246_v45 = vshrl.u32 %v6706_v38, 16  ;;  %v1249_v39 = vshll.u32 %v6706_v38, 16  ;;  %v1800_v51 = vld [vmem:[#allocation2 + $0x9c] sm:$0x1]  ;;  %v1227_v59 = vrot.slane %v1223_v33, 4  ;;  %v8935_v14 = vld [vmem:[#allocation2 + $0x80] sm:$0xff]  }
 0x152   : > { %v1226_v24 = vor.u32 %v1224_v37, %v1223_v33  ;;  %v6704_v46 = vpack.c.bf16 %v880_v43, %v880_v43  ;;  %v1414_v55 = vsel %vm8452_vm4, %v1243_v54, %v1413_v22  ;;  %v1801_v19 = vsel %vm8463_vm5, 0, %v1800_v51  ;;  %7343 = vmatmul.mubr.bf16.gmra.mxu1 %v8919_v40  ;;  %v1410_v12 = vld [vmem:[#allocation2 + $0xbc] sm:$0x1]  ;;  %v8949_v22 = vld [vmem:[#allocation2 + $0x84] sm:$0xff]  }
 0x153   : > { %1415 = vst [vmem:[#allocation2 + $0xc0] sm:$0xf] %v1414_v55  ;;  %v1248_v57 = vrot.slane %v1246_v45, 7  ;;  %1802 = vst [vmem:[#allocation2 + $0x9c] sm:$0x1] %v1801_v19  ;;  %7346 = vmatprep.mubr.bf16.mxu1 %v8921_v50  ;;  %v8967_v54 = vld [vmem:[#allocation2 + $0x94] sm:$0xff]  }
 0x154   : > { %v1407_v53 = vsel %vm8452_vm4, %v1226_v24, %v1406_v35  ;;  %v1229_v58 = vshrl.u32 %v6704_v46, 16  ;;  %v1232_v2 = vshll.u32 %v6704_v46, 16  ;;  %v8953_v16 = vld [vmem:[#allocation2 + $0x8c] sm:$0xff]  }
 0x155   : > { %1408 = vst [vmem:[#allocation2 + $0xb4] sm:$0xf] %v1407_v53  ;;  %v1857_v3 = vld [vmem:[#allocation2 + $0xb0] sm:$0xf]  ;;  %v1251_v7 = vor.u32 %v1249_v39, %v1248_v57  ;;  %v1253_v30 = vrot.slane %v1248_v57, 4  ;;  %v8959_v29 = vld [vmem:[#allocation2 + $0x88] sm:$0xff]  }
 0x156   : > { %v1231_v63 = vrot.slane %v1229_v58, 7  ;;  %v1858_v49 = vsel %vm8452_vm4, 0, %v1857_v3  ;;  %v1854_v13 = vld [vmem:[#allocation2 + $0xa4] sm:$0xf]  ;;  %7411 = vmatmul.mubr.bf16.gmra.mxu0 %v8929_v61  ;;  %v8961_v35 = vld [vmem:[#allocation2 + $0x90] sm:$0xff]   ;;  %v8987_v55 = vld [vmem:[#allocation2 + $0xa8] sm:$0xff]  }
 0x157   : > { %1859 = vst [vmem:[#allocation2 + $0xb0] sm:$0xf] %v1858_v49  ;;  %v1855_v0 = vsel %vm8452_vm4, 0, %v1854_v13  ;;  %v1252_v60 = vsel %vm8523_vm7, %v1244_v44, %v1251_v7  ;;  %v1418_v17 = vsel %vm8463_vm5, %v1253_v30, %v1417_v23  ;;  %7414 = vmatprep.mubr.bf16.mxu0 %v8935_v14  ;;  %v9002_v58 = vld [vmem:[#allocation2] sm:$0xff]   ;;  %v9010_v7 = vld [vmem:[#allocation2 + $0xc] sm:$0xff]  }
 0x158   : > { %v1234_v48 = vor.u32 %v1232_v2, %v1231_v63  ;;  %1856 = vst [vmem:[#allocation2 + $0xa4] sm:$0xf] %v1855_v0  ;;  %1416 = vst [vmem:[#allocation2 + $0xc4] sm:$0xf] %v1252_v60  ;;  %v1236_v1 = vrot.slane %v1231_v63, 4  ;;  %v8111_v30 = vld [vmem:[%s10129_s5 + $0xb0] sm:$0xff]  }
 0x159   : > { %1419 = vst [vmem:[#allocation2 + $0xc8] sm:$0x1] %v1418_v17  ;;  %v1754_v2 = vld [vmem:[#allocation2 + $0xcc] sm:$0xf]  ;;  %v8105_v49 = vld [vmem:[%s10129_s5 + $0x170] sm:$0xff]  }
 0x15a   : > { %v1235_v52 = vsel %vm8523_vm7, %v1227_v59, %v1234_v48  ;;  %v1809_v20 = vld [vmem:[#allocation2 + $0xc0] sm:$0x1]  ;;  %v1411_v21 = vsel %vm8463_vm5, %v1236_v1, %v1410_v12  ;;  %7347 = vmatmul.mubr.bf16.gmra.mxu1 %v8949_v22  ;;  %v8974_v45 = vld [vmem:[#allocation2 + $0x98] sm:$0xff]   ;;  %v1755_v3 = vsel %vm8452_vm4, 0, %v1754_v2  ;;  %v9016_v63 = vld [vmem:[#allocation2 + $0x8] sm:$0xff]  }
 0x15b   : > { %1409 = vst [vmem:[#allocation2 + $0xb8] sm:$0xf] %v1235_v52  ;;  %v1810_v27 = vsel %vm8463_vm5, 0, %v1809_v20  ;;  %1412 = vst [vmem:[#allocation2 + $0xbc] sm:$0x1] %v1411_v21  ;;  %7350 = vmatprep.mubr.bf16.mxu1 %v8953_v16  ;;  %v8971_v24 = vld [vmem:[#allocation2 + $0x9c] sm:$0xff]  }
 0x15c   : > { %v1806_v8 = vld [vmem:[#allocation2 + $0xb4] sm:$0x1]  ;;  %1811 = vst [vmem:[#allocation2 + $0xc0] sm:$0x1] %v1810_v27  ;;  %1756 = vst [vmem:[#allocation2 + $0xcc] sm:$0xf] %v1755_v3 }
 0x15d   : > { %v1807_v33 = vsel %vm8463_vm5, 0, %v1806_v8  ;;  %v9019_v12 = vld [vmem:[#allocation2 + $0x10] sm:$0xff]   ;;  %v8112_v13 = vld [vmem:[%s10129_s5 + $0xa8] sm:$0xff]   ;;  %v8114_v48 = vld [vmem:[%s10129_s5 + $0xa0] sm:$0xff]  }
 0x15e   : > { %1808 = vst [vmem:[#allocation2 + $0xb4] sm:$0x1] %v1807_v33  ;;  %7415 = vmatmul.mubr.bf16.gmra.mxu0 %v8959_v29  ;;  %v8983_v51 = vld [vmem:[#allocation2 + $0xac] sm:$0xff]   ;;  %v9029_v60 = vld [vmem:[#allocation2 + $0x14] sm:$0xff]   ;;  %v8107_v20 = vld [vmem:[%s10129_s5 + $0x160] sm:$0xff]  }
 0x15f   : > { %7418 = vmatprep.mubr.bf16.mxu0 %v8961_v35  ;;  %v8977_v39 = vld [vmem:[#allocation2 + $0xa0] sm:$0xff]   ;;  %v8106_v1 = vld [vmem:[%s10129_s5 + $0x168] sm:$0xff]   ;;  %v9044_v52 = vld [vmem:[#allocation2 + $0x18] sm:$0xff]  }
 0x160   : > { %v1863_v37 = vld [vmem:[#allocation2 + $0xc8] sm:$0xf]  ;;  %v8115_v21 = vld [vmem:[%s10129_s5 + $0x98] sm:$0xff]   ;;  %v9059_v8 = vld [vmem:[#allocation2 + $0x2c] sm:$0xff]  }
 0x161   : > { %v1864_v38 = vsel %vm8452_vm4, 0, %v1863_v37  ;;  %v8981_v46 = vld [vmem:[#allocation2 + $0xa4] sm:$0xff]   ;;  %v8116_v33 = vld [vmem:[%s10129_s5 + $0x90] sm:$0xff]   ;;  %v8108_v37 = vld [vmem:[%s10129_s5 + $0x158] sm:$0xff]  }
 0x162   : > { %1865 = vst [vmem:[#allocation2 + $0xc8] sm:$0xf] %v1864_v38  ;;  %v1860_v43 = vld [vmem:[#allocation2 + $0xbc] sm:$0xf]  ;;  %7351 = vmatmul.mubr.bf16.gmra.mxu1 %v8967_v54  ;;  %v9056_v27 = vld [vmem:[#allocation2 + $0x24] sm:$0xff]  }
 0x163   : > { %v1861_v44 = vsel %vm8452_vm4, 0, %v1860_v43  ;;  %7354 = vmatprep.mubr.bf16.mxu1 %v8971_v24  ;;  %v1812_v0 = vld [vmem:[#allocation2 + $0xcc] sm:$0x1]  ;;  %v9071_v43 = vld [vmem:[#allocation2 + $0x30] sm:$0xff]   ;;  %v8119_v3 = vld [vmem:[%s10129_s5 + $0x80] sm:$0xff]  }
 0x164   : > { %1862 = vst [vmem:[#allocation2 + $0xbc] sm:$0xf] %v1861_v44  ;;  %v1813_v17 = vsel %vm8463_vm5, 0, %v1812_v0  ;;  %v9068_v38 = vld [vmem:[#allocation2 + $0x28] sm:$0xff]   ;;  %v8109_v44 = vld [vmem:[%s10129_s5 + $0x150] sm:$0xff]  }
 0x165   : > { %v8989_v23 = vld [vmem:[#allocation2 + $0xb0] sm:$0xff]   ;;  %1814 = vst [vmem:[#allocation2 + $0xcc] sm:$0x1] %v1813_v17  ;;  %v8118_v2 = vld [vmem:[%s10129_s5 + $0x88] sm:$0xff]  }
 0x166   : > { %7419 = vmatmul.mubr.bf16.gmra.mxu0 %v8974_v45  ;;  %v8993_v19 = vld [vmem:[#allocation2 + $0xb4] sm:$0xff]  }
 0x167   : > { %7422 = vmatprep.mubr.bf16.mxu0 %v8977_v39 }
 0x169   : > { %v9005_v59 = vld [vmem:[#allocation2 + $0xc4] sm:$0xff]  }
 0x16a   : > { %7355 = vmatmul.mubr.bf16.gmra.mxu1 %v8981_v46 }
 0x16b   : > { %7358 = vmatprep.mubr.bf16.mxu1 %v8983_v51  ;;  %v8995_v53 = vld [vmem:[#allocation2 + $0xbc] sm:$0xff]  }
 0x16c   : > { %v8999_v57 = vld [vmem:[#allocation2 + $0xb8] sm:$0xff]  }
 0x16e   : > { %7423 = vmatmul.mubr.bf16.gmra.mxu0 %v8987_v55 }
 0x16f   : > { %7426 = vmatprep.mubr.bf16.mxu0 %v8989_v23 }
 0x172   : > { %7359 = vmatmul.mubr.bf16.gmra.mxu1 %v8993_v19 }
 0x173   : > { %7362 = vmatprep.mubr.bf16.mxu1 %v8995_v53 }
 0x176   : > { %7427 = vmatmul.mubr.bf16.gmra.mxu0 %v8999_v57 }
 0x177   : > { %7510 = vmatprep.mubr.bf16.mxu0 %v9002_v58 }
 0x17a   : > { %7363 = vmatmul.mubr.bf16.gmra.mxu1 %v9005_v59 }
 0x17b   : > { %7446 = vmatprep.mubr.bf16.mxu1 %v9010_v7 }
 0x17e   : > { %7511 = vmatmul.mubr.bf16.vlgmr.msra.gmra.mxu0 %v9016_v63 }
 0x17f   : > { %7514 = vmatprep.mubr.bf16.mxu0 %v9019_v12  ;;  %7623 = vmatpush3.bf16.msra.mxu0 %v8914_v32  ;;  %v9035_v32 = vld [vmem:[#allocation2 + $0x1c] sm:$0xff]  }
 0x180   : > { %7624 = vmatprep.subr.bf16.mxu0 %v8111_v30 }
 0x182   : > { %7447 = vmatmul.mubr.bf16.vlgmr.msra.gmra.mxu1 %v9029_v60 }
 0x183   : > { %7625 = vmatpush3.bf16.msra.mxu0 %v8111_v30  ;;  %7559 = vmatpush3.bf16.msra.mxu1 %v8819_v25  ;;  %v9047_v25 = vld [vmem:[#allocation2 + $0x20] sm:$0xff]   ;;  %v8113_v30 = vld [vmem:[%s10129_s5 + $0x148] sm:$0xff]  }
 0x184   : > { %7450 = vmatprep.mubr.bf16.mxu1 %v9035_v32  ;;  %7560 = vmatprep.subr.bf16.mxu1 %v8105_v49 }
 0x185   : > { %7626 = vmatprep.subr.bf16.mxu0 %v8112_v13 }
 0x186   : > { %7515 = vmatmul.mubr.bf16.gmra.mxu0 %v9044_v52 }
 0x187   : > { %7518 = vmatprep.mubr.bf16.mxu0 %v9047_v25  ;;  %7627 = vmatpush3.bf16.msra.mxu0 %v8112_v13  ;;  %v8122_v13 = vld [vmem:[%s10129_s5 + $0x1a8] sm:$0xff]  }
 0x188   : > { %7561 = vmatpush3.bf16.msra.mxu1 %v8105_v49  ;;  %7628 = vmatprep.subr.bf16.mxu0 %v8114_v48 }
 0x189   : > { %7562 = vmatprep.subr.bf16.mxu1 %v8106_v1 }
 0x18a   : > { %7451 = vmatmul.mubr.bf16.gmra.mxu1 %v9056_v27 }
 0x18b   : > { %7629 = vmatpush3.bf16.msra.mxu0 %v8114_v48  ;;  %7454 = vmatprep.mubr.bf16.mxu1 %v9059_v8 }
 0x18c   : > { %7563 = vmatpush3.bf16.msra.mxu1 %v8106_v1  ;;  %7630 = vmatprep.subr.bf16.mxu0 %v8115_v21 }
 0x18d   : > { %7564 = vmatprep.subr.bf16.mxu1 %v8107_v20 }
 0x18e   : > { %7519 = vmatmul.mubr.bf16.gmra.mxu0 %v9068_v38 }
 0x18f   : > { %7522 = vmatprep.mubr.bf16.mxu0 %v9071_v43  ;;  %7631 = vmatpush3.bf16.msra.mxu0 %v8115_v21  ;;  %v8131_v21 = vld [vmem:[%s10129_s5 + $0x1d8] sm:$0xff]  }
 0x190   : > { %7565 = vmatpush3.bf16.msra.mxu1 %v8107_v20  ;;  %7632 = vmatprep.subr.bf16.mxu0 %v8116_v33  ;;  %v8123_v20 = vld [vmem:[%s10129_s5 + $0x1a0] sm:$0xff]  }
 0x191   : > { %7566 = vmatprep.subr.bf16.mxu1 %v8108_v37 }
 0x192   : > { %7455 = vmatmul.mubr.bf16.gmra.mxu1 %v8727_v36  ;;  %v8117_v36 = vld [vmem:[%s10129_s5 + $0x140] sm:$0xff]  }
 0x193   : > { %7633 = vmatpush3.bf16.msra.mxu0 %v8116_v33  ;;  %7458 = vmatprep.mubr.bf16.mxu1 %v8736_v42  ;;  %v8120_v42 = vld [vmem:[%s10129_s5 + $0x1b8] sm:$0xff]  }
 0x194   : > { %7567 = vmatpush3.bf16.msra.mxu1 %v8108_v37  ;;  %7634 = vmatprep.subr.bf16.mxu0 %v8118_v2 }
 0x195   : > { %7568 = vmatprep.subr.bf16.mxu1 %v8109_v44 }
 0x196   : > { %7523 = vmatmul.mubr.bf16.gmra.mxu0 %v8753_v56  ;;  %v8126_v56 = vld [vmem:[%s10129_s5 + $0x1f8] sm:$0xff]  }
 0x197   : > { %7526 = vmatprep.mubr.bf16.mxu0 %v8763_v62  ;;  %7635 = vmatpush3.bf16.msra.mxu0 %v8118_v2  ;;  %v8127_v62 = vld [vmem:[%s10129_s5 + $0x1f0] sm:$0xff]  }
 0x198   : > { %7569 = vmatpush3.bf16.msra.mxu1 %v8109_v44  ;;  %7636 = vmatprep.subr.bf16.mxu0 %v8119_v3  ;;  %v8132_v2 = vld [vmem:[%s10129_s5 + $0x1d0] sm:$0xff]  }
 0x199   : > { %7570 = vmatprep.subr.bf16.mxu1 %v8113_v30 }
 0x19a   : > { %7459 = vmatmul.mubr.bf16.gmra.mxu1 %v8795_v18 }
 0x19b   : > { %7637 = vmatpush3.bf16.msra.mxu0 %v8119_v3  ;;  %7462 = vmatprep.mubr.bf16.mxu1 %v8785_v15 }
 0x19c   : > { %7571 = vmatpush3.bf16.msra.mxu1 %v8113_v30  ;;  %7750 = vmatprep.subr.bf16.mxu0 %v8126_v56  ;;  %v8124_v30 = vld [vmem:[%s10129_s5 + $0x198] sm:$0xff]  }
 0x19d   : > { %7572 = vmatprep.subr.bf16.mxu1 %v8117_v36 }
 0x19e   : > { %7527 = vmatmul.mubr.bf16.gmra.mxu0 %v8814_v11  ;;  %v8121_v11 = vld [vmem:[%s10129_s5 + $0x1b0] sm:$0xff]  }
 0x19f   : > { %7530 = vmatprep.mubr.bf16.mxu0 %v8831_v47  ;;  %v8128_v47 = vld [vmem:[%s10129_s5 + $0x1e8] sm:$0xff]  }
 0x1a0   : > { %7573 = vmatpush3.bf16.msra.mxu1 %v8117_v36 }
 0x1a1   : > { %7686 = vmatprep.subr.bf16.mxu1 %v8120_v42 }
 0x1a2   : > { %7463 = vmatmul.mubr.bf16.gmra.mxu1 %v8842_v6 }
 0x1a3   : > { %7466 = vmatprep.mubr.bf16.mxu1 %v8856_v9 }
 0x1a6   : > { %7531 = vmatmul.mubr.bf16.gmra.mxu0 %v8868_v28 }
 0x1a7   : > { %7534 = vmatprep.mubr.bf16.mxu0 %v8876_v41 }
 0x1aa   : > { %7467 = vmatmul.mubr.bf16.gmra.mxu1 %v8885_v4 }
 0x1ab   : > { %7470 = vmatprep.mubr.bf16.mxu1 %v8887_v5 }
 0x1ae   : > { %7535 = vmatmul.mubr.bf16.gmra.mxu0 %v8889_v10 }
 0x1af   : > { %7538 = vmatprep.mubr.bf16.mxu0 %v8905_v26 }
 0x1b2   : > { %7471 = vmatmul.mubr.bf16.gmra.mxu1 %v8919_v40 }
 0x1b3   : > { %7474 = vmatprep.mubr.bf16.mxu1 %v8921_v50 }
 0x1b6   : > { %7539 = vmatmul.mubr.bf16.gmra.mxu0 %v8929_v61 }
 0x1b7   : > { %7542 = vmatprep.mubr.bf16.mxu0 %v8935_v14 }
 0x1ba   : > { %7475 = vmatmul.mubr.bf16.gmra.mxu1 %v8949_v22 }
 0x1bb   : > { %7478 = vmatprep.mubr.bf16.mxu1 %v8953_v16 }
 0x1be   : > { %7543 = vmatmul.mubr.bf16.gmra.mxu0 %v8959_v29 }
 0x1bf   : > { %7546 = vmatprep.mubr.bf16.mxu0 %v8961_v35 }
 0x1c2   : > { %7479 = vmatmul.mubr.bf16.gmra.mxu1 %v8967_v54 }
 0x1c3   : > { %7482 = vmatprep.mubr.bf16.mxu1 %v8971_v24 }
 0x1c6   : > { %7547 = vmatmul.mubr.bf16.gmra.mxu0 %v8974_v45 }
 0x1c7   : > { %7550 = vmatprep.mubr.bf16.mxu0 %v8977_v39 }
 0x1ca   : > { %7483 = vmatmul.mubr.bf16.gmra.mxu1 %v8981_v46 }
 0x1cb   : > { %7486 = vmatprep.mubr.bf16.mxu1 %v8983_v51 }
 0x1ce   : > { %7551 = vmatmul.mubr.bf16.gmra.mxu0 %v8987_v55 }
 0x1cf   : > { %7554 = vmatprep.mubr.bf16.mxu0 %v8989_v23 }
 0x1d2   : > { %7487 = vmatmul.mubr.bf16.gmra.mxu1 %v8993_v19 }
 0x1d3   : > { %7490 = vmatprep.mubr.bf16.mxu1 %v8995_v53 }
 0x1d6   : > { %7555 = vmatmul.mubr.bf16.gmra.mxu0 %v8999_v57 }
 0x1d7   : > { %7638 = vmatprep.mubr.bf16.mxu0 %v9002_v58 }
 0x1d8   : > { %v7384_v15 = vpop.f32.mrf.mxu0 }
 0x1d9   : > { %v8125_v15 = vld [vmem:[%s10129_s5 + $0x190] sm:$0xff]  }
 0x1da   : > { %7491 = vmatmul.mubr.bf16.gmra.mxu1 %v9005_v59  ;;  %v2659_v18 = vpop.f32.mrf.mxu0 }
 0x1db   : > { %7574 = vmatprep.mubr.bf16.mxu1 %v9010_v7 }
 0x1dc   : > { %v7385_v58 = vpop.f32.mrf.mxu0 }
 0x1dd   : > { %v7320_v7 = vpop.f32.mrf.mxu1 }
 0x1de   : > { %7639 = vmatmul.mubr.bf16.vlgmr.msra.gmra.mxu0 %v9016_v63  ;;  %v2662_v63 = vpop.f32.mrf.mxu0 }
 0x1df   : > { %7642 = vmatprep.mubr.bf16.mxu0 %v9019_v12  ;;  %7751 = vmatpush3.bf16.msra.mxu0 %v8126_v56  ;;  %v8130_v12 = vld [vmem:[%s10129_s5 + $0x1e0] sm:$0xff]   ;;  %v2258_v49 = vpop.f32.mrf.mxu1 }
 0x1e0   : > { %7752 = vmatprep.subr.bf16.mxu0 %v8127_v62  ;;  %v9152_v0 = vadd.f32 %v2659_v18, %v2258_v49  ;;  %v8134_v18 = vld [vmem:[%s10129_s5 + $0x1c8] sm:$0xff]  }
 0x1e1   : > { %v7388_v17 = vpop.f32.mrf.mxu0  ;;  %v8129_v49 = vld [vmem:[%s10129_s5 + $0x188] sm:$0xff]  }
 0x1e2   : > { %7575 = vmatmul.mubr.bf16.vlgmr.msra.gmra.mxu1 %v9029_v60  ;;  %v7321_v60 = vpop.f32.mrf.mxu1 }
 0x1e3   : > { %7753 = vmatpush3.bf16.msra.mxu0 %v8127_v62  ;;  %7687 = vmatpush3.bf16.msra.mxu1 %v8120_v42  ;;  %v2674_v48 = vpop.f32.mrf.mxu0 }
 0x1e4   : > { %7578 = vmatprep.mubr.bf16.mxu1 %v9035_v32  ;;  %7688 = vmatprep.subr.bf16.mxu1 %v8121_v11  ;;  %v9156_v32 = vadd.f32 %v7385_v58, %v7321_v60  ;;  %v2261_v1 = vpop.f32.mrf.mxu1  ;;  %v8190_v58 = vld [vmem:[#allocation2 + $0x3c] sm:$0xff]  }
 0x1e5   : > { %7754 = vmatprep.subr.bf16.mxu0 %v8128_v47  ;;  %v7389_v33 = vpop.f32.mrf.mxu0 }
 0x1e6   : > { %7643 = vmatmul.mubr.bf16.gmra.mxu0 %v9044_v52  ;;  %v9164_v52 = vadd.f32 %v2662_v63, %v2261_v1  ;;  %v8136_v63 = vld [vmem:[%s10129_s5 + $0x1c0] sm:$0xff]  }
 0x1e7   : > { %7646 = vmatprep.mubr.bf16.mxu0 %v9047_v25  ;;  %7755 = vmatpush3.bf16.msra.mxu0 %v8128_v47  ;;  %v7324_v25 = vpop.f32.mrf.mxu1  ;;  %v2677_v44 = vpop.f32.mrf.mxu0  ;;  %v8189_v47 = vld [vmem:[#allocation2 + $0x34] sm:$0xff]  }
 0x1e8   : > { %7689 = vmatpush3.bf16.msra.mxu1 %v8121_v11  ;;  %7756 = vmatprep.subr.bf16.mxu0 %v8130_v12  ;;  %v9167_v37 = vadd.f32 %v7388_v17, %v7324_v25  ;;  %v8191_v17 = vld [vmem:[#allocation2 + $0x38] sm:$0xff]  }
 0x1e9   : > { %7690 = vmatprep.subr.bf16.mxu1 %v8122_v13  ;;  %v2273_v3 = vpop.f32.mrf.mxu1 }
 0x1ea   : > { %7579 = vmatmul.mubr.bf16.gmra.mxu1 %v9056_v27  ;;  %v9176_v36 = vadd.f32 %v2674_v48, %v2273_v3  ;;  %v7392_v27 = vpop.f32.mrf.mxu0  ;;  %v8192_v48 = vld [vmem:[#allocation2 + $0x40] sm:$0xff]   ;;  %v8194_v3 = vld [vmem:[#allocation2 + $0x4c] sm:$0xff]  }
 0x1eb   : > { %7757 = vmatpush3.bf16.msra.mxu0 %v8130_v12  ;;  %7582 = vmatprep.mubr.bf16.mxu1 %v9059_v8  ;;  %v7325_v42 = vpop.f32.mrf.mxu1 }
 0x1ec   : > { %7691 = vmatpush3.bf16.msra.mxu1 %v8122_v13  ;;  %7758 = vmatprep.subr.bf16.mxu0 %v8131_v21  ;;  %v9180_v8 = vadd.f32 %v7389_v33, %v7325_v42  ;;  %v2689_v56 = vpop.f32.mrf.mxu0  ;;  %v9204_v42 = vld [vmem:[%s10129_s5 + $0x238] sm:$0xff]  }
 0x1ed   : > { %7692 = vmatprep.subr.bf16.mxu1 %v8123_v20  ;;  %v2276_v62 = vpop.f32.mrf.mxu1 }
 0x1ee   : > { %7647 = vmatmul.mubr.bf16.gmra.mxu0 %v9068_v38  ;;  %v7393_v38 = vpop.f32.mrf.mxu0 }
 0x1ef   : > { %7650 = vmatprep.mubr.bf16.mxu0 %v9071_v43  ;;  %7759 = vmatpush3.bf16.msra.mxu0 %v8131_v21  ;;  %v8133_v21 = vld [vmem:[%s10129_s5 + $0x180] sm:$0xff]   ;;  %v8196_v38 = vld [vmem:[#allocation2 + $0x50] sm:$0xff]  }
 0x1f0   : > { %7693 = vmatpush3.bf16.msra.mxu1 %v8123_v20  ;;  %7760 = vmatprep.subr.bf16.mxu0 %v8132_v2  ;;  %v7328_v11 = vpop.f32.mrf.mxu1  ;;  %v2691_v7 = vpop.f32.mrf.mxu0 }
 0x1f1   : > { %7694 = vmatprep.subr.bf16.mxu1 %v8124_v30  ;;  %v9188_v43 = vadd.f32 %v7392_v27, %v7328_v11 }
 0x1f2   : > { %7583 = vmatmul.mubr.bf16.gmra.mxu1 %v8189_v47  ;;  %v2288_v12 = vpop.f32.mrf.mxu1  ;;  %v7396_v13 = vpop.f32.mrf.mxu0 }
 0x1f3   : > { %7761 = vmatpush3.bf16.msra.mxu0 %v8132_v2  ;;  %7586 = vmatprep.mubr.bf16.mxu1 %v8190_v58  ;;  %v8193_v2 = vld [vmem:[#allocation2 + $0x44] sm:$0xff]  }
 0x1f4   : > { %7695 = vmatpush3.bf16.msra.mxu1 %v8124_v30  ;;  %7762 = vmatprep.subr.bf16.mxu0 %v8134_v18  ;;  %v7329_v60 = vpop.f32.mrf.mxu1  ;;  %v2703_v1 = vpop.f32.mrf.mxu0 }
 0x1f5   : > { %7696 = vmatprep.subr.bf16.mxu1 %v8125_v15 }
 0x1f6   : > { %7651 = vmatmul.mubr.bf16.gmra.mxu0 %v8191_v17  ;;  %v2290_v20 = vpop.f32.mrf.mxu1  ;;  %v7397_v25 = vpop.f32.mrf.mxu0 }
 0x1f7   : > { %7654 = vmatprep.mubr.bf16.mxu0 %v8192_v48  ;;  %7763 = vmatpush3.bf16.msra.mxu0 %v8134_v18  ;;  %v9199_v33 = vadd.f32 %v2691_v7, %v2290_v20 }
 0x1f8   : > { %7697 = vmatpush3.bf16.msra.mxu1 %v8125_v15  ;;  %7764 = vmatprep.subr.bf16.mxu0 %v8136_v63  ;;  %v2706_v30 = vpop.f32.mrf.mxu0  ;;  %v8195_v15 = vld [vmem:[#allocation2 + $0x48] sm:$0xff]  }
 0x1f9   : > { %7698 = vmatprep.subr.bf16.mxu1 %v8129_v49  ;;  %v7332_v44 = vpop.f32.mrf.mxu1 }
 0x1fa   : > { %7587 = vmatmul.mubr.bf16.gmra.mxu1 %v8193_v2  ;;  %v7400_v62 = vpop.f32.mrf.mxu0 }
 0x1fb   : > { %7765 = vmatpush3.bf16.msra.mxu0 %v8136_v63  ;;  %7590 = vmatprep.mubr.bf16.mxu1 %v8194_v3  ;;  %v2302_v27 = vpop.f32.mrf.mxu1 }
 0x1fc   : > { %7699 = vmatpush3.bf16.msra.mxu1 %v8129_v49  ;;  %v9206_v56 = vadd.f32 %v2703_v1, %v2302_v27  ;;  %v2718_v47 = vpop.f32.mrf.mxu0 }
 0x1fd   : > { %7700 = vmatprep.subr.bf16.mxu1 %v8133_v21  ;;  %v7333_v18 = vpop.f32.mrf.mxu1 }
 0x1fe   : > { %7655 = vmatmul.mubr.bf16.gmra.mxu0 %v8195_v15  ;;  %v9208_v11 = vadd.f32 %v7397_v25, %v7333_v18  ;;  %v7401_v63 = vpop.f32.mrf.mxu0 }
 0x1ff   : > { %7658 = vmatprep.mubr.bf16.mxu0 %v8196_v38  ;;  %v2305_v58 = vpop.f32.mrf.mxu1 }
 0x200   : > { %10142 = vst [vmem:[#allocation6_spill] sm:$0xff] %v9208_v11  ;;  %7701 = vmatpush3.bf16.msra.mxu1 %v8133_v21  ;;  %v9211_v7 = vadd.f32 %v2706_v30, %v2305_v58  ;;  %v2721_v13 = vpop.f32.mrf.mxu0 }
 0x201   : > { %7814 = vmatprep.subr.bf16.mxu1 %v9204_v42 }
 0x202   : > { %10143 = vst [vmem:[#allocation7_spill] sm:$0xff] %v9211_v7  ;;  %v7336_v12 = vpop.f32.mrf.mxu1  ;;  %7591 = vmatmul.mubr.bf16.gmra.mxu1 %v8842_v6 }
 0x203   : > { %v9214_v49 = vadd.f32 %v7400_v62, %v7336_v12  ;;  %7594 = vmatprep.mubr.bf16.mxu1 %v8856_v9 }
 0x204   : > { %v2317_v17 = vpop.f32.mrf.mxu1 }
 0x205   : > { %10144 = vst [vmem:[#allocation8_spill] sm:$0xff] %v9214_v49  ;;  %v9217_v60 = vadd.f32 %v2718_v47, %v2317_v17  ;;  %v7404_v48 = vpop.f32.mrf.mxu0  ;;  %v9455_v49 = vld [vmem:[#allocation2 + $0xb8] sm:$0xff]  }
 0x206   : > { %7659 = vmatmul.mubr.bf16.gmra.mxu0 %v8868_v28  ;;  %v7337_v1 = vpop.f32.mrf.mxu1 }
 0x207   : > { %10145 = vst [vmem:[#allocation9_spill] sm:$0xff] %v9217_v60  ;;  %7662 = vmatprep.mubr.bf16.mxu0 %v8876_v41  ;;  %v9221_v20 = vadd.f32 %v7401_v63, %v7337_v1  ;;  %v2733_v21 = vpop.f32.mrf.mxu0  ;;  %v1758_v63 = vld [vmem:[#allocation2 + $0xd4] sm:$0x1]  ;;  %v9437_v60 = vld [vmem:[#allocation2 + $0xa8] sm:$0xff]  }
 0x208   : > { %v2320_v25 = vpop.f32.mrf.mxu1 }
 0x209   : > { %10146 = vst [vmem:[#allocation10_spill] sm:$0xff] %v9221_v20  ;;  %v7405_v44 = vpop.f32.mrf.mxu0 }
 0x20a   : > { %v7340_v6 = vpop.f32.mrf.mxu1  ;;  %7595 = vmatmul.mubr.bf16.gmra.mxu1 %v8885_v4 }
 0x20b   : > { %v9224_v2 = vadd.f32 %v7404_v48, %v7340_v6  ;;  %7598 = vmatprep.mubr.bf16.mxu1 %v8887_v5  ;;  %v2735_v9 = vpop.f32.mrf.mxu0 }
 0x20c   : > { %v2332_v3 = vpop.f32.mrf.mxu1 }
 0x20d   : > { %10147 = vst [vmem:[#allocation11_spill] sm:$0xff] %v9224_v2 }
 0x20e   : > { %v7408_v30 = vpop.f32.mrf.mxu0  ;;  %7663 = vmatmul.mubr.bf16.gmra.mxu0 %v8889_v10  ;;  %v7341_v28 = vpop.f32.mrf.mxu1 }
 0x20f   : > { %7666 = vmatprep.mubr.bf16.mxu0 %v8905_v26 }
 0x210   : > { %v2747_v41 = vpop.f32.mrf.mxu0  ;;  %v2334_v27 = vpop.f32.mrf.mxu1 }
 0x211   : > { %v9229_v62 = vadd.f32 %v2735_v9, %v2334_v27 }
 0x212   : > { %v7409_v15 = vpop.f32.mrf.mxu0  ;;  %v7344_v18 = vpop.f32.mrf.mxu1  ;;  %7599 = vmatmul.mubr.bf16.gmra.mxu1 %v8919_v40  ;;  %v1759_v40 = vsel %vm8463_vm5, 0, %v1758_v63 }
 0x213   : > { %10148 = vst [vmem:[#allocation12_spill] sm:$0xff] %v9229_v62  ;;  %7602 = vmatprep.mubr.bf16.mxu1 %v8921_v50  ;;  %1760 = vst [vmem:[#allocation2 + $0xd4] sm:$0x1] %v1759_v40 }
 0x214   : > { %v2750_v4 = vpop.f32.mrf.mxu0  ;;  %v2346_v5 = vpop.f32.mrf.mxu1 }
 0x215   : > { %v9233_v38 = vadd.f32 %v2747_v41, %v2346_v5 }
 0x216   : > { %v7412_v47 = vpop.f32.mrf.mxu0  ;;  %7667 = vmatmul.mubr.bf16.gmra.mxu0 %v8929_v61  ;;  %v7345_v10 = vpop.f32.mrf.mxu1 }
 0x217   : > { %10149 = vst [vmem:[#allocation13_spill] sm:$0xff] %v9233_v38  ;;  %7670 = vmatprep.mubr.bf16.mxu0 %v8935_v14  ;;  %v9237_v26 = vadd.f32 %v7409_v15, %v7345_v10 }
 0x218   : > { %v2762_v58 = vpop.f32.mrf.mxu0  ;;  %v2349_v12 = vpop.f32.mrf.mxu1 }
 0x219   : > { %10150 = vst [vmem:[#allocation14_spill] sm:$0xff] %v9237_v26  ;;  %v9241_v13 = vadd.f32 %v2750_v4, %v2349_v12 }
 0x21a   : > { %v7413_v50 = vpop.f32.mrf.mxu0  ;;  %v7348_v17 = vpop.f32.mrf.mxu1  ;;  %7603 = vmatmul.mubr.bf16.gmra.mxu1 %v8949_v22  ;;  %v1866_v9 = vld [vmem:[#allocation2 + $0xd4] sm:$0xf] }
 0x21b   : > { %10151 = vst [vmem:[#allocation15_spill] sm:$0xff] %v9241_v13  ;;  %v9244_v48 = vadd.f32 %v7412_v47, %v7348_v17  ;;  %7606 = vmatprep.mubr.bf16.mxu1 %v8953_v16  ;;  %v1867_v3 = vsel %vm8452_vm4, 0, %v1866_v9  ;;  %v9289_v9 = vld [vmem:[#allocation2 + $0x20] sm:$0xff]   ;;  %v9405_v13 = vld [vmem:[#allocation2 + $0x88] sm:$0xff]  }
 0x21c   : > { %v2765_v61 = vpop.f32.mrf.mxu0  ;;  %v2361_v14 = vpop.f32.mrf.mxu1  ;;  %1868 = vst [vmem:[#allocation2 + $0xd4] sm:$0xf] %v1867_v3 }
 0x21d   : > { %10152 = vst [vmem:[#allocation16_spill] sm:$0xff] %v9244_v48  ;;  %v9247_v1 = vadd.f32 %v2762_v58, %v2361_v14 }
 0x21e   : > { %v7416_v21 = vpop.f32.mrf.mxu0  ;;  %7671 = vmatmul.mubr.bf16.gmra.mxu0 %v8959_v29  ;;  %v7349_v34 = vpop.f32.mrf.mxu1 }
 0x21f   : > { %10153 = vst [vmem:[#allocation17_spill] sm:$0xff] %v9247_v1  ;;  %7674 = vmatprep.mubr.bf16.mxu0 %v8961_v35  ;;  %v9251_v25 = vadd.f32 %v7413_v50, %v7349_v34 }
 0x220   : > { %v2777_v44 = vpop.f32.mrf.mxu0  ;;  %v2364_v6 = vpop.f32.mrf.mxu1 }
 0x221   : > { %10154 = vst [vmem:[#allocation18_spill] sm:$0xff] %v9251_v25 }
 0x222   : > { %v7417_v22 = vpop.f32.mrf.mxu0  ;;  %v7352_v16 = vpop.f32.mrf.mxu1  ;;  %7607 = vmatmul.mubr.bf16.gmra.mxu1 %v8967_v54 }
 0x223   : > { %v9256_v30 = vadd.f32 %v7416_v21, %v7352_v16  ;;  %7610 = vmatprep.mubr.bf16.mxu1 %v8971_v24 }
 0x224   : > { %v2779_v29 = vpop.f32.mrf.mxu0  ;;  %v2376_v28 = vpop.f32.mrf.mxu1 }
 0x225   : > { %10155 = vst [vmem:[#allocation19_spill] sm:$0xff] %v9256_v30 }
 0x226   : > { %v7420_v35 = vpop.f32.mrf.mxu0  ;;  %7675 = vmatmul.mubr.bf16.gmra.mxu0 %v8974_v45  ;;  %v7353_v41 = vpop.f32.mrf.mxu1 }
 0x227   : > { %7678 = vmatprep.mubr.bf16.mxu0 %v8977_v39 }
 0x228   : > { %v2791_v27 = vpop.f32.mrf.mxu0  ;;  %v2378_v15 = vpop.f32.mrf.mxu1 }
 0x229   : > { %v9261_v31 = vadd.f32 %v2779_v29, %v2378_v15 }
 0x22a   : > { %v7421_v18 = vpop.f32.mrf.mxu0  ;;  %v7356_v4 = vpop.f32.mrf.mxu1  ;;  %7611 = vmatmul.mubr.bf16.gmra.mxu1 %v8981_v46 }
 0x22b   : > { %10156 = vst [vmem:[#allocation20_spill] sm:$0xff] %v9261_v31  ;;  %7614 = vmatprep.mubr.bf16.mxu1 %v8983_v51  ;;  %v9305_v4 = vld [vmem:[#allocation2 + $0x30] sm:$0xff]   ;;  %v9389_v31 = vld [vmem:[#allocation2 + $0x78] sm:$0xff]  }
 0x22c   : > { %v2794_v54 = vpop.f32.mrf.mxu0  ;;  %v2390_v24 = vpop.f32.mrf.mxu1 }
 0x22d   : > { %v9265_v5 = vadd.f32 %v2791_v27, %v2390_v24  ;;  %v9307_v24 = vld [vmem:[#allocation2 + $0x38] sm:$0xff]  }
 0x22e   : > { %v7424_v47 = vpop.f32.mrf.mxu0  ;;  %7679 = vmatmul.mubr.bf16.gmra.mxu0 %v8987_v55  ;;  %v7357_v45 = vpop.f32.mrf.mxu1  ;;  %v9277_v55 = vld [vmem:[#allocation2 + $0x18] sm:$0xff]  }
 0x22f   : > { %10157 = vst [vmem:[#allocation21_spill] sm:$0xff] %v9265_v5  ;;  %7682 = vmatprep.mubr.bf16.mxu0 %v8989_v23  ;;  %v9269_v39 = vadd.f32 %v7421_v18, %v7357_v45 }
 0x230   : > { %v2806_v10 = vpop.f32.mrf.mxu0  ;;  %v2393_v58 = vpop.f32.mrf.mxu1 }
 0x231   : > { %10158 = vst [vmem:[#allocation22_spill] sm:$0xff] %v9269_v39  ;;  %v9271_v63 = vadd.f32 %v2794_v54, %v2393_v58 }
 0x232   : > { %v7425_v12 = vpop.f32.mrf.mxu0  ;;  %v7360_v46 = vpop.f32.mrf.mxu1  ;;  %7615 = vmatmul.mubr.bf16.gmra.mxu1 %v8993_v19 }
 0x233   : > { %10159 = vst [vmem:[#allocation23_spill] sm:$0xff] %v9271_v63  ;;  %v9274_v51 = vadd.f32 %v7424_v47, %v7360_v46  ;;  %7618 = vmatprep.mubr.bf16.mxu1 %v8995_v53  ;;  %v8147_v47 = vld [vmem:[%s10129_s5 + $0x228] sm:$0xff]  }
 0x234   : > { %v2809_v40 = vpop.f32.mrf.mxu0  ;;  %v2405_v50 = vpop.f32.mrf.mxu1 }
 0x235   : > { %10160 = vst [vmem:[#allocation24_spill] sm:$0xff] %v9274_v51  ;;  %v9279_v17 = vadd.f32 %v2806_v10, %v2405_v50  ;;  %v8150_v40 = vld [vmem:[%s10129_s5 + $0x220] sm:$0xff]  }
 0x236   : > { %v7428_v23 = vpop.f32.mrf.mxu0  ;;  %7683 = vmatmul.mubr.bf16.gmra.mxu0 %v8999_v57  ;;  %v7361_v61 = vpop.f32.mrf.mxu1  ;;  %v9291_v57 = vld [vmem:[#allocation2 + $0x28] sm:$0xff]  }
 0x237   : > { %10161 = vst [vmem:[#allocation25_spill] sm:$0xff] %v9279_v17  ;;  %7766 = vmatprep.mubr.bf16.mxu0 %v9277_v55  ;;  %v9283_v14 = vadd.f32 %v7425_v12, %v7361_v61 }
 0x238   : > { %v2821_v21 = vpop.f32.mrf.mxu0  ;;  %v2408_v19 = vpop.f32.mrf.mxu1 }
 0x239   : > { %10162 = vst [vmem:[#allocation26_spill] sm:$0xff] %v9283_v14 }
 0x23a   : > { %v7429_v34 = vpop.f32.mrf.mxu0  ;;  %v7364_v44 = vpop.f32.mrf.mxu1  ;;  %7619 = vmatmul.mubr.bf16.gmra.mxu1 %v9005_v59  ;;  %v8142_v59 = vld [vmem:[%s10129_s5 + $0x230] sm:$0xff]  }
 0x23b   : > { %v9286_v53 = vadd.f32 %v7428_v23, %v7364_v44  ;;  %7702 = vmatprep.mubr.bf16.mxu1 %v9277_v55  ;;  %v9327_v34 = vld [vmem:[#allocation2 + $0x40] sm:$0xff]  }
 0x23c   : > { %v2823_v6 = vpop.f32.mrf.mxu0  ;;  %v2420_v22 = vpop.f32.mrf.mxu1 }
 0x23d   : > { %10163 = vst [vmem:[#allocation27_spill] sm:$0xff] %v9286_v53  ;;  %v8155_v22 = vld [vmem:[%s10129_s5 + $0x218] sm:$0xff]   ;;  %v9373_v53 = vld [vmem:[#allocation2 + $0x68] sm:$0xff]  }
 0x23e   : > { %v7512_v3 = vpop.f32.mrf.mxu0  ;;  %7767 = vmatmul.mubr.bf16.vlgmr.msra.gmra.mxu0 %v9289_v9  ;;  %v7365_v16 = vpop.f32.mrf.mxu1 }
 0x23f   : > { %7770 = vmatprep.mubr.bf16.mxu0 %v9291_v57 }
 0x240   : > { %v3206_v29 = vpop.f32.mrf.mxu0  ;;  %v2422_v28 = vpop.f32.mrf.mxu1 }
 0x241   : > { %v9298_v35 = vadd.f32 %v2823_v6, %v2422_v28  ;;  %v9329_v6 = vld [vmem:[#allocation2 + $0x48] sm:$0xff]  }
 0x242   : > { %v7513_v41 = vpop.f32.mrf.mxu0  ;;  %v7448_v27 = vpop.f32.mrf.mxu1  ;;  %7703 = vmatmul.mubr.bf16.vlgmr.msra.gmra.mxu1 %v9289_v9 }
 0x243   : > { %10164 = vst [vmem:[#allocation28_spill] sm:$0xff] %v9298_v35  ;;  %v9301_v15 = vadd.f32 %v7512_v3, %v7448_v27  ;;  %7815 = vmatpush3.bf16.msra.mxu1 %v9204_v42  ;;  %7706 = vmatprep.mubr.bf16.mxu1 %v9291_v57  ;;  %v8158_v27 = vld [vmem:[%s10129_s5 + $0x210] sm:$0xff]  }
 0x244   : > { %v3209_v18 = vpop.f32.mrf.mxu0  ;;  %v2933_v54 = vpop.f32.mrf.mxu1  ;;  %7816 = vmatprep.subr.bf16.mxu1 %v8142_v59 }
 0x245   : > { %v9312_v45 = vadd.f32 %v3206_v29, %v2933_v54 }
 0x246   : > { %v7516_v10 = vpop.f32.mrf.mxu0  ;;  %7771 = vmatmul.mubr.bf16.gmra.mxu0 %v9305_v4  ;;  %v7449_v58 = vpop.f32.mrf.mxu1 }
 0x247   : > { %7774 = vmatprep.mubr.bf16.mxu0 %v9307_v24  ;;  %v9316_v42 = vadd.f32 %v7513_v41, %v7449_v58  ;;  %7817 = vmatpush3.bf16.msra.mxu1 %v8142_v59 }
 0x248   : > { %v3222_v12 = vpop.f32.mrf.mxu0  ;;  %v2936_v46 = vpop.f32.mrf.mxu1  ;;  %7818 = vmatprep.subr.bf16.mxu1 %v8147_v47 }
 0x249   : > { %v9321_v50 = vadd.f32 %v3209_v18, %v2936_v46 }
 0x24a   : > { %v7517_v23 = vpop.f32.mrf.mxu0  ;;  %v7452_v61 = vpop.f32.mrf.mxu1  ;;  %7707 = vmatmul.mubr.bf16.gmra.mxu1 %v9305_v4 }
 0x24b   : > { %v9324_v21 = vadd.f32 %v7516_v10, %v7452_v61  ;;  %7710 = vmatprep.mubr.bf16.mxu1 %v9307_v24  ;;  %7819 = vmatpush3.bf16.msra.mxu1 %v8147_v47 }
 0x24c   : > { %v3225_v19 = vpop.f32.mrf.mxu0  ;;  %v2949_v44 = vpop.f32.mrf.mxu1  ;;  %7820 = vmatprep.subr.bf16.mxu1 %v8150_v40 }
 0x24d   : > { %v9334_v3 = vadd.f32 %v3222_v12, %v2949_v44  ;;  %v9349_v12 = vld [vmem:[#allocation2 + $0x50] sm:$0xff]  }
 0x24e   : > { %v7520_v16 = vpop.f32.mrf.mxu0  ;;  %7775 = vmatmul.mubr.bf16.gmra.mxu0 %v9327_v34  ;;  %v7453_v29 = vpop.f32.mrf.mxu1 }
 0x24f   : > { %7778 = vmatprep.mubr.bf16.mxu0 %v9329_v6  ;;  %v9338_v28 = vadd.f32 %v7517_v23, %v7453_v29  ;;  %7821 = vmatpush3.bf16.msra.mxu1 %v8150_v40  ;;  %v9351_v40 = vld [vmem:[#allocation2 + $0x58] sm:$0xff]   ;;  %v8163_v23 = vld [vmem:[%s10129_s5 + $0x208] sm:$0xff]  }
 0x250   : > { %v3238_v59 = vpop.f32.mrf.mxu0  ;;  %v2952_v41 = vpop.f32.mrf.mxu1  ;;  %7822 = vmatprep.subr.bf16.mxu1 %v8155_v22 }
 0x251   : > { %v9343_v18 = vadd.f32 %v3225_v19, %v2952_v41  ;;  %v8166_v41 = vld [vmem:[%s10129_s5 + $0x200] sm:$0xff]  }
 0x252   : > { %v7521_v54 = vpop.f32.mrf.mxu0  ;;  %v7456_v47 = vpop.f32.mrf.mxu1  ;;  %7711 = vmatmul.mubr.bf16.gmra.mxu1 %v9327_v34 }
 0x253   : > { %v9346_v10 = vadd.f32 %v7520_v16, %v7456_v47  ;;  %7714 = vmatprep.mubr.bf16.mxu1 %v9329_v6  ;;  %7823 = vmatpush3.bf16.msra.mxu1 %v8155_v22 }
 0x254   : > { %v3241_v58 = vpop.f32.mrf.mxu0  ;;  %v2965_v46 = vpop.f32.mrf.mxu1  ;;  %7824 = vmatprep.subr.bf16.mxu1 %v8158_v27 }
 0x255   : > { %v9356_v61 = vadd.f32 %v3238_v59, %v2965_v46 }
 0x256   : > { %v7524_v19 = vpop.f32.mrf.mxu0  ;;  %7779 = vmatmul.mubr.bf16.gmra.mxu0 %v9349_v12  ;;  %v7457_v44 = vpop.f32.mrf.mxu1 }
 0x257   : > { %7782 = vmatprep.mubr.bf16.mxu0 %v9351_v40  ;;  %v9360_v16 = vadd.f32 %v7521_v54, %v7457_v44  ;;  %7825 = vmatpush3.bf16.msra.mxu1 %v8158_v27  ;;  %v9371_v44 = vld [vmem:[#allocation2 + $0x60] sm:$0xff]  }
 0x258   : > { %v3254_v29 = vpop.f32.mrf.mxu0  ;;  %v2968_v22 = vpop.f32.mrf.mxu1  ;;  %7826 = vmatprep.subr.bf16.mxu1 %v8163_v23 }
 0x259   : > { %v9365_v47 = vadd.f32 %v3241_v58, %v2968_v22 }
 0x25a   : > { %v7525_v59 = vpop.f32.mrf.mxu0  ;;  %v7460_v46 = vpop.f32.mrf.mxu1  ;;  %7715 = vmatmul.mubr.bf16.gmra.mxu1 %v9349_v12 }
 0x25b   : > { %v9368_v35 = vadd.f32 %v7524_v19, %v7460_v46  ;;  %7718 = vmatprep.mubr.bf16.mxu1 %v9351_v40  ;;  %7827 = vmatpush3.bf16.msra.mxu1 %v8163_v23 }
 0x25c   : > { %v3257_v54 = vpop.f32.mrf.mxu0  ;;  %v2981_v27 = vpop.f32.mrf.mxu1  ;;  %7828 = vmatprep.subr.bf16.mxu1 %v8166_v41 }
 0x25d   : > { %v9375_v14 = vadd.f32 %v3254_v29, %v2981_v27  ;;  %v9387_v27 = vld [vmem:[#allocation2 + $0x70] sm:$0xff]  }
 0x25e   : > { %v7528_v58 = vpop.f32.mrf.mxu0  ;;  %7783 = vmatmul.mubr.bf16.gmra.mxu0 %v9371_v44  ;;  %v7461_v22 = vpop.f32.mrf.mxu1 }
 0x25f   : > { %7786 = vmatprep.mubr.bf16.mxu0 %v9373_v53  ;;  %v9379_v19 = vadd.f32 %v7525_v59, %v7461_v22  ;;  %7829 = vmatpush3.bf16.msra.mxu1 %v8166_v41 }
 0x260   : > { %v3270_v46 = vpop.f32.mrf.mxu0  ;;  %v2984_v17 = vpop.f32.mrf.mxu1 }
 0x261   : > { %v9381_v51 = vadd.f32 %v3257_v54, %v2984_v17 }
 0x262   : > { %v7529_v23 = vpop.f32.mrf.mxu0  ;;  %v7464_v63 = vpop.f32.mrf.mxu1  ;;  %7719 = vmatmul.mubr.bf16.gmra.mxu1 %v9371_v44 }
 0x263   : > { %v9384_v39 = vadd.f32 %v7528_v58, %v7464_v63  ;;  %7722 = vmatprep.mubr.bf16.mxu1 %v9373_v53 }
 0x264   : > { %v3273_v29 = vpop.f32.mrf.mxu0  ;;  %v2997_v5 = vpop.f32.mrf.mxu1 }
 0x265   : > { %10165 = vst [vmem:[#allocation29_spill] sm:$0xff] %v9384_v39  ;;  %v9391_v59 = vadd.f32 %v3270_v46, %v2997_v5  ;;  %v9403_v46 = vld [vmem:[#allocation2 + $0x80] sm:$0xff]  }
 0x266   : > { %v7532_v41 = vpop.f32.mrf.mxu0  ;;  %7787 = vmatmul.mubr.bf16.gmra.mxu0 %v9387_v27  ;;  %v7465_v17 = vpop.f32.mrf.mxu1 }
 0x267   : > { %10166 = vst [vmem:[#allocation30_spill] sm:$0xff] %v9391_v59  ;;  %7790 = vmatprep.mubr.bf16.mxu0 %v9389_v31  ;;  %v9395_v54 = vadd.f32 %v7529_v23, %v7465_v17 }
 0x268   : > { %v3286_v63 = vpop.f32.mrf.mxu0  ;;  %v3000_v58 = vpop.f32.mrf.mxu1 }
 0x269   : > { %10167 = vst [vmem:[#allocation31_spill] sm:$0xff] %v9395_v54  ;;  %v9397_v22 = vadd.f32 %v3273_v29, %v3000_v58 }
 0x26a   : > { %v7533_v30 = vpop.f32.mrf.mxu0  ;;  %v7468_v25 = vpop.f32.mrf.mxu1  ;;  %7723 = vmatmul.mubr.bf16.gmra.mxu1 %v9387_v27 }
 0x26b   : > { %10168 = vst [vmem:[#allocation32_spill] sm:$0xff] %v9397_v22  ;;  %v9400_v1 = vadd.f32 %v7532_v41, %v7468_v25  ;;  %7726 = vmatprep.mubr.bf16.mxu1 %v9389_v31 }
 0x26c   : > { %v3289_v5 = vpop.f32.mrf.mxu0  ;;  %v3013_v48 = vpop.f32.mrf.mxu1 }
 0x26d   : > { %10169 = vst [vmem:[#allocation33_spill] sm:$0xff] %v9400_v1  ;;  %v9407_v23 = vadd.f32 %v3286_v63, %v3013_v48  ;;  %v9419_v63 = vld [vmem:[#allocation2 + $0x90] sm:$0xff]   ;;  %v9421_v1 = vld [vmem:[#allocation2 + $0x98] sm:$0xff]  }
 0x26e   : > { %v7536_v17 = vpop.f32.mrf.mxu0  ;;  %7791 = vmatmul.mubr.bf16.gmra.mxu0 %v9403_v46  ;;  %v7469_v29 = vpop.f32.mrf.mxu1 }
 0x26f   : > { %10170 = vst [vmem:[#allocation34_spill] sm:$0xff] %v9407_v23  ;;  %7794 = vmatprep.mubr.bf16.mxu0 %v9405_v13  ;;  %v9411_v58 = vadd.f32 %v7533_v30, %v7469_v29 }
 0x270   : > { %v3302_v25 = vpop.f32.mrf.mxu0  ;;  %v3016_v41 = vpop.f32.mrf.mxu1 }
 0x271   : > { %10171 = vst [vmem:[#allocation35_spill] sm:$0xff] %v9411_v58  ;;  %v9413_v26 = vadd.f32 %v3289_v5, %v3016_v41 }
 0x272   : > { %v7537_v38 = vpop.f32.mrf.mxu0  ;;  %v7472_v62 = vpop.f32.mrf.mxu1  ;;  %7727 = vmatmul.mubr.bf16.gmra.mxu1 %v9403_v46 }
 0x273   : > { %10172 = vst [vmem:[#allocation36_spill] sm:$0xff] %v9413_v26  ;;  %v9416_v2 = vadd.f32 %v7536_v17, %v7472_v62  ;;  %7730 = vmatprep.mubr.bf16.mxu1 %v9405_v13 }
 0x274   : > { %v3305_v48 = vpop.f32.mrf.mxu0  ;;  %v3029_v23 = vpop.f32.mrf.mxu1 }
 0x275   : > { %10173 = vst [vmem:[#allocation37_spill] sm:$0xff] %v9416_v2  ;;  %v9423_v30 = vadd.f32 %v3302_v25, %v3029_v23  ;;  %v9435_v25 = vld [vmem:[#allocation2 + $0xa0] sm:$0xff]  }
 0x276   : > { %v7540_v29 = vpop.f32.mrf.mxu0  ;;  %7795 = vmatmul.mubr.bf16.gmra.mxu0 %v9419_v63  ;;  %v7473_v5 = vpop.f32.mrf.mxu1 }
 0x277   : > { %10174 = vst [vmem:[#allocation38_spill] sm:$0xff] %v9423_v30  ;;  %7798 = vmatprep.mubr.bf16.mxu0 %v9421_v1  ;;  %v9427_v41 = vadd.f32 %v7537_v38, %v7473_v5 }
 0x278   : > { %v3318_v62 = vpop.f32.mrf.mxu0  ;;  %v3032_v17 = vpop.f32.mrf.mxu1 }
 0x279   : > { %10175 = vst [vmem:[#allocation39_spill] sm:$0xff] %v9427_v41  ;;  %v9429_v2 = vadd.f32 %v3305_v48, %v3032_v17 }
 0x27a   : > { %v7541_v26 = vpop.f32.mrf.mxu0  ;;  %v7476_v58 = vpop.f32.mrf.mxu1  ;;  %7731 = vmatmul.mubr.bf16.gmra.mxu1 %v9419_v63 }
 0x27b   : > { %10176 = vst [vmem:[#allocation40_spill] sm:$0xff] %v9429_v2  ;;  %v9432_v20 = vadd.f32 %v7540_v29, %v7476_v58  ;;  %7734 = vmatprep.mubr.bf16.mxu1 %v9421_v1 }
 0x27c   : > { %v3321_v23 = vpop.f32.mrf.mxu0  ;;  %v3045_v30 = vpop.f32.mrf.mxu1 }
 0x27d   : > { %10177 = vst [vmem:[#allocation41_spill] sm:$0xff] %v9432_v20  ;;  %v9439_v38 = vadd.f32 %v3318_v62, %v3045_v30  ;;  %v9453_v62 = vld [vmem:[#allocation2 + $0xb0] sm:$0xff]  }
 0x27e   : > { %v7544_v5 = vpop.f32.mrf.mxu0  ;;  %7799 = vmatmul.mubr.bf16.gmra.mxu0 %v9435_v25  ;;  %v7477_v48 = vpop.f32.mrf.mxu1 }
 0x27f   : > { %10178 = vst [vmem:[#allocation42_spill] sm:$0xff] %v9439_v38  ;;  %7802 = vmatprep.mubr.bf16.mxu0 %v9437_v60  ;;  %v9443_v17 = vadd.f32 %v7541_v26, %v7477_v48 }
 0x280   : > { %v3334_v58 = vpop.f32.mrf.mxu0  ;;  %v3048_v29 = vpop.f32.mrf.mxu1 }
 0x281   : > { %10179 = vst [vmem:[#allocation43_spill] sm:$0xff] %v9443_v17  ;;  %v9445_v20 = vadd.f32 %v3321_v23, %v3048_v29  ;;  %v9473_v17 = vld [vmem:[#allocation2 + $0xc8] sm:$0xff]  }
 0x282   : > { %v7545_v41 = vpop.f32.mrf.mxu0  ;;  %v7480_v2 = vpop.f32.mrf.mxu1  ;;  %7735 = vmatmul.mubr.bf16.gmra.mxu1 %v9435_v25 }
 0x283   : > { %10180 = vst [vmem:[#allocation44_spill] sm:$0xff] %v9445_v20  ;;  %v9448_v22 = vadd.f32 %v7544_v5, %v7480_v2  ;;  %7738 = vmatprep.mubr.bf16.mxu1 %v9437_v60 }
 0x284   : > { %v9451_v30 = vpop.f32.mrf.mxu0  ;;  %v3061_v38 = vpop.f32.mrf.mxu1 }
 0x285   : > { %10181 = vst [vmem:[#allocation45_spill] sm:$0xff] %v9448_v22  ;;  %10182 = vst [vmem:[#allocation46_spill] sm:$0xff] %v9451_v30  ;;  %v9457_v26 = vadd.f32 %v3334_v58, %v3061_v38  ;;  %v9471_v58 = vld [vmem:[#allocation2 + $0xc0] sm:$0xff]  }
 0x286   : > { %v7548_v48 = vpop.f32.mrf.mxu0  ;;  %7803 = vmatmul.mubr.bf16.gmra.mxu0 %v9453_v62  ;;  %v7481_v23 = vpop.f32.mrf.mxu1 }
 0x287   : > { %10183 = vst [vmem:[#allocation47_spill] sm:$0xff] %v9457_v26  ;;  %7806 = vmatprep.mubr.bf16.mxu0 %v9455_v49  ;;  %v9461_v29 = vadd.f32 %v7545_v41, %v7481_v23 }
 0x288   : > { %v3350_v2 = vpop.f32.mrf.mxu0  ;;  %v9463_v5 = vpop.f32.mrf.mxu1 }
 0x289   : > { %10184 = vst [vmem:[#allocation48_spill] sm:$0xff] %v9461_v29  ;;  %10185 = vst [vmem:[#allocation49_spill] sm:$0xff] %v9463_v5 }
 0x28a   : > { %v7549_v22 = vpop.f32.mrf.mxu0  ;;  %v7484_v30 = vpop.f32.mrf.mxu1  ;;  %7739 = vmatmul.mubr.bf16.gmra.mxu1 %v9453_v62 }
 0x28b   : > { %v9466_v20 = vadd.f32 %v7548_v48, %v7484_v30  ;;  %7742 = vmatprep.mubr.bf16.mxu1 %v9455_v49 }
 0x28c   : > { %v9469_v38 = vpop.f32.mrf.mxu0  ;;  %v3077_v26 = vpop.f32.mrf.mxu1 }
 0x28d   : > { %10186 = vst [vmem:[#allocation50_spill] sm:$0xff] %v9466_v20  ;;  %10187 = vst [vmem:[#allocation51_spill] sm:$0xff] %v9469_v38  ;;  %v9475_v41 = vadd.f32 %v3350_v2, %v3077_v26  ;;  %v9483_v38 = vld [vmem:[#allocation2 + $0xd0] sm:$0xff]  }
 0x28e   : > { %v7552_v23 = vpop.f32.mrf.mxu0  ;;  %7807 = vmatmul.mubr.bf16.gmra.mxu0 %v9471_v58  ;;  %v7485_v29 = vpop.f32.mrf.mxu1 }
 0x28f   : > { %10188 = vst [vmem:[#allocation52_spill] sm:$0xff] %v9475_v41  ;;  %7810 = vmatprep.mubr.bf16.mxu0 %v9473_v17  ;;  %v9479_v5 = vadd.f32 %v7549_v22, %v7485_v29 }
 0x290   : > { %v3366_v30 = vpop.f32.mrf.mxu0  ;;  %v9481_v48 = vpop.f32.mrf.mxu1 }
 0x291   : > { %10189 = vst [vmem:[#allocation53_spill] sm:$0xff] %v9479_v5  ;;  %10190 = vst [vmem:[#allocation54_spill] sm:$0xff] %v9481_v48 }
 0x292   : > { %v7553_v20 = vpop.f32.mrf.mxu0  ;;  %v7488_v54 = vpop.f32.mrf.mxu1  ;;  %7743 = vmatmul.mubr.bf16.gmra.mxu1 %v9471_v58 }
 0x293   : > { %v9486_v7 = vadd.f32 %v7552_v23, %v7488_v54  ;;  %7746 = vmatprep.mubr.bf16.mxu1 %v9473_v17 }
 0x294   : > { %v9489_v26 = vpop.f32.mrf.mxu0  ;;  %v3093_v2 = vpop.f32.mrf.mxu1 }
 0x295   : > { %10191 = vst [vmem:[#allocation55_spill] sm:$0xff] %v9486_v7  ;;  %10192 = vst [vmem:[#allocation56_spill] sm:$0xff] %v9489_v26  ;;  %v9491_v41 = vadd.f32 %v3366_v30, %v3093_v2 }
 0x296   : > { %v7556_v22 = vpop.f32.mrf.mxu0  ;;  %7811 = vmatmul.mubr.bf16.gmra.mxu0 %v9483_v38  ;;  %v7489_v29 = vpop.f32.mrf.mxu1 }
 0x297   : > { %10193 = vst [vmem:[#allocation57_spill] sm:$0xff] %v9491_v41  ;;  %v9494_v5 = vadd.f32 %v7553_v20, %v7489_v29 }
 0x298   : > { %v3382_v48 = vpop.f32.mrf.mxu0  ;;  %v9496_v59 = vpop.f32.mrf.mxu1 }
 0x299   : > { %10194 = vst [vmem:[#allocation58_spill] sm:$0xff] %v9494_v5  ;;  %10195 = vst [vmem:[#allocation59_spill] sm:$0xff] %v9496_v59 }
 0x29a   : > { %v7557_v39 = vpop.f32.mrf.mxu0  ;;  %v7492_v11 = vpop.f32.mrf.mxu1  ;;  %7747 = vmatmul.mubr.bf16.gmra.mxu1 %v9483_v38 }
 0x29b   : > { %v9499_v54 = vadd.f32 %v7556_v22, %v7492_v11  ;;  %7830 = vmatprep.mubr.bf16.mxu1 %v9277_v55 }
 0x29c   : > { %v9502_v23 = vpop.f32.mrf.mxu0  ;;  %v3109_v30 = vpop.f32.mrf.mxu1 }
 0x29d   : > { %10196 = vst [vmem:[#allocation60_spill] sm:$0xff] %v9502_v23  ;;  %v9504_v2 = vadd.f32 %v3382_v48, %v3109_v30 }
 0x29e   : > { %v7640_v26 = vpop.f32.mrf.mxu0  ;;  %v7493_v41 = vpop.f32.mrf.mxu1 }
 0x29f   : > { %10197 = vst [vmem:[#allocation61_spill] sm:$0xff] %v9504_v2  ;;  %v9506_v20 = vadd.f32 %v7557_v39, %v7493_v41 }
 0x2a0   : > { %v3769_v29 = vpop.f32.mrf.mxu0  ;;  %v9508_v5 = vpop.f32.mrf.mxu1 }
 0x2a1   : > { %10198 = vst [vmem:[#allocation62_spill] sm:$0xff] %v9506_v20  ;;  %10199 = vst [vmem:[#allocation63_spill] sm:$0xff] %v9508_v5 }
 0x2a2   : > { %v7641_v59 = vpop.f32.mrf.mxu0  ;;  %v7576_v7 = vpop.f32.mrf.mxu1  ;;  %7831 = vmatmul.mubr.bf16.vlgmr.msra.gmra.mxu1 %v9289_v9 }
 0x2a3   : > { %v9511_v11 = vadd.f32 %v7640_v26, %v7576_v7  ;;  %7834 = vmatprep.mubr.bf16.mxu1 %v9291_v57 }
 0x2a4   : > { %v9514_v55 = vpop.f32.mrf.mxu0  ;;  %v3496_v22 = vpop.f32.mrf.mxu1 }
 0x2a5   : > { %10200 = vst [vmem:[#allocation64_spill] sm:$0xff] %v9511_v11  ;;  %v9516_v48 = vadd.f32 %v3769_v29, %v3496_v22 }
 0x2a6   : > { %v7644_v30 = vpop.f32.mrf.mxu0  ;;  %v7577_v23 = vpop.f32.mrf.mxu1 }
 0x2a7   : > { %10201 = vst [vmem:[#allocation65_spill] sm:$0xff] %v9516_v48  ;;  %v9518_v39 = vadd.f32 %v7641_v59, %v7577_v23 }
 0x2a8   : > { %v3785_v41 = vpop.f32.mrf.mxu0  ;;  %v9520_v20 = vpop.f32.mrf.mxu1 }
 0x2a9   : > { %10202 = vst [vmem:[#allocation66_spill] sm:$0xff] %v9518_v39 }
 0x2aa   : > { %v7645_v5 = vpop.f32.mrf.mxu0  ;;  %v7580_v2 = vpop.f32.mrf.mxu1  ;;  %7835 = vmatmul.mubr.bf16.gmra.mxu1 %v9305_v4 }
 0x2ab   : > { %v9523_v7 = vadd.f32 %v7644_v30, %v7580_v2  ;;  %7838 = vmatprep.mubr.bf16.mxu1 %v9307_v24 }
 0x2ac   : > { %v9526_v9 = vpop.f32.mrf.mxu0  ;;  %v3512_v57 = vpop.f32.mrf.mxu1 }
 0x2ad   : > { %10203 = vst [vmem:[#allocation67_spill] sm:$0xff] %v9526_v9  ;;  %v9528_v26 = vadd.f32 %v3785_v41, %v3512_v57 }
 0x2ae   : > { %v7648_v29 = vpop.f32.mrf.mxu0  ;;  %v7581_v22 = vpop.f32.mrf.mxu1 }
 0x2af   : > { %10204 = vst [vmem:[#allocation68_spill] sm:$0xff] %v9528_v26  ;;  %v9530_v59 = vadd.f32 %v7645_v5, %v7581_v22 }
 0x2b0   : > { %v3801_v23 = vpop.f32.mrf.mxu0  ;;  %v9532_v39 = vpop.f32.mrf.mxu1 }
 0x2b1   : > { %10205 = vst [vmem:[#allocation69_spill] sm:$0xff] %v9530_v59  ;;  %10206 = vst [vmem:[#allocation70_spill] sm:$0xff] %v9532_v39 }
 0x2b2   : > { %v7649_v48 = vpop.f32.mrf.mxu0  ;;  %v7584_v11 = vpop.f32.mrf.mxu1  ;;  %7839 = vmatmul.mubr.bf16.gmra.mxu1 %v9327_v34 }
 0x2b3   : > { %v9535_v4 = vadd.f32 %v7648_v29, %v7584_v11  ;;  %7842 = vmatprep.mubr.bf16.mxu1 %v9329_v6 }
 0x2b4   : > { %v3804_v24 = vpop.f32.mrf.mxu0  ;;  %v3528_v2 = vpop.f32.mrf.mxu1 }
 0x2b5   : > { %v9538_v30 = vadd.f32 %v3801_v23, %v3528_v2 }
 0x2b6   : > { %v7652_v41 = vpop.f32.mrf.mxu0  ;;  %v7585_v57 = vpop.f32.mrf.mxu1 }
 0x2b7   : > { %v9540_v9 = vadd.f32 %v7649_v48, %v7585_v57 }
 0x2b8   : > { %v3817_v5 = vpop.f32.mrf.mxu0  ;;  %v3531_v22 = vpop.f32.mrf.mxu1 }
 0x2b9   : > { %10207 = vst [vmem:[#allocation71_spill] sm:$0xff] %v9540_v9  ;;  %v9542_v59 = vadd.f32 %v3804_v24, %v3531_v22 }
 0x2ba   : > { %v7653_v39 = vpop.f32.mrf.mxu0  ;;  %v7588_v26 = vpop.f32.mrf.mxu1  ;;  %7843 = vmatmul.mubr.bf16.gmra.mxu1 %v9349_v12 }
 0x2bb   : > { %10208 = vst [vmem:[#allocation72_spill] sm:$0xff] %v9542_v59  ;;  %v9545_v34 = vadd.f32 %v7652_v41, %v7588_v26  ;;  %7846 = vmatprep.mubr.bf16.mxu1 %v9351_v40 }
 0x2bc   : > { %v3820_v6 = vpop.f32.mrf.mxu0  ;;  %v3544_v11 = vpop.f32.mrf.mxu1 }
 0x2bd   : > { %v9548_v29 = vadd.f32 %v3817_v5, %v3544_v11 }
 0x2be   : > { %v7656_v23 = vpop.f32.mrf.mxu0  ;;  %v7589_v2 = vpop.f32.mrf.mxu1 }
 0x2bf   : > { %v9550_v48 = vadd.f32 %v7653_v39, %v7589_v2 }
 0x2c0   : > { %v3833_v57 = vpop.f32.mrf.mxu0  ;;  %v3547_v9 = vpop.f32.mrf.mxu1 }
 0x2c1   : > { %10209 = vst [vmem:[#allocation73_spill] sm:$0xff] %v9550_v48  ;;  %v9552_v24 = vadd.f32 %v3820_v6, %v3547_v9  ;;  %v8168_v9 = vld [vmem:[%s10131_s7 + $0x38] sm:$0xff]  }
 0x2c2   : > { %v7657_v22 = vpop.f32.mrf.mxu0  ;;  %v7592_v59 = vpop.f32.mrf.mxu1  ;;  %7847 = vmatmul.mubr.bf16.gmra.mxu1 %v9371_v44  ;;  %7878 = vmatprep.subr.bf16.mxu0 %v8168_v9 }
 0x2c3   : > { %v9555_v12 = vadd.f32 %v7656_v23, %v7592_v59  ;;  %7850 = vmatprep.mubr.bf16.mxu1 %v9373_v53  ;;  %7926 = vmatprep.subr.bf16.mxu1 %v8168_v9 }
 0x2c4   : > { %v3836_v40 = vpop.f32.mrf.mxu0  ;;  %v3560_v26 = vpop.f32.mrf.mxu1  ;;  %7879 = vmatpush3.bf16.msra.mxu0 %v8168_v9  ;;  %7934 = vmatpush3.bf16.msra.mxu1 %v8168_v9 }
 0x2c5   : > { %v9558_v41 = vadd.f32 %v3833_v57, %v3560_v26 }
 0x2c6   : > { %v7660_v5 = vpop.f32.mrf.mxu0  ;;  %v7593_v11 = vpop.f32.mrf.mxu1 }
 0x2c7   : > { %10210 = vst [vmem:[#allocation74_spill] sm:$0xff] %v9558_v41  ;;  %v9560_v39 = vadd.f32 %v7657_v22, %v7593_v11 }
 0x2c8   : > { %v3849_v2 = vpop.f32.mrf.mxu0  ;;  %v3563_v6 = vpop.f32.mrf.mxu1 }
 0x2c9   : > { %10211 = vst [vmem:[#allocation75_spill] sm:$0xff] %v9560_v39  ;;  %v9565_v48 = vadd.f32 %v3836_v40, %v3563_v6 }
 0x2ca   : > { %v7661_v44 = vpop.f32.mrf.mxu0  ;;  %v7596_v53 = vpop.f32.mrf.mxu1  ;;  %7851 = vmatmul.mubr.bf16.gmra.mxu1 %v9387_v27 }
 0x2cb   : > { %10212 = vst [vmem:[#allocation76_spill] sm:$0xff] %v9565_v48  ;;  %v9568_v59 = vadd.f32 %v7660_v5, %v7596_v53  ;;  %7854 = vmatprep.mubr.bf16.mxu1 %v9389_v31 }
 0x2cc   : > { %v3852_v23 = vpop.f32.mrf.mxu0  ;;  %v3576_v57 = vpop.f32.mrf.mxu1 }
 0x2cd   : > { %v9571_v22 = vadd.f32 %v3849_v2, %v3576_v57 }
 0x2ce   : > { %v7664_v26 = vpop.f32.mrf.mxu0  ;;  %v7597_v11 = vpop.f32.mrf.mxu1 }
 0x2cf   : > { %v9573_v40 = vadd.f32 %v7661_v44, %v7597_v11  ;;  %v8169_v44 = vld [vmem:[%s10131_s7 + $0x30] sm:$0xff]  }
 0x2d0   : > { %v3865_v6 = vpop.f32.mrf.mxu0  ;;  %v3579_v48 = vpop.f32.mrf.mxu1  ;;  %7880 = vmatprep.subr.bf16.mxu0 %v8169_v44  ;;  %7927 = vmatprep.subr.bf16.mxu1 %v8169_v44 }
 0x2d1   : > { %v9575_v39 = vadd.f32 %v3852_v23, %v3579_v48  ;;  %7881 = vmatpush3.bf16.msra.mxu0 %v8169_v44  ;;  %7935 = vmatpush3.bf16.msra.mxu1 %v8169_v44 }
 0x2d2   : > { %v7665_v41 = vpop.f32.mrf.mxu0  ;;  %v7600_v27 = vpop.f32.mrf.mxu1  ;;  %7855 = vmatmul.mubr.bf16.gmra.mxu1 %v9403_v46 }
 0x2d3   : > { %v9578_v5 = vadd.f32 %v7664_v26, %v7600_v27  ;;  %7858 = vmatprep.mubr.bf16.mxu1 %v9405_v13 }
 0x2d4   : > { %v3868_v31 = vpop.f32.mrf.mxu0  ;;  %v3592_v9 = vpop.f32.mrf.mxu1 }
 0x2d5   : > { %10213 = vst [vmem:[#allocation77_spill] sm:$0xff] %v9578_v5  ;;  %v9581_v2 = vadd.f32 %v3865_v6, %v3592_v9 }
 0x2d6   : > { %v7668_v53 = vpop.f32.mrf.mxu0  ;;  %v7601_v57 = vpop.f32.mrf.mxu1 }
 0x2d7   : > { %10214 = vst [vmem:[#allocation78_spill] sm:$0xff] %v9581_v2  ;;  %v9586_v48 = vadd.f32 %v7665_v41, %v7601_v57 }
 0x2d8   : > { %v3881_v23 = vpop.f32.mrf.mxu0  ;;  %v3595_v46 = vpop.f32.mrf.mxu1 }
 0x2d9   : > { %10215 = vst [vmem:[#allocation79_spill] sm:$0xff] %v9586_v48  ;;  %v9588_v26 = vadd.f32 %v3868_v31, %v3595_v46  ;;  %v8170_v31 = vld [vmem:[%s10131_s7 + $0x28] sm:$0xff]  }
 0x2da   : > { %v7669_v13 = vpop.f32.mrf.mxu0  ;;  %v7604_v11 = vpop.f32.mrf.mxu1  ;;  %7859 = vmatmul.mubr.bf16.gmra.mxu1 %v9419_v63  ;;  %7882 = vmatprep.subr.bf16.mxu0 %v8170_v31 }
 0x2db   : > { %v9591_v6 = vadd.f32 %v7668_v53, %v7604_v11  ;;  %7862 = vmatprep.mubr.bf16.mxu1 %v9421_v1  ;;  %7928 = vmatprep.subr.bf16.mxu1 %v8170_v31 }
 0x2dc   : > { %v3884_v27 = vpop.f32.mrf.mxu0  ;;  %v3608_v9 = vpop.f32.mrf.mxu1  ;;  %7883 = vmatpush3.bf16.msra.mxu0 %v8170_v31  ;;  %7936 = vmatpush3.bf16.msra.mxu1 %v8170_v31 }
 0x2dd   : > { %v9594_v41 = vadd.f32 %v3881_v23, %v3608_v9 }
 0x2de   : > { %v7672_v57 = vpop.f32.mrf.mxu0  ;;  %v7605_v48 = vpop.f32.mrf.mxu1 }
 0x2df   : > { %v9596_v2 = vadd.f32 %v7669_v13, %v7605_v48 }
 0x2e0   : > { %v3897_v5 = vpop.f32.mrf.mxu0  ;;  %v3611_v44 = vpop.f32.mrf.mxu1 }
 0x2e1   : > { %10216 = vst [vmem:[#allocation80_spill] sm:$0xff] %v9596_v2  ;;  %v9601_v46 = vadd.f32 %v3884_v27, %v3611_v44 }
 0x2e2   : > { %v7673_v63 = vpop.f32.mrf.mxu0  ;;  %v7608_v1 = vpop.f32.mrf.mxu1  ;;  %7863 = vmatmul.mubr.bf16.gmra.mxu1 %v9435_v25 }
 0x2e3   : > { %10217 = vst [vmem:[#allocation81_spill] sm:$0xff] %v9601_v46  ;;  %v9604_v53 = vadd.f32 %v7672_v57, %v7608_v1  ;;  %7866 = vmatprep.mubr.bf16.mxu1 %v9437_v60 }
 0x2e4   : > { %v9607_v48 = vpop.f32.mrf.mxu0  ;;  %v3624_v23 = vpop.f32.mrf.mxu1 }
 0x2e5   : > { %10218 = vst [vmem:[#allocation82_spill] sm:$0xff] %v9604_v53  ;;  %10219 = vst [vmem:[#allocation83_spill] sm:$0xff] %v9607_v48  ;;  %v9609_v13 = vadd.f32 %v3897_v5, %v3624_v23 }
 0x2e6   : > { %v7676_v11 = vpop.f32.mrf.mxu0  ;;  %v7609_v27 = vpop.f32.mrf.mxu1 }
 0x2e7   : > { %10220 = vst [vmem:[#allocation84_spill] sm:$0xff] %v9609_v13  ;;  %v9611_v9 = vadd.f32 %v7673_v63, %v7609_v27  ;;  %v8171_v63 = vld [vmem:[%s10131_s7 + $0x20] sm:$0xff]  }
 0x2e8   : > { %v3913_v44 = vpop.f32.mrf.mxu0  ;;  %v9613_v46 = vpop.f32.mrf.mxu1  ;;  %7884 = vmatprep.subr.bf16.mxu0 %v8171_v63  ;;  %7929 = vmatprep.subr.bf16.mxu1 %v8171_v63 }
 0x2e9   : > { %10221 = vst [vmem:[#allocation85_spill] sm:$0xff] %v9611_v9  ;;  %10222 = vst [vmem:[#allocation86_spill] sm:$0xff] %v9613_v46  ;;  %7885 = vmatpush3.bf16.msra.mxu0 %v8171_v63  ;;  %7937 = vmatpush3.bf16.msra.mxu1 %v8171_v63  ;;  %v10271_v46 = vld [vmem:[#allocation19_spill] sm:$0xff] }
 0x2ea   : > { %v7677_v2 = vpop.f32.mrf.mxu0  ;;  %v7612_v25 = vpop.f32.mrf.mxu1  ;;  %7867 = vmatmul.mubr.bf16.gmra.mxu1 %v9453_v62 }
 0x2eb   : > { %v9616_v57 = vadd.f32 %v7676_v11, %v7612_v25  ;;  %7870 = vmatprep.mubr.bf16.mxu1 %v9455_v49 }
 0x2ec   : > { %v9619_v60 = vpop.f32.mrf.mxu0  ;;  %v3640_v31 = vpop.f32.mrf.mxu1 }
 0x2ed   : > { %10223 = vst [vmem:[#allocation87_spill] sm:$0xff] %v9616_v57  ;;  %10224 = vst [vmem:[#allocation88_spill] sm:$0xff] %v9619_v60  ;;  %v9621_v5 = vadd.f32 %v3913_v44, %v3640_v31 }
 0x2ee   : > { %v7680_v1 = vpop.f32.mrf.mxu0  ;;  %v7613_v23 = vpop.f32.mrf.mxu1 }
 0x2ef   : > { %10225 = vst [vmem:[#allocation89_spill] sm:$0xff] %v9621_v5  ;;  %v9626_v27 = vadd.f32 %v7677_v2, %v7613_v23 }
 0x2f0   : > { %v3929_v9 = vpop.f32.mrf.mxu0  ;;  %v9628_v48 = vpop.f32.mrf.mxu1 }
 0x2f1   : > { %10226 = vst [vmem:[#allocation90_spill] sm:$0xff] %v9626_v27  ;;  %10227 = vst [vmem:[#allocation91_spill] sm:$0xff] %v9628_v48  ;;  %v8172_v27 = vld [vmem:[%s10131_s7 + $0x18] sm:$0xff]  }
 0x2f2   : > { %v7681_v62 = vpop.f32.mrf.mxu0  ;;  %v7616_v49 = vpop.f32.mrf.mxu1  ;;  %7871 = vmatmul.mubr.bf16.gmra.mxu1 %v9471_v58  ;;  %7886 = vmatprep.subr.bf16.mxu0 %v8172_v27 }
 0x2f3   : > { %v9631_v11 = vadd.f32 %v7680_v1, %v7616_v49  ;;  %7874 = vmatprep.mubr.bf16.mxu1 %v9473_v17  ;;  %7930 = vmatprep.subr.bf16.mxu1 %v8172_v27 }
 0x2f4   : > { %v3932_v44 = vpop.f32.mrf.mxu0  ;;  %v3656_v25 = vpop.f32.mrf.mxu1  ;;  %7887 = vmatpush3.bf16.msra.mxu0 %v8172_v27  ;;  %7938 = vmatpush3.bf16.msra.mxu1 %v8172_v27 }
 0x2f5   : > { %10228 = vst [vmem:[#allocation92_spill] sm:$0xff] %v9631_v11  ;;  %v9634_v31 = vadd.f32 %v3929_v9, %v3656_v25 }
 0x2f6   : > { %v7684_v2 = vpop.f32.mrf.mxu0  ;;  %v7617_v23 = vpop.f32.mrf.mxu1 }
 0x2f7   : > { %10229 = vst [vmem:[#allocation93_spill] sm:$0xff] %v9634_v31  ;;  %v9639_v5 = vadd.f32 %v7681_v62, %v7617_v23  ;;  %v8173_v62 = vld [vmem:[%s10131_s7 + $0x10] sm:$0xff]  }
 0x2f8   : > { %v3945_v63 = vpop.f32.mrf.mxu0  ;;  %v3659_v57 = vpop.f32.mrf.mxu1  ;;  %7888 = vmatprep.subr.bf16.mxu0 %v8173_v62  ;;  %7931 = vmatprep.subr.bf16.mxu1 %v8173_v62 }
 0x2f9   : > { %10230 = vst [vmem:[#allocation94_spill] sm:$0xff] %v9639_v5  ;;  %v9641_v58 = vadd.f32 %v3932_v44, %v3659_v57  ;;  %7889 = vmatpush3.bf16.msra.mxu0 %v8173_v62  ;;  %7939 = vmatpush3.bf16.msra.mxu1 %v8173_v62  ;;  %v8174_v44 = vld [vmem:[%s10131_s7 + $0x8] sm:$0xff]  }
 0x2fa   : > { %v7685_v1 = vpop.f32.mrf.mxu0  ;;  %v7620_v17 = vpop.f32.mrf.mxu1  ;;  %7875 = vmatmul.mubr.bf16.gmra.mxu1 %v9483_v38  ;;  %7890 = vmatprep.subr.bf16.mxu0 %v8174_v44 }
 0x2fb   : > { %10231 = vst [vmem:[#allocation95_spill] sm:$0xff] %v9641_v58  ;;  %v9644_v9 = vadd.f32 %v7684_v2, %v7620_v17  ;;  %7932 = vmatprep.subr.bf16.mxu1 %v8174_v44  ;;  %v10260_v58 = vld [vmem:[#allocation43_spill] sm:$0xff] }
 0x2fc   : > { %v3948_v49 = vpop.f32.mrf.mxu0  ;;  %v3672_v25 = vpop.f32.mrf.mxu1 }
 0x2fd   : > { %10232 = vst [vmem:[#allocation96_spill] sm:$0xff] %v9644_v9  ;;  %v9649_v23 = vadd.f32 %v3945_v63, %v3672_v25  ;;  %7891 = vmatpush3.bf16.msra.mxu0 %v8174_v44  ;;  %7940 = vmatpush3.bf16.msra.mxu1 %v8174_v44 }
 0x2fe   : > { %v7768_v5 = vpop.f32.mrf.mxu0  ;;  %v7621_v31 = vpop.f32.mrf.mxu1 }
 0x2ff   : > { %10233 = vst [vmem:[#allocation97_spill] sm:$0xff] %v9649_v23  ;;  %v9651_v57 = vadd.f32 %v7685_v1, %v7621_v31  ;;  %v4751_v63 = vadd.f32 %v7768_v5, %v9301_v15  ;;  %v8175_v31 = vld [vmem:[%s10131_s7] sm:$0xff]  }
 0x300   : > { %v4558_v27 = vpop.f32.mrf.mxu0  ;;  %v3675_v38 = vpop.f32.mrf.mxu1  ;;  %7892 = vmatprep.subr.bf16.mxu0 %v8175_v31  ;;  %7933 = vmatprep.subr.bf16.mxu1 %v8175_v31 }
 0x301   : > { %10234 = vst [vmem:[#allocation98_spill] sm:$0xff] %v9651_v57  ;;  %v9656_v2 = vadd.f32 %v3948_v49, %v3675_v38  ;;  %v4749_v25 = vadd.f32 %v4558_v27, %v9312_v45  ;;  %v5187_v45 = vrot.slane %v4751_v63, 1  ;;  %7893 = vmatpush3.bf16.msra.mxu0 %v8175_v31  ;;  %7941 = vmatpush3.bf16.msra.mxu1 %v8175_v31 }
 0x302   : > { %v7769_v17 = vpop.f32.mrf.mxu0  ;;  %v7704_v23 = vpop.f32.mrf.mxu1 }
 0x303   : > { %10235 = vst [vmem:[#allocation99_spill] sm:$0xff] %v9656_v2  ;;  %v5184_v5 = vrot.slane %v4749_v25, 1  ;;  %v4752_v23 = vadd.f32 %v7769_v17, %v9316_v42 }
 0x304   : > { %v4561_v1 = vpop.f32.mrf.mxu0  ;;  %v4252_v62 = vpop.f32.mrf.mxu1 }
 0x305   : > { %v4750_v57 = vadd.f32 %v4561_v1, %v9321_v50  ;;  %v4427_v49 = vadd.f32 %v4252_v62, %v9152_v0  ;;  %v5189_v17 = vrot.slane %v4752_v23, 1 }
 0x306   : > { %v7772_v15 = vpop.f32.mrf.mxu0  ;;  %v7705_v38 = vpop.f32.mrf.mxu1 }
 0x307   : > { %v5185_v27 = vrot.slane %v4750_v57, 1  ;;  %v4429_v2 = vadd.f32 %v7705_v38, %v9156_v32  ;;  %v4755_v50 = vadd.f32 %v7772_v15, %v9324_v21 }
 0x308   : > { %v4574_v9 = vpop.f32.mrf.mxu0  ;;  %v4255_v1 = vpop.f32.mrf.mxu1 }
 0x309   : > { %v5186_v44 = vsel %vm5183_vm8, %v5184_v5, %v5185_v27  ;;  %v5188_v0 = vsel %vm5183_vm8, %v5185_v27, %v5187_v45  ;;  %v4753_v62 = vadd.f32 %v4574_v9, %v9334_v3  ;;  %v4428_v42 = vadd.f32 %v4255_v1, %v9164_v52 }
 0x30a   : > { %v9671_v63 = vadd.f32 %v5186_v44, %v4427_v49  ;;  %v7773_v57 = vpop.f32.mrf.mxu0  ;;  %v7708_v32 = vpop.f32.mrf.mxu1  ;;  %v5194_v15 = vrot.slane %v4755_v50, 1 }
 0x30b   : > { %v5190_v25 = vrot.slane %v4753_v62, 1  ;;  %v4756_v38 = vadd.f32 %v7773_v57, %v9338_v28  ;;  %v9675_v31 = vadd.f32 %v5188_v0, %v4428_v42  ;;  %v4431_v5 = vadd.f32 %v7708_v32, %v9167_v37 }
 0x30c   : > { %v4577_v21 = vpop.f32.mrf.mxu0  ;;  %v4267_v3 = vpop.f32.mrf.mxu1 }
 0x30d   : > { %v5191_v45 = vsel %vm5183_vm8, %v5189_v17, %v5190_v25  ;;  %v5195_v27 = vrot.slane %v4756_v38, 1  ;;  %v4754_v9 = vadd.f32 %v4577_v21, %v9343_v18  ;;  %v4430_v52 = vadd.f32 %v4267_v3, %v9176_v36 }
 0x30e   : > { %v9680_v49 = vadd.f32 %v5191_v45, %v4429_v2  ;;  %v7776_v23 = vpop.f32.mrf.mxu0  ;;  %v7709_v1 = vpop.f32.mrf.mxu1 }
 0x30f   : > { %v5196_v44 = vsel %vm5183_vm8, %v5194_v15, %v5195_v27  ;;  %v5192_v28 = vrot.slane %v4754_v9, 1  ;;  %v4432_v37 = vadd.f32 %v7709_v1, %v9180_v8  ;;  %v4759_v42 = vadd.f32 %v7776_v23, %v9346_v10 }
 0x310   : > { %v9684_v0 = vadd.f32 %v5196_v44, %v4431_v5  ;;  %v4590_v50 = vpop.f32.mrf.mxu0  ;;  %v4270_v57 = vpop.f32.mrf.mxu1 }
 0x311   : > { %v5193_v62 = vsel %vm5183_vm8, %v5190_v25, %v5192_v28  ;;  %v4757_v18 = vadd.f32 %v4590_v50, %v9356_v61  ;;  %v5200_v15 = vrot.slane %v4759_v42, 1 }
 0x312   : > { %v9690_v2 = vadd.f32 %v5193_v62, %v4430_v52  ;;  %v7777_v36 = vpop.f32.mrf.mxu0  ;;  %v7712_v32 = vpop.f32.mrf.mxu1 }
 0x313   : > { %v5197_v17 = vrot.slane %v4757_v18, 1  ;;  %v4760_v38 = vadd.f32 %v7777_v36, %v9360_v16  ;;  %v4434_v5 = vadd.f32 %v7712_v32, %v9188_v43 }
 0x314   : > { %v4593_v21 = vpop.f32.mrf.mxu0  ;;  %v4282_v25 = vpop.f32.mrf.mxu1 }
 0x315   : > { %v5198_v8 = vsel %vm5183_vm8, %v5195_v27, %v5197_v17  ;;  %v5202_v45 = vrot.slane %v4760_v38, 1  ;;  %v4758_v10 = vadd.f32 %v4593_v21, %v9365_v47 }
 0x316   : > { %v9696_v3 = vadd.f32 %v5198_v8, %v4432_v37  ;;  %v7780_v61 = vpop.f32.mrf.mxu0  ;;  %v7713_v23 = vpop.f32.mrf.mxu1 }
 0x317   : > { %v5203_v9 = vsel %vm5183_vm8, %v5200_v15, %v5202_v45  ;;  %v5199_v52 = vrot.slane %v4758_v10, 1  ;;  %v4763_v50 = vadd.f32 %v7780_v61, %v9368_v35  ;;  %v10237_v45 = vld [vmem:[#allocation29_spill] sm:$0xff] }
 0x318   : > { %v9699_v44 = vadd.f32 %v5203_v9, %v4434_v5  ;;  %v4606_v16 = vpop.f32.mrf.mxu0  ;;  %v4284_v28 = vpop.f32.mrf.mxu1 }
 0x319   : > { %v5201_v43 = vsel %vm5183_vm8, %v5199_v52, %v5200_v15  ;;  %v4433_v1 = vadd.f32 %v4284_v28, %v9199_v33  ;;  %v4761_v47 = vadd.f32 %v4606_v16, %v9375_v14  ;;  %v5207_v32 = vrot.slane %v4763_v50, 1  ;;  %v10236_v15 = vld [vmem:[#allocation6_spill] sm:$0xff]  ;;  %v10239_v52 = vld [vmem:[#allocation7_spill] sm:$0xff] }
 0x31a   : > { %v7781_v27 = vpop.f32.mrf.mxu0  ;;  %v7716_v37 = vpop.f32.mrf.mxu1 }
 0x31b   : > { %v9705_v62 = vadd.f32 %v5201_v43, %v4433_v1  ;;  %v5204_v38 = vrot.slane %v4761_v47, 1  ;;  %v4764_v5 = vadd.f32 %v7781_v27, %v9379_v19  ;;  %v10240_v1 = vld [vmem:[#allocation31_spill] sm:$0xff]  ;;  %v10241_v47 = vld [vmem:[#allocation8_spill] sm:$0xff] }
 0x31c   : > { %v4609_v42 = vpop.f32.mrf.mxu0  ;;  %v4296_v57 = vpop.f32.mrf.mxu1 }
 0x31d   : > { %v4762_v18 = vadd.f32 %v4609_v42, %v9381_v51  ;;  %v4435_v36 = vadd.f32 %v4296_v57, %v9206_v56  ;;  %v10238_v51 = vld [vmem:[#allocation30_spill] sm:$0xff]  ;;  %v5209_v19 = vrot.slane %v4764_v5, 1 }
 0x31e   : > { %v7784_v17 = vpop.f32.mrf.mxu0  ;;  %v7717_v21 = vpop.f32.mrf.mxu1 }
 0x31f   : > { %v5205_v33 = vrot.slane %v4762_v18, 1  ;;  %v4437_v35 = vadd.f32 %v7717_v21, %v10236_v15  ;;  %v4767_v25 = vadd.f32 %v7784_v17, %v10237_v45  ;;  %v10243_v21 = vld [vmem:[#allocation9_spill] sm:$0xff] }
 0x320   : > { %v4622_v8 = vpop.f32.mrf.mxu0  ;;  %v4299_v10 = vpop.f32.mrf.mxu1 }
 0x321   : > { %v5206_v14 = vsel %vm5183_vm8, %v5204_v38, %v5205_v33  ;;  %v5208_v61 = vsel %vm5183_vm8, %v5205_v33, %v5207_v32  ;;  %v4765_v9 = vadd.f32 %v4622_v8, %v10238_v51  ;;  %v4436_v23 = vadd.f32 %v4299_v10, %v10239_v52  ;;  %v10245_v52 = vld [vmem:[#allocation33_spill] sm:$0xff] }
 0x322   : > { %v9715_v56 = vadd.f32 %v5206_v14, %v4435_v36  ;;  %v7785_v16 = vpop.f32.mrf.mxu0  ;;  %v7720_v43 = vpop.f32.mrf.mxu1  ;;  %v5214_v57 = vrot.slane %v4767_v25, 1  ;;  %v10242_v36 = vld [vmem:[#allocation32_spill] sm:$0xff] }
 0x323   : > { %v5210_v28 = vrot.slane %v4765_v9, 1  ;;  %v4768_v27 = vadd.f32 %v7785_v16, %v10240_v1  ;;  %v9719_v50 = vadd.f32 %v5208_v61, %v4436_v23  ;;  %v4439_v37 = vadd.f32 %v7720_v43, %v10241_v47  ;;  %v10244_v61 = vld [vmem:[#allocation10_spill] sm:$0xff] }
 0x324   : > { %v4625_v42 = vpop.f32.mrf.mxu0  ;;  %v4311_v32 = vpop.f32.mrf.mxu1 }
 0x325   : > { %v5211_v18 = vsel %vm5183_vm8, %v5209_v19, %v5210_v28  ;;  %v5215_v17 = vrot.slane %v4768_v27, 1  ;;  %v4766_v38 = vadd.f32 %v4625_v42, %v10242_v36  ;;  %v4438_v5 = vadd.f32 %v4311_v32, %v10243_v21  ;;  %v10246_v19 = vld [vmem:[#allocation34_spill] sm:$0xff]  ;;  %v10247_v42 = vld [vmem:[#allocation35_spill] sm:$0xff] }
 0x326   : > { %v9724_v33 = vadd.f32 %v5211_v18, %v4437_v35  ;;  %v7788_v15 = vpop.f32.mrf.mxu0  ;;  %v7721_v45 = vpop.f32.mrf.mxu1  ;;  %v10248_v18 = vld [vmem:[#allocation11_spill] sm:$0xff] }
 0x327   : > { %v5216_v8 = vsel %vm5183_vm8, %v5214_v57, %v5215_v17  ;;  %v5212_v14 = vrot.slane %v4766_v38, 1  ;;  %v4440_v51 = vadd.f32 %v7721_v45, %v10244_v61  ;;  %v4771_v23 = vadd.f32 %v7788_v15, %v10245_v52 }
 0x328   : > { %v9728_v10 = vadd.f32 %v5216_v8, %v4439_v37  ;;  %v4638_v25 = vpop.f32.mrf.mxu0  ;;  %v4314_v16 = vpop.f32.mrf.mxu1  ;;  %v10249_v8 = vld [vmem:[#allocation36_spill] sm:$0xff] }
 0x329   : > { %v5213_v9 = vsel %vm5183_vm8, %v5210_v28, %v5212_v14  ;;  %v4769_v35 = vadd.f32 %v4638_v25, %v10246_v19  ;;  %v5220_v36 = vrot.slane %v4771_v23, 1  ;;  %v10250_v23 = vld [vmem:[#allocation12_spill] sm:$0xff] }
 0x32a   : > { %v9734_v43 = vadd.f32 %v5213_v9, %v4438_v5  ;;  %v7789_v1 = vpop.f32.mrf.mxu0  ;;  %v7724_v47 = vpop.f32.mrf.mxu1 }
 0x32b   : > { %v5217_v27 = vrot.slane %v4769_v35, 1  ;;  %v4772_v57 = vadd.f32 %v7789_v1, %v10247_v42  ;;  %v4442_v37 = vadd.f32 %v7724_v47, %v10248_v18  ;;  %v10251_v1 = vld [vmem:[#allocation37_spill] sm:$0xff]  ;;  %v10252_v47 = vld [vmem:[#allocation38_spill] sm:$0xff] }
 0x32c   : > { %v4641_v32 = vpop.f32.mrf.mxu0  ;;  %v4326_v28 = vpop.f32.mrf.mxu1 }
 0x32d   : > { %v5218_v38 = vsel %vm5183_vm8, %v5215_v17, %v5217_v27  ;;  %v5222_v21 = vrot.slane %v4772_v57, 1  ;;  %v4770_v15 = vadd.f32 %v4641_v32, %v10249_v8 }
 0x32e   : > { %v9740_v14 = vadd.f32 %v5218_v38, %v4440_v51  ;;  %v7792_v45 = vpop.f32.mrf.mxu0  ;;  %v7725_v25 = vpop.f32.mrf.mxu1  ;;  %v10253_v38 = vld [vmem:[#allocation40_spill] sm:$0xff] }
 0x32f   : > { %v5223_v5 = vsel %vm5183_vm8, %v5220_v36, %v5222_v21  ;;  %v5219_v61 = vrot.slane %v4770_v15, 1  ;;  %v4775_v27 = vadd.f32 %v7792_v45, %v10251_v1 }
 0x330   : > { %v9743_v9 = vadd.f32 %v5223_v5, %v4442_v37  ;;  %v4654_v52 = vpop.f32.mrf.mxu0  ;;  %v4328_v16 = vpop.f32.mrf.mxu1  ;;  %v10254_v37 = vld [vmem:[#allocation13_spill] sm:$0xff] }
 0x331   : > { %v5221_v19 = vsel %vm5183_vm8, %v5219_v61, %v5220_v36  ;;  %v4441_v35 = vadd.f32 %v4328_v16, %v10250_v23  ;;  %v4773_v42 = vadd.f32 %v4654_v52, %v10252_v47  ;;  %v5227_v15 = vrot.slane %v4775_v27, 1  ;;  %v10255_v36 = vld [vmem:[#allocation39_spill] sm:$0xff]  ;;  %v10256_v23 = vld [vmem:[#allocation14_spill] sm:$0xff] }
 0x332   : > { %v7793_v17 = vpop.f32.mrf.mxu0  ;;  %v7728_v51 = vpop.f32.mrf.mxu1  ;;  %v10259_v27 = vld [vmem:[#allocation15_spill] sm:$0xff] }
 0x333   : > { %v9749_v57 = vadd.f32 %v5221_v19, %v4441_v35  ;;  %v5224_v5 = vrot.slane %v4773_v42, 1  ;;  %v4776_v61 = vadd.f32 %v7793_v17, %v10255_v36  ;;  %v10257_v19 = vld [vmem:[#allocation41_spill] sm:$0xff] }
 0x334   : > { %v4657_v18 = vpop.f32.mrf.mxu0  ;;  %v4340_v32 = vpop.f32.mrf.mxu1 }
 0x335   : > { %v4774_v21 = vadd.f32 %v4657_v18, %v10253_v38  ;;  %v4443_v28 = vadd.f32 %v4340_v32, %v10254_v37  ;;  %v10258_v18 = vld [vmem:[#allocation42_spill] sm:$0xff]  ;;  %v5229_v17 = vrot.slane %v4776_v61, 1 }
 0x336   : > { %v7796_v8 = vpop.f32.mrf.mxu0  ;;  %v7729_v16 = vpop.f32.mrf.mxu1 }
 0x337   : > { %v5225_v25 = vrot.slane %v4774_v21, 1  ;;  %v4445_v45 = vadd.f32 %v7729_v16, %v10256_v23  ;;  %v4779_v35 = vadd.f32 %v7796_v8, %v10257_v19 }
 0x338   : > { %v4670_v1 = vpop.f32.mrf.mxu0  ;;  %v4343_v47 = vpop.f32.mrf.mxu1 }
 0x339   : > { %v5226_v52 = vsel %vm5183_vm8, %v5224_v5, %v5225_v25  ;;  %v5228_v51 = vsel %vm5183_vm8, %v5225_v25, %v5227_v15  ;;  %v4777_v38 = vadd.f32 %v4670_v1, %v10258_v18  ;;  %v4444_v42 = vadd.f32 %v4343_v47, %v10259_v27  ;;  %v10261_v5 = vld [vmem:[#allocation16_spill] sm:$0xff]  ;;  %v10263_v47 = vld [vmem:[#allocation17_spill] sm:$0xff] }
 0x33a   : > { %v9759_v32 = vadd.f32 %v5226_v52, %v4443_v28  ;;  %v7797_v37 = vpop.f32.mrf.mxu0  ;;  %v7732_v36 = vpop.f32.mrf.mxu1  ;;  %v5234_v19 = vrot.slane %v4779_v35, 1  ;;  %v10262_v28 = vld [vmem:[#allocation44_spill] sm:$0xff] }
 0x33b   : > { %v5230_v21 = vrot.slane %v4777_v38, 1  ;;  %v4780_v16 = vadd.f32 %v7797_v37, %v10260_v58  ;;  %v9763_v23 = vadd.f32 %v5228_v51, %v4444_v42  ;;  %v4447_v11 = vadd.f32 %v7732_v36, %v10261_v5  ;;  %v10264_v37 = vld [vmem:[#allocation18_spill] sm:$0xff] }
 0x33c   : > { %v4673_v8 = vpop.f32.mrf.mxu0  ;;  %v4355_v1 = vpop.f32.mrf.mxu1 }
 0x33d   : > { %v5231_v15 = vsel %vm5183_vm8, %v5229_v17, %v5230_v21  ;;  %v5235_v25 = vrot.slane %v4780_v16, 1  ;;  %v4778_v52 = vadd.f32 %v4673_v8, %v10262_v28  ;;  %v4446_v61 = vadd.f32 %v4355_v1, %v10263_v47  ;;  %v10265_v16 = vld [vmem:[#allocation45_spill] sm:$0xff]  ;;  %v10266_v8 = vld [vmem:[#allocation47_spill] sm:$0xff]  ;;  %v10269_v47 = vld [vmem:[#allocation46_spill] sm:$0xff] }
 0x33e   : > { %v9768_v18 = vadd.f32 %v5231_v15, %v4445_v45  ;;  %v7800_v38 = vpop.f32.mrf.mxu0  ;;  %v7733_v51 = vpop.f32.mrf.mxu1  ;;  %v10268_v28 = vld [vmem:[#allocation49_spill] sm:$0xff] }
 0x33f   : > { %v5236_v27 = vsel %vm5183_vm8, %v5234_v19, %v5235_v25  ;;  %v5232_v58 = vrot.slane %v4778_v52, 1  ;;  %v4448_v36 = vadd.f32 %v7733_v51, %v10264_v37  ;;  %v4783_v5 = vadd.f32 %v7800_v38, %v10265_v16 }
 0x340   : > { %v9772_v42 = vadd.f32 %v5236_v27, %v4447_v11  ;;  %v4686_v35 = vpop.f32.mrf.mxu0  ;;  %v4358_v60 = vpop.f32.mrf.mxu1  ;;  %v3338_v19 = vadd.f32 %v10269_v47, %v10268_v28  ;;  %v10270_v11 = vld [vmem:[#allocation48_spill] sm:$0xff] }
 0x341   : > { %v5233_v17 = vsel %vm5183_vm8, %v5230_v21, %v5232_v58  ;;  %v4781_v45 = vadd.f32 %v4686_v35, %v10266_v8  ;;  %v5240_v13 = vrot.slane %v4783_v5, 1 }
 0x342   : > { %v9778_v15 = vadd.f32 %v5233_v17, %v4446_v61  ;;  %v7801_v1 = vpop.f32.mrf.mxu0  ;;  %v7736_v48 = vpop.f32.mrf.mxu1 }
 0x343   : > { %v5237_v52 = vrot.slane %v4781_v45, 1  ;;  %v4784_v27 = vadd.f32 %v7801_v1, %v10270_v11  ;;  %v4450_v51 = vadd.f32 %v7736_v48, %v10271_v46  ;;  %v10274_v48 = vld [vmem:[#allocation20_spill] sm:$0xff] }
 0x344   : > { %10267 = vst [vmem:[#allocation6_spill] sm:$0xff] %v9778_v15  ;;  %v4689_v37 = vpop.f32.mrf.mxu0  ;;  %v4370_v60 = vpop.f32.mrf.mxu1 }
 0x345   : > { %v5238_v21 = vsel %vm5183_vm8, %v5235_v25, %v5237_v52  ;;  %v5242_v38 = vrot.slane %v4784_v27, 1  ;;  %v4782_v58 = vadd.f32 %v4689_v37, %v3338_v19  ;;  %v10275_v25 = vld [vmem:[#allocation54_spill] sm:$0xff]  ;;  %v10276_v52 = vld [vmem:[#allocation51_spill] sm:$0xff]  ;;  %v10278_v27 = vld [vmem:[#allocation52_spill] sm:$0xff] }
 0x346   : > { %v9785_v35 = vadd.f32 %v5238_v21, %v4448_v36  ;;  %v7804_v61 = vpop.f32.mrf.mxu0  ;;  %v7737_v8 = vpop.f32.mrf.mxu1  ;;  %v3354_v11 = vadd.f32 %v10276_v52, %v10275_v25  ;;  %v10277_v19 = vld [vmem:[#allocation50_spill] sm:$0xff] }
 0x347   : > { %v5243_v17 = vsel %vm5183_vm8, %v5240_v13, %v5242_v38  ;;  %v5239_v16 = vrot.slane %v4782_v58, 1  ;;  %v4787_v36 = vadd.f32 %v7804_v61, %v10277_v19  ;;  %v10282_v25 = vld [vmem:[#allocation22_spill] sm:$0xff]  ;;  %v10283_v19 = vld [vmem:[#allocation55_spill] sm:$0xff] }
 0x348   : > { %10272 = vst [vmem:[#allocation29_spill] sm:$0xff] %v9785_v35  ;;  %v9788_v45 = vadd.f32 %v5243_v17, %v4450_v51  ;;  %v4702_v28 = vpop.f32.mrf.mxu0  ;;  %v4372_v1 = vpop.f32.mrf.mxu1  ;;  %v10280_v17 = vld [vmem:[#allocation21_spill] sm:$0xff] }
 0x349   : > { %v5241_v46 = vsel %vm5183_vm8, %v5239_v16, %v5240_v13  ;;  %v4449_v5 = vadd.f32 %v4372_v1, %v10274_v48  ;;  %v4785_v37 = vadd.f32 %v4702_v28, %v10278_v27  ;;  %v5247_v13 = vrot.slane %v4787_v36, 1  ;;  %v10281_v1 = vld [vmem:[#allocation53_spill] sm:$0xff]  ;;  %v10285_v36 = vld [vmem:[#allocation23_spill] sm:$0xff] }
 0x34a   : > { %10273 = vst [vmem:[#allocation30_spill] sm:$0xff] %v9788_v45  ;;  %v7805_v47 = vpop.f32.mrf.mxu0  ;;  %v7740_v21 = vpop.f32.mrf.mxu1 }
 0x34b   : > { %v9796_v38 = vadd.f32 %v5241_v46, %v4449_v5  ;;  %v5244_v16 = vrot.slane %v4785_v37, 1  ;;  %v4788_v48 = vadd.f32 %v7805_v47, %v10281_v1  ;;  %v10286_v47 = vld [vmem:[#allocation59_spill] sm:$0xff] }
 0x34c   : > { %v4705_v60 = vpop.f32.mrf.mxu0  ;;  %v4384_v51 = vpop.f32.mrf.mxu1 }
 0x34d   : > { %10279 = vst [vmem:[#allocation7_spill] sm:$0xff] %v9796_v38  ;;  %v4786_v58 = vadd.f32 %v4705_v60, %v3354_v11  ;;  %v4451_v8 = vadd.f32 %v4384_v51, %v10280_v17  ;;  %v10284_v11 = vld [vmem:[#allocation57_spill] sm:$0xff]  ;;  %v5249_v1 = vrot.slane %v4788_v48, 1  ;;  %v10288_v38 = vld [vmem:[#allocation58_spill] sm:$0xff] }
 0x34e   : > { %v7808_v45 = vpop.f32.mrf.mxu0  ;;  %v7741_v15 = vpop.f32.mrf.mxu1 }
 0x34f   : > { %v5245_v35 = vrot.slane %v4786_v58, 1  ;;  %v4453_v52 = vadd.f32 %v7741_v15, %v10282_v25  ;;  %v4791_v46 = vadd.f32 %v7808_v45, %v10283_v19  ;;  %v10287_v58 = vld [vmem:[#allocation56_spill] sm:$0xff] }
 0x350   : > { %v4718_v61 = vpop.f32.mrf.mxu0  ;;  %v4387_v5 = vpop.f32.mrf.mxu1  ;;  %v3370_v17 = vadd.f32 %v10287_v58, %v10286_v47  ;;  %v10289_v45 = vld [vmem:[#allocation24_spill] sm:$0xff] }
 0x351   : > { %v5246_v28 = vsel %vm5183_vm8, %v5244_v16, %v5245_v35  ;;  %v5248_v27 = vsel %vm5183_vm8, %v5245_v35, %v5247_v13  ;;  %v4789_v21 = vadd.f32 %v4718_v61, %v10284_v11  ;;  %v4452_v37 = vadd.f32 %v4387_v5, %v10285_v36  ;;  %v10291_v36 = vld [vmem:[#allocation25_spill] sm:$0xff] }
 0x352   : > { %v9805_v60 = vadd.f32 %v5246_v28, %v4451_v8  ;;  %v7809_v51 = vpop.f32.mrf.mxu0  ;;  %v7744_v25 = vpop.f32.mrf.mxu1  ;;  %v5254_v13 = vrot.slane %v4791_v46, 1 }
 0x353   : > { %v5250_v15 = vrot.slane %v4789_v21, 1  ;;  %v4792_v16 = vadd.f32 %v7809_v51, %v10288_v38  ;;  %v9811_v53 = vadd.f32 %v5248_v27, %v4452_v37  ;;  %v4455_v19 = vadd.f32 %v7744_v25, %v10289_v45  ;;  %v10293_v37 = vld [vmem:[#allocation26_spill] sm:$0xff] }
 0x354   : > { %v4721_v35 = vpop.f32.mrf.mxu0  ;;  %v4399_v28 = vpop.f32.mrf.mxu1 }
 0x355   : > { %v5251_v8 = vsel %vm5183_vm8, %v5249_v1, %v5250_v15  ;;  %v5255_v61 = vrot.slane %v4792_v16, 1  ;;  %v4790_v5 = vadd.f32 %v4721_v35, %v3370_v17  ;;  %v4454_v47 = vadd.f32 %v4399_v28, %v10291_v36  ;;  %v10294_v17 = vld [vmem:[#allocation61_spill] sm:$0xff]  ;;  %v10296_v28 = vld [vmem:[#allocation60_spill] sm:$0xff] }
 0x356   : > { %v9815_v11 = vadd.f32 %v5251_v8, %v4453_v52  ;;  %v7812_v48 = vpop.f32.mrf.mxu0  ;;  %v7745_v38 = vpop.f32.mrf.mxu1  ;;  %v10295_v8 = vld [vmem:[#allocation63_spill] sm:$0xff] }
 0x357   : > { %v5256_v21 = vsel %vm5183_vm8, %v5254_v13, %v5255_v61  ;;  %v5252_v58 = vrot.slane %v4790_v5, 1  ;;  %v4456_v51 = vadd.f32 %v7745_v38, %v10293_v37  ;;  %v4795_v1 = vadd.f32 %v7812_v48, %v9499_v54 }
 0x358   : > { %10290 = vst [vmem:[#allocation31_spill] sm:$0xff] %v9815_v11  ;;  %v9819_v27 = vadd.f32 %v5256_v21, %v4455_v19  ;;  %v4734_v25 = vpop.f32.mrf.mxu0  ;;  %v4402_v16 = vpop.f32.mrf.mxu1  ;;  %v3386_v13 = vadd.f32 %v10296_v28, %v10295_v8  ;;  %v10297_v19 = vld [vmem:[#allocation62_spill] sm:$0xff]  ;;  %v10299_v8 = vld [vmem:[#allocation28_spill] sm:$0xff] }
 0x359   : > { %v5253_v46 = vsel %vm5183_vm8, %v5250_v15, %v5252_v58  ;;  %v4793_v52 = vadd.f32 %v4734_v25, %v10294_v17  ;;  %v5260_v11 = vrot.slane %v4795_v1, 1 }
 0x35a   : > { %10292 = vst [vmem:[#allocation8_spill] sm:$0xff] %v9819_v27  ;;  %v9825_v45 = vadd.f32 %v5253_v46, %v4454_v47  ;;  %v7813_v35 = vpop.f32.mrf.mxu0  ;;  %v7748_v36 = vpop.f32.mrf.mxu1  ;;  %v10298_v27 = vld [vmem:[#allocation27_spill] sm:$0xff] }
 0x35b   : > { %v5257_v5 = vrot.slane %v4793_v52, 1  ;;  %v4796_v21 = vadd.f32 %v7813_v35, %v10297_v19  ;;  %v4458_v38 = vadd.f32 %v7748_v36, %v10298_v27  ;;  %v10301_v19 = vld [vmem:[#allocation65_spill] sm:$0xff] }
 0x35c   : > { %v4737_v37 = vpop.f32.mrf.mxu0  ;;  %v4414_v48 = vpop.f32.mrf.mxu1 }
 0x35d   : > { %v5258_v15 = vsel %vm5183_vm8, %v5255_v61, %v5257_v5  ;;  %v5262_v54 = vrot.slane %v4796_v21, 1  ;;  %v4794_v58 = vadd.f32 %v4737_v37, %v3386_v13  ;;  %v10300_v13 = vld [vmem:[#allocation64_spill] sm:$0xff]  ;;  %v10302_v48 = vld [vmem:[#allocation66_spill] sm:$0xff] }
 0x35e   : > { %v9832_v25 = vadd.f32 %v5258_v15, %v4456_v51  ;;  %v7749_v16 = vpop.f32.mrf.mxu1  ;;  %v3773_v51 = vadd.f32 %v9514_v55, %v9520_v20  ;;  %v10303_v55 = vld [vmem:[#allocation68_spill] sm:$0xff] }
 0x35f   : > { %v5263_v47 = vsel %vm5183_vm8, %v5260_v11, %v5262_v54  ;;  %v5259_v46 = vrot.slane %v4794_v58, 1 }
 0x360   : > { %v9835_v17 = vadd.f32 %v5263_v47, %v4458_v38  ;;  %v4416_v52 = vpop.f32.mrf.mxu1 }
 0x361   : > { %v5261_v35 = vsel %vm5183_vm8, %v5259_v46, %v5260_v11  ;;  %v4457_v27 = vadd.f32 %v4416_v52, %v10299_v8  ;;  %v9853_v8 = vld [vmem:[%s10130_s6] ss:$0 sm:$0xff] }
 0x362   : > { %v7832_v28 = vpop.f32.mrf.mxu1 }
 0x363   : > { %v9839_v1 = vadd.f32 %v5261_v35, %v4457_v27  ;;  %v5089_v36 = vadd.f32 %v7832_v28, %v10300_v13 }
 0x364   : > { %v4896_v61 = vpop.f32.mrf.mxu1 }
 0x365   : > { %v5087_v21 = vadd.f32 %v4896_v61, %v10301_v19  ;;  %v5380_v54 = vrot.slane %v5089_v36, 2 }
 0x366   : > { %v7833_v5 = vpop.f32.mrf.mxu1 }
 0x367   : > { %v5377_v11 = vrot.slane %v5087_v21, 2  ;;  %v5090_v58 = vadd.f32 %v7833_v5, %v10302_v48  ;;  %v10304_v5 = vld [vmem:[#allocation70_spill] sm:$0xff]  ;;  %v10306_v21 = vld [vmem:[#allocation69_spill] sm:$0xff] }
 0x368   : > { %v4899_v37 = vpop.f32.mrf.mxu1 }
 0x369   : > { %v5088_v38 = vadd.f32 %v4899_v37, %v3773_v51  ;;  %v10305_v51 = vld [vmem:[#allocation67_spill] sm:$0xff]  ;;  %v5382_v36 = vrot.slane %v5090_v58, 2 }
 0x36a   : > { %v7836_v15 = vpop.f32.mrf.mxu1  ;;  %v3789_v13 = vadd.f32 %v10305_v51, %v10304_v5 }
 0x36b   : > { %v5378_v47 = vrot.slane %v5088_v38, 2  ;;  %v5093_v20 = vadd.f32 %v7836_v15, %v9523_v7 }
 0x36c   : > { %v4912_v46 = vpop.f32.mrf.mxu1 }
 0x36d   : > { %v5379_v16 = vsel %vm5376_vm9, %v5377_v11, %v5378_v47  ;;  %v5381_v52 = vsel %vm5376_vm9, %v5378_v47, %v5380_v54  ;;  %v5091_v35 = vadd.f32 %v4912_v46, %v10303_v55  ;;  %v5387_v54 = vrot.slane %v5093_v20, 2 }
 0x36e   : > { %v5489_v27 = vadd.f32 %v5379_v16, %v9671_v63  ;;  %v5490_v28 = vadd.f32 %v5381_v52, %v9675_v31  ;;  %v7837_v61 = vpop.f32.mrf.mxu1 }
 0x36f   : > { %v5383_v19 = vrot.slane %v5091_v35, 2  ;;  %v5094_v37 = vadd.f32 %v7837_v61, %v10306_v21 }
 0x370   : > { %v4915_v7 = vpop.f32.mrf.mxu1  ;;  %v5528_v38 = vadd.f32 %v9853_v8, %v5489_v27  ;;  %v5529_v15 = vadd.f32 %v9853_v8, %v5490_v28 }
 0x371   : > { %v5384_v11 = vsel %vm5376_vm9, %v5382_v36, %v5383_v19  ;;  %v5388_v48 = vrot.slane %v5094_v37, 2  ;;  %v5092_v63 = vadd.f32 %v4915_v7, %v3789_v13  ;;  %v10307_v36 = vld [vmem:[#allocation71_spill] sm:$0xff] }
 0x372   : > { %v5491_v31 = vadd.f32 %v5384_v11, %v9680_v49  ;;  %v7840_v47 = vpop.f32.mrf.mxu1  ;;  %v5560_v46 = vmax.f32 %v5528_v38, 0.0  ;;  %v5561_v16 = vmax.f32 %v5529_v15, 0.0  ;;  %v10308_v15 = vld [vmem:[#allocation72_spill] sm:$0xff] }
 0x373   : > { %v5389_v58 = vsel %vm5376_vm9, %v5387_v54, %v5388_v48  ;;  %v5385_v52 = vrot.slane %v5092_v63, 2  ;;  %v5097_v20 = vadd.f32 %v7840_v47, %v9535_v4 }
 0x374   : > { %v5493_v55 = vadd.f32 %v5389_v58, %v9684_v0  ;;  %v4928_v35 = vpop.f32.mrf.mxu1  ;;  %v5592_v61 = vpack.c.bf16 %v5561_v16, %v5560_v46  ;;  %v5530_v5 = vadd.f32 %v9853_v8, %v5491_v31 }
 0x375   : > { %v5386_v27 = vsel %vm5376_vm9, %v5383_v19, %v5385_v52  ;;  %v5095_v28 = vadd.f32 %v4928_v35, %v9538_v30  ;;  %v5393_v7 = vrot.slane %v5097_v20, 2 }
 0x376   : > { %v5492_v49 = vadd.f32 %v5386_v27, %v9690_v2  ;;  %v7841_v51 = vpop.f32.mrf.mxu1  ;;  %7894 = vmatprep.mubr.bf16.mxu0 %v5592_v61  ;;  %v5562_v54 = vmax.f32 %v5530_v5, 0.0  ;;  %v5532_v2 = vadd.f32 %v9853_v8, %v5493_v55 }
 0x377   : > { %v5390_v13 = vrot.slane %v5095_v28, 2  ;;  %v5098_v21 = vadd.f32 %v7841_v51, %v10307_v36 }
 0x378   : > { %v5531_v37 = vadd.f32 %v9853_v8, %v5492_v49  ;;  %v4931_v0 = vpop.f32.mrf.mxu1 }
 0x379   : > { %v5391_v38 = vsel %vm5376_vm9, %v5388_v48, %v5390_v13  ;;  %v5395_v19 = vrot.slane %v5098_v21, 2  ;;  %v5096_v4 = vadd.f32 %v4931_v0, %v10308_v15  ;;  %v10309_v0 = vld [vmem:[#allocation73_spill] sm:$0xff] }
 0x37a   : > { %v5563_v30 = vmax.f32 %v5531_v37, 0.0  ;;  %v5494_v11 = vadd.f32 %v5391_v38, %v9696_v3  ;;  %v7844_v63 = vpop.f32.mrf.mxu1  ;;  %v5564_v3 = vmax.f32 %v5532_v2, 0.0 }
 0x37b   : > { %v5396_v31 = vsel %vm5376_vm9, %v5393_v7, %v5395_v19  ;;  %v5392_v47 = vrot.slane %v5096_v4, 2  ;;  %v5101_v55 = vadd.f32 %v7844_v63, %v9545_v34 }
 0x37c   : > { %v5593_v46 = vpack.c.bf16 %v5563_v30, %v5562_v54  ;;  %v5496_v16 = vadd.f32 %v5396_v31, %v9699_v44  ;;  %v4944_v58 = vpop.f32.mrf.mxu1  ;;  %v5533_v52 = vadd.f32 %v9853_v8, %v5494_v11  ;;  %v10310_v54 = vld [vmem:[#allocation74_spill] sm:$0xff] }
 0x37d   : > { %v5394_v48 = vsel %vm5376_vm9, %v5392_v47, %v5393_v7  ;;  %v5099_v28 = vadd.f32 %v4944_v58, %v9548_v29  ;;  %v5400_v37 = vrot.slane %v5101_v55, 2  ;;  %v10311_v47 = vld [vmem:[#allocation75_spill] sm:$0xff] }
 0x37e   : > { %v5535_v35 = vadd.f32 %v9853_v8, %v5496_v16  ;;  %v5495_v61 = vadd.f32 %v5394_v48, %v9705_v62  ;;  %v7845_v27 = vpop.f32.mrf.mxu1  ;;  %7895 = vmatmul.mubr.bf16.vlgmr.msra.gmra.mxu0 %v5593_v46  ;;  %v5565_v20 = vmax.f32 %v5533_v52, 0.0 }
 0x37f   : > { %v5397_v62 = vrot.slane %v5099_v28, 2  ;;  %v5102_v7 = vadd.f32 %v7845_v27, %v10309_v0 }
 0x380   : > { %v5534_v5 = vadd.f32 %v9853_v8, %v5495_v61  ;;  %v4947_v44 = vpop.f32.mrf.mxu1  ;;  %v5594_v49 = vpack.c.bf16 %v5565_v20, %v5564_v3  ;;  %v5567_v13 = vmax.f32 %v5535_v35, 0.0  ;;  %v10312_v61 = vld [vmem:[#allocation76_spill] sm:$0xff] }
 0x381   : > { %v5100_v51 = vadd.f32 %v4947_v44, %v9552_v24  ;;  %v5402_v2 = vrot.slane %v5102_v7, 2 }
 0x382   : > { %v5566_v36 = vmax.f32 %v5534_v5, 0.0  ;;  %v7848_v21 = vpop.f32.mrf.mxu1  ;;  %7898 = vmatprep.mubr.bf16.mxu0 %v5594_v49 }
 0x383   : > { %v5398_v38 = vrot.slane %v5100_v51, 2  ;;  %v5105_v4 = vadd.f32 %v7848_v21, %v9555_v12 }
 0x384   : > { %v4960_v19 = vpop.f32.mrf.mxu1  ;;  %v5595_v15 = vpack.c.bf16 %v5567_v13, %v5566_v36 }
 0x385   : > { %v5399_v34 = vsel %vm5376_vm9, %v5397_v62, %v5398_v38  ;;  %v5401_v29 = vsel %vm5376_vm9, %v5398_v38, %v5400_v37  ;;  %v5103_v30 = vadd.f32 %v4960_v19, %v10310_v54  ;;  %v5407_v48 = vrot.slane %v5105_v4, 2 }
 0x386   : > { %v5497_v24 = vadd.f32 %v5399_v34, %v9715_v56  ;;  %v5498_v11 = vadd.f32 %v5401_v29, %v9719_v50  ;;  %v7849_v63 = vpop.f32.mrf.mxu1  ;;  %7899 = vmatmul.mubr.bf16.gmra.mxu0 %v5595_v15 }
 0x387   : > { %v5403_v31 = vrot.slane %v5103_v30, 2  ;;  %v5106_v46 = vadd.f32 %v7849_v63, %v10311_v47 }
 0x388   : > { %v4963_v16 = vpop.f32.mrf.mxu1  ;;  %v5536_v58 = vadd.f32 %v9853_v8, %v5497_v24  ;;  %v5537_v52 = vadd.f32 %v9853_v8, %v5498_v11 }
 0x389   : > { %v5404_v12 = vsel %vm5376_vm9, %v5402_v2, %v5403_v31  ;;  %v5408_v35 = vrot.slane %v5106_v46, 2  ;;  %v5104_v27 = vadd.f32 %v4963_v16, %v10312_v61  ;;  %v10313_v16 = vld [vmem:[#allocation77_spill] sm:$0xff] }
 0x38a   : > { %v5499_v56 = vadd.f32 %v5404_v12, %v9724_v33  ;;  %v7852_v50 = vpop.f32.mrf.mxu1  ;;  %v5568_v3 = vmax.f32 %v5536_v58, 0.0  ;;  %v5569_v20 = vmax.f32 %v5537_v52, 0.0  ;;  %v10314_v52 = vld [vmem:[#allocation78_spill] sm:$0xff] }
 0x38b   : > { %v5409_v55 = vsel %vm5376_vm9, %v5407_v48, %v5408_v35  ;;  %v5405_v28 = vrot.slane %v5104_v27, 2  ;;  %v5109_v13 = vadd.f32 %v7852_v50, %v9568_v59 }
 0x38c   : > { %v5501_v5 = vadd.f32 %v5409_v55, %v9728_v10  ;;  %v4976_v44 = vpop.f32.mrf.mxu1  ;;  %v5596_v49 = vpack.c.bf16 %v5569_v20, %v5568_v3  ;;  %v5538_v21 = vadd.f32 %v9853_v8, %v5499_v56  ;;  %v10315_v20 = vld [vmem:[#allocation79_spill] sm:$0xff] }
 0x38d   : > { %v5406_v51 = vsel %vm5376_vm9, %v5403_v31, %v5405_v28  ;;  %v5107_v36 = vadd.f32 %v4976_v44, %v9571_v22  ;;  %v5413_v38 = vrot.slane %v5109_v13, 2 }
 0x38e   : > { %v5500_v33 = vadd.f32 %v5406_v51, %v9734_v43  ;;  %v7853_v37 = vpop.f32.mrf.mxu1  ;;  %7902 = vmatprep.mubr.bf16.mxu0 %v5596_v49  ;;  %v5570_v34 = vmax.f32 %v5538_v21, 0.0  ;;  %v5540_v43 = vadd.f32 %v9853_v8, %v5501_v5 }
 0x38f   : > { %v5410_v62 = vrot.slane %v5107_v36, 2  ;;  %v5110_v0 = vadd.f32 %v7853_v37, %v9573_v40 }
 0x390   : > { %v5539_v7 = vadd.f32 %v9853_v8, %v5500_v33  ;;  %v4979_v10 = vpop.f32.mrf.mxu1 }
 0x391   : > { %v5411_v19 = vsel %vm5376_vm9, %v5408_v35, %v5410_v62  ;;  %v5415_v15 = vrot.slane %v5110_v0, 2  ;;  %v5108_v59 = vadd.f32 %v4979_v10, %v9575_v39  ;;  %v10316_v0 = vld [vmem:[#allocation80_spill] sm:$0xff] }
 0x392   : > { %v5571_v22 = vmax.f32 %v5539_v7, 0.0  ;;  %v5502_v29 = vadd.f32 %v5411_v19, %v9740_v14  ;;  %v7856_v4 = vpop.f32.mrf.mxu1  ;;  %v5572_v14 = vmax.f32 %v5540_v43, 0.0 }
 0x393   : > { %v5416_v54 = vsel %vm5376_vm9, %v5413_v38, %v5415_v15  ;;  %v5412_v30 = vrot.slane %v5108_v59, 2  ;;  %v5113_v58 = vadd.f32 %v7856_v4, %v10313_v16  ;;  %v10322_v16 = vld [vmem:[#allocation83_spill] sm:$0xff] }
 0x394   : > { %v5504_v40 = vadd.f32 %v5416_v54, %v9743_v9  ;;  %v4992_v24 = vpop.f32.mrf.mxu1  ;;  %v5597_v11 = vpack.c.bf16 %v5571_v22, %v5570_v34  ;;  %v5541_v63 = vadd.f32 %v9853_v8, %v5502_v29 }
 0x395   : > { %v5414_v2 = vsel %vm5376_vm9, %v5412_v30, %v5413_v38  ;;  %v5111_v48 = vadd.f32 %v4992_v24, %v10314_v52  ;;  %v5420_v3 = vrot.slane %v5113_v58, 2 }
 0x396   : > { %v5543_v39 = vadd.f32 %v9853_v8, %v5504_v40  ;;  %v5503_v31 = vadd.f32 %v5414_v2, %v9749_v57  ;;  %v7857_v47 = vpop.f32.mrf.mxu1  ;;  %7903 = vmatmul.mubr.bf16.gmra.mxu0 %v5597_v11  ;;  %v5573_v46 = vmax.f32 %v5541_v63, 0.0  ;;  %v10318_v11 = vld [vmem:[#allocation82_spill] sm:$0xff]  ;;  %v10319_v2 = vld [vmem:[#allocation84_spill] sm:$0xff] }
 0x397   : > { %v5417_v57 = vrot.slane %v5111_v48, 2  ;;  %v5114_v55 = vadd.f32 %v7857_v47, %v10315_v20  ;;  %v10320_v47 = vld [vmem:[#allocation6_spill] sm:$0xff]  ;;  %v10323_v48 = vld [vmem:[#allocation85_spill] sm:$0xff] }
 0x398   : > { %v5542_v9 = vadd.f32 %v9853_v8, %v5503_v31  ;;  %v4995_v12 = vpop.f32.mrf.mxu1  ;;  %v5598_v35 = vpack.c.bf16 %v5573_v46, %v5572_v14  ;;  %v5575_v27 = vmax.f32 %v5543_v39, 0.0  ;;  %v10321_v46 = vld [vmem:[#allocation86_spill] sm:$0xff] }
 0x399   : > { %v5112_v61 = vadd.f32 %v4995_v12, %v9588_v26  ;;  %v5422_v37 = vrot.slane %v5114_v55, 2  ;;  %v3901_v58 = vadd.f32 %v10322_v16, %v10321_v46  ;;  %v10333_v46 = vld [vmem:[#allocation93_spill] sm:$0xff] }
 0x39a   : > { %v5574_v56 = vmax.f32 %v5542_v9, 0.0  ;;  %v7860_v50 = vpop.f32.mrf.mxu1  ;;  %7906 = vmatprep.mubr.bf16.mxu0 %v5598_v35 }
 0x39b   : > { %v5418_v28 = vrot.slane %v5112_v61, 2  ;;  %v5117_v13 = vadd.f32 %v7860_v50, %v9591_v6 }
 0x39c   : > { %v5008_v5 = vpop.f32.mrf.mxu1  ;;  %v5599_v44 = vpack.c.bf16 %v5575_v27, %v5574_v56 }
 0x39d   : > { %v5419_v49 = vsel %vm5376_vm9, %v5417_v57, %v5418_v28  ;;  %v5421_v51 = vsel %vm5376_vm9, %v5418_v28, %v5420_v3  ;;  %v5115_v36 = vadd.f32 %v5008_v5, %v9594_v41  ;;  %v5427_v15 = vrot.slane %v5117_v13, 2  ;;  %v10317_v41 = vld [vmem:[#allocation81_spill] sm:$0xff] }
 0x39e   : > { %v5505_v26 = vadd.f32 %v5419_v49, %v9759_v32  ;;  %v5506_v21 = vadd.f32 %v5421_v51, %v9763_v23  ;;  %v7861_v33 = vpop.f32.mrf.mxu1  ;;  %7907 = vmatmul.mubr.bf16.gmra.mxu0 %v5599_v44  ;;  %v10324_v57 = vld [vmem:[#allocation29_spill] sm:$0xff]  ;;  %v10325_v49 = vld [vmem:[#allocation30_spill] sm:$0xff] }
 0x39f   : > { %v5423_v62 = vrot.slane %v5115_v36, 2  ;;  %v5118_v7 = vadd.f32 %v7861_v33, %v10316_v0 }
 0x3a0   : > { %v5011_v10 = vpop.f32.mrf.mxu1  ;;  %v5544_v38 = vadd.f32 %v9853_v8, %v5505_v26  ;;  %v5545_v19 = vadd.f32 %v9853_v8, %v5506_v21 }
 0x3a1   : > { %v5424_v6 = vsel %vm5376_vm9, %v5422_v37, %v5423_v62  ;;  %v5428_v59 = vrot.slane %v5118_v7, 2  ;;  %v5116_v34 = vadd.f32 %v5011_v10, %v10317_v41  ;;  %v10326_v37 = vld [vmem:[#allocation7_spill] sm:$0xff]  ;;  %v10330_v41 = vld [vmem:[#allocation89_spill] sm:$0xff] }
 0x3a2   : > { %v5507_v32 = vadd.f32 %v5424_v6, %v9768_v18  ;;  %v7864_v23 = vpop.f32.mrf.mxu1  ;;  %v5576_v22 = vmax.f32 %v5544_v38, 0.0  ;;  %v5577_v29 = vmax.f32 %v5545_v19, 0.0  ;;  %v10327_v38 = vld [vmem:[#allocation91_spill] sm:$0xff]  ;;  %v10328_v19 = vld [vmem:[#allocation88_spill] sm:$0xff] }
 0x3a3   : > { %v5429_v4 = vsel %vm5376_vm9, %v5427_v15, %v5428_v59  ;;  %v5425_v43 = vrot.slane %v5116_v34, 2  ;;  %v5121_v63 = vadd.f32 %v7864_v23, %v10318_v11  ;;  %v3917_v15 = vadd.f32 %v10328_v19, %v10327_v38  ;;  %v10329_v6 = vld [vmem:[#allocation87_spill] sm:$0xff] }
 0x3a4   : > { %v5509_v54 = vadd.f32 %v5429_v4, %v9772_v42  ;;  %v5024_v30 = vpop.f32.mrf.mxu1  ;;  %v5600_v40 = vpack.c.bf16 %v5577_v29, %v5576_v22  ;;  %v5546_v31 = vadd.f32 %v9853_v8, %v5507_v32 }
 0x3a5   : > { %v5426_v24 = vsel %vm5376_vm9, %v5423_v62, %v5425_v43  ;;  %v5119_v39 = vadd.f32 %v5024_v30, %v10319_v2  ;;  %v5433_v35 = vrot.slane %v5121_v63, 2 }
 0x3a6   : > { %v5508_v18 = vadd.f32 %v5426_v24, %v10320_v47  ;;  %v7865_v14 = vpop.f32.mrf.mxu1  ;;  %7910 = vmatprep.mubr.bf16.mxu0 %v5600_v40  ;;  %v5578_v50 = vmax.f32 %v5546_v31, 0.0  ;;  %v5548_v28 = vadd.f32 %v9853_v8, %v5509_v54  ;;  %v10331_v24 = vld [vmem:[#allocation90_spill] sm:$0xff] }
 0x3a7   : > { %v5430_v52 = vrot.slane %v5119_v39, 2  ;;  %v5122_v42 = vadd.f32 %v7865_v14, %v10323_v48 }
 0x3a8   : > { %v5547_v9 = vadd.f32 %v9853_v8, %v5508_v18  ;;  %v5027_v12 = vpop.f32.mrf.mxu1  ;;  %v5580_v7 = vmax.f32 %v5548_v28, 0.0  ;;  %v10332_v18 = vld [vmem:[#allocation92_spill] sm:$0xff] }
 0x3a9   : > { %v5431_v61 = vsel %vm5376_vm9, %v5428_v59, %v5430_v52  ;;  %v5435_v27 = vrot.slane %v5122_v42, 2  ;;  %v5120_v56 = vadd.f32 %v5027_v12, %v3901_v58  ;;  %v10334_v12 = vld [vmem:[#allocation94_spill] sm:$0xff] }
 0x3aa   : > { %v5579_v3 = vmax.f32 %v5547_v9, 0.0  ;;  %v5510_v20 = vadd.f32 %v5431_v61, %v10324_v57  ;;  %v7868_v55 = vpop.f32.mrf.mxu1 }
 0x3ab   : > { %v5436_v5 = vsel %vm5376_vm9, %v5433_v35, %v5435_v27  ;;  %v5432_v44 = vrot.slane %v5120_v56, 2  ;;  %v5125_v59 = vadd.f32 %v7868_v55, %v10329_v6  ;;  %v10340_v6 = vld [vmem:[#allocation98_spill] sm:$0xff] }
 0x3ac   : > { %v5512_v51 = vadd.f32 %v5436_v5, %v10325_v49  ;;  %v5040_v13 = vpop.f32.mrf.mxu1  ;;  %v5601_v36 = vpack.c.bf16 %v5579_v3, %v5578_v50  ;;  %v5549_v26 = vadd.f32 %v9853_v8, %v5510_v20  ;;  %v10335_v20 = vld [vmem:[#allocation95_spill] sm:$0xff] }
 0x3ad   : > { %v5434_v21 = vsel %vm5376_vm9, %v5432_v44, %v5433_v35  ;;  %v5123_v34 = vadd.f32 %v5040_v13, %v10330_v41  ;;  %v5440_v30 = vrot.slane %v5125_v59, 2  ;;  %v10337_v13 = vld [vmem:[#allocation8_spill] sm:$0xff] }
 0x3ae   : > { %v5551_v33 = vadd.f32 %v9853_v8, %v5512_v51  ;;  %v5511_v62 = vadd.f32 %v5434_v21, %v10326_v37  ;;  %v7869_v0 = vpop.f32.mrf.mxu1  ;;  %7911 = vmatmul.mubr.bf16.gmra.mxu0 %v5601_v36  ;;  %v5581_v10 = vmax.f32 %v5549_v26, 0.0  ;;  %v10338_v37 = vld [vmem:[#allocation96_spill] sm:$0xff] }
 0x3af   : > { %v5437_v40 = vrot.slane %v5123_v34, 2  ;;  %v5126_v11 = vadd.f32 %v7869_v0, %v10331_v24  ;;  %v10339_v0 = vld [vmem:[#allocation97_spill] sm:$0xff] }
 0x3b0   : > { %v5550_v32 = vadd.f32 %v9853_v8, %v5511_v62  ;;  %v5043_v23 = vpop.f32.mrf.mxu1  ;;  %v5602_v22 = vpack.c.bf16 %v5581_v10, %v5580_v7  ;;  %v5583_v4 = vmax.f32 %v5551_v33, 0.0 }
 0x3b1   : > { %v5124_v29 = vadd.f32 %v5043_v23, %v3917_v15  ;;  %v5442_v42 = vrot.slane %v5126_v11, 2 }
 0x3b2   : > { %v5582_v43 = vmax.f32 %v5550_v32, 0.0  ;;  %v7872_v54 = vpop.f32.mrf.mxu1  ;;  %7914 = vmatprep.mubr.bf16.mxu0 %v5602_v22 }
 0x3b3   : > { %v5438_v63 = vrot.slane %v5124_v29, 2  ;;  %v5129_v14 = vadd.f32 %v7872_v54, %v10332_v18  ;;  %v10341_v29 = vld [vmem:[#allocation99_spill] sm:$0xff] }
 0x3b4   : > { %v5056_v2 = vpop.f32.mrf.mxu1  ;;  %v5603_v39 = vpack.c.bf16 %v5583_v4, %v5582_v43 }
 0x3b5   : > { %v5439_v31 = vsel %vm5376_vm9, %v5437_v40, %v5438_v63  ;;  %v5441_v47 = vsel %vm5376_vm9, %v5438_v63, %v5440_v30  ;;  %v5127_v16 = vadd.f32 %v5056_v2, %v10333_v46  ;;  %v5447_v50 = vrot.slane %v5129_v14, 2 }
 0x3b6   : > { %v5513_v58 = vadd.f32 %v5439_v31, %v9805_v60  ;;  %v5514_v52 = vadd.f32 %v5441_v47, %v9811_v53  ;;  %v7873_v48 = vpop.f32.mrf.mxu1  ;;  %7915 = vmatmul.mubr.bf16.gmra.mxu0 %v5603_v39  ;;  %v10336_v60 = vld [vmem:[#allocation31_spill] sm:$0xff] }
 0x3b7   : > { %v5443_v9 = vrot.slane %v5127_v16, 2  ;;  %v5130_v35 = vadd.f32 %v7873_v48, %v10334_v12  ;;  %v6888_v48 = vld [vmem:[%s8398_s14 + $0x8] sm:$0xff]  }
 0x3b8   : > { %v5059_v61 = vpop.f32.mrf.mxu1  ;;  %v5552_v27 = vadd.f32 %v9853_v8, %v5513_v58  ;;  %v5553_v56 = vadd.f32 %v9853_v8, %v5514_v52  ;;  %v9997_v52 = vld [vmem:[%s10132_s8] ss:$0 sm:$0xff] }
 0x3b9   : > { %v5444_v3 = vsel %vm5376_vm9, %v5442_v42, %v5443_v9  ;;  %v5448_v57 = vrot.slane %v5130_v35, 2  ;;  %v5128_v55 = vadd.f32 %v5059_v61, %v10335_v20  ;;  %v6745_v42 = vld [vmem:[%s8398_s14] sm:$0xff]   ;;  %v6890_v20 = vld [vmem:[%s8398_s14 + $0x18] sm:$0xff]  }
 0x3ba   : > { %v5515_v28 = vadd.f32 %v5444_v3, %v10336_v60  ;;  %v7876_v53 = vpop.f32.mrf.mxu1  ;;  %v5584_v5 = vmax.f32 %v5552_v27, 0.0  ;;  %v5585_v44 = vmax.f32 %v5553_v56, 0.0  ;;  %v6746_v61 = vunpack.c.l.bf16 %v6745_v42 }
 0x3bb   : > { %v5449_v49 = vsel %vm5376_vm9, %v5447_v50, %v5448_v57  ;;  %v5445_v51 = vrot.slane %v5128_v55, 2  ;;  %v5133_v62 = vadd.f32 %v7876_v53, %v10338_v37  ;;  %v6751_v27 = vunpack.c.h.bf16 %v6888_v48 }
 0x3bc   : > { %v5517_v36 = vadd.f32 %v5449_v49, %v10337_v13  ;;  %v5072_v26 = vpop.f32.mrf.mxu1  ;;  %v5604_v21 = vpack.c.bf16 %v5585_v44, %v5584_v5  ;;  %v5554_v10 = vadd.f32 %v9853_v8, %v5515_v28  ;;  %v6889_v5 = vld [vmem:[%s8398_s14 + $0x10] sm:$0xff]   ;;  %v6758_v49 = vunpack.c.l.bf16 %v6890_v20 }
 0x3bd   : > { %v5446_v33 = vsel %vm5376_vm9, %v5443_v9, %v5445_v51  ;;  %v5131_v7 = vadd.f32 %v5072_v26, %v10339_v0  ;;  %v5453_v32 = vrot.slane %v5133_v62, 2  ;;  %v6759_v37 = vunpack.c.h.bf16 %v6890_v20 }
 0x3be   : > { %v5516_v38 = vadd.f32 %v5446_v33, %v9825_v45  ;;  %v7877_v19 = vpop.f32.mrf.mxu1  ;;  %7918 = vmatprep.mubr.bf16.mxu1 %v5604_v21  ;;  %v5586_v43 = vmax.f32 %v5554_v10, 0.0  ;;  %v5556_v45 = vadd.f32 %v9853_v8, %v5517_v36  ;;  %v6754_v33 = vunpack.c.l.bf16 %v6889_v5 }
 0x3bf   : > { %v5450_v15 = vrot.slane %v5131_v7, 2  ;;  %v5134_v59 = vadd.f32 %v7877_v19, %v10340_v6 }
 0x3c0   : > { %v5555_v41 = vadd.f32 %v9853_v8, %v5516_v38  ;;  %v5075_v34 = vpop.f32.mrf.mxu1 }
 0x3c1   : > { %v5451_v23 = vsel %vm5376_vm9, %v5448_v57, %v5450_v15  ;;  %v5455_v22 = vrot.slane %v5134_v59, 2  ;;  %v5132_v4 = vadd.f32 %v5075_v34, %v10341_v29  ;;  %v6747_v57 = vunpack.c.h.bf16 %v6745_v42 }
 0x3c2   : > { %v5587_v54 = vmax.f32 %v5555_v41, 0.0  ;;  %v5518_v30 = vadd.f32 %v5451_v23, %v9832_v25  ;;  %v5588_v25 = vmax.f32 %v5556_v45, 0.0  ;;  %v6755_v59 = vunpack.c.h.bf16 %v6889_v5 }
 0x3c3   : > { %v5456_v40 = vsel %vm5376_vm9, %v5453_v32, %v5455_v22  ;;  %v5452_v24 = vrot.slane %v5132_v4, 2 }
 0x3c4   : > { %v5605_v11 = vpack.c.bf16 %v5587_v54, %v5586_v43  ;;  %v5520_v63 = vadd.f32 %v5456_v40, %v9835_v17  ;;  %v5557_v2 = vadd.f32 %v9853_v8, %v5518_v30  ;;  %v6892_v40 = vld [vmem:[%s8398_s14 + $0x28] sm:$0xff]  }
 0x3c5   : > { %v5454_v39 = vsel %vm5376_vm9, %v5452_v24, %v5453_v32 }
 0x3c6   : > { %v5559_v31 = vadd.f32 %v9853_v8, %v5520_v63  ;;  %v5519_v47 = vadd.f32 %v5454_v39, %v9839_v1  ;;  %7919 = vmatmul.mubr.bf16.vlgmr.msra.gmra.mxu1 %v5605_v11  ;;  %v5589_v18 = vmax.f32 %v5557_v2, 0.0  ;;  %v6891_v11 = vld [vmem:[%s8398_s14 + $0x20] sm:$0xff]   ;;  %v6766_v2 = vunpack.c.l.bf16 %v6892_v40 }
 0x3c8   : > { %v5558_v14 = vadd.f32 %v9853_v8, %v5519_v47  ;;  %v5606_v46 = vpack.c.bf16 %v5589_v18, %v5588_v25  ;;  %v5591_v16 = vmax.f32 %v5559_v31, 0.0  ;;  %v6750_v8 = vunpack.c.l.bf16 %v6888_v48 }
 0x3c9   : > { %v6762_v47 = vunpack.c.l.bf16 %v6891_v11  ;;  %v6767_v25 = vunpack.c.h.bf16 %v6892_v40 }
 0x3ca   : > { %v5590_v58 = vmax.f32 %v5558_v14, 0.0  ;;  %7922 = vmatprep.mubr.bf16.mxu1 %v5606_v46 }
 0x3cc   : > { %v5607_v17 = vpack.c.bf16 %v5591_v16, %v5590_v58  ;;  %v6763_v16 = vunpack.c.h.bf16 %v6891_v11  ;;  %v6894_v58 = vld [vmem:[%s8398_s14 + $0x38] sm:$0xff]  }
 0x3ce   : > { %7923 = vmatmul.mubr.bf16.gmra.mxu1 %v5607_v17 }
 0x43e   : > { %v7896_v1 = vpop.f32.mrf.mxu0 }
 0x43f   : > { %v5722_v9 = vadd.f32 %v7896_v1, %v9997_v52 }
 0x440   : > { %v5713_v12 = vpop.f32.mrf.mxu0 }
 0x441   : > { %v5714_v35 = vadd.f32 %v9997_v52, %v5713_v12  ;;  %v5906_v50 = vadd.f32 %v6750_v8, %v5722_v9  ;;  %v6893_v9 = vld [vmem:[%s8398_s14 + $0x30] sm:$0xff]   ;;  %v6774_v12 = vunpack.c.l.bf16 %v6894_v58 }
 0x442   : > { %v7897_v56 = vpop.f32.mrf.mxu0 }
 0x443   : > { %v5725_v3 = vadd.f32 %v7897_v56, %v9997_v52  ;;  %v5904_v60 = vadd.f32 %v6746_v61, %v5714_v35  ;;  %v5938_v51 = vmax.f32 %v5906_v50, 0.0 }
 0x444   : > { %v5716_v55 = vpop.f32.mrf.mxu0 }
 0x445   : > { %v5907_v28 = vadd.f32 %v6751_v27, %v5725_v3  ;;  %v5717_v53 = vadd.f32 %v9997_v52, %v5716_v55  ;;  %v5936_v62 = vmax.f32 %v5904_v60, 0.0  ;;  %v6770_v3 = vunpack.c.l.bf16 %v6893_v9 }
 0x446   : > { %v7900_v44 = vpop.f32.mrf.mxu0 }
 0x447   : > { %v5939_v13 = vmax.f32 %v5907_v28, 0.0  ;;  %v5905_v36 = vadd.f32 %v6747_v57, %v5717_v53  ;;  %v5738_v26 = vadd.f32 %v7900_v44, %v9997_v52  ;;  %v6775_v57 = vunpack.c.h.bf16 %v6894_v58 }
 0x448   : > { %v5729_v21 = vpop.f32.mrf.mxu0 }
 0x449   : > { %v6816_v0 = vpack.c.bf16 %v5939_v13, %v5938_v51  ;;  %v5937_v7 = vmax.f32 %v5905_v36, 0.0  ;;  %v5730_v10 = vadd.f32 %v9997_v52, %v5729_v21  ;;  %v5910_v15 = vadd.f32 %v6758_v49, %v5738_v26 }
 0x44a   : > { %v7901_v38 = vpop.f32.mrf.mxu0  ;;  %v6771_v51 = vunpack.c.h.bf16 %v6893_v9 }
 0x44b   : > { %6903 = vst [vmem:[%s10012_s16 + $0x8] sm:$0xff] %v6816_v0   ;;  %v6811_v19 = vpack.c.bf16 %v5937_v7, %v5936_v62  ;;  %v5741_v6 = vadd.f32 %v7901_v38, %v9997_v52  ;;  %v5908_v34 = vadd.f32 %v6754_v33, %v5730_v10  ;;  %v5942_v22 = vmax.f32 %v5910_v15, 0.0 }
 0x44c   : > { %v5732_v41 = vpop.f32.mrf.mxu0 }
 0x44d   : > { %6812 = vst [vmem:[%s10012_s16] sm:$0xff] %v6811_v19   ;;  %v5911_v32 = vadd.f32 %v6759_v37, %v5741_v6  ;;  %v5733_v23 = vadd.f32 %v9997_v52, %v5732_v41  ;;  %v5940_v43 = vmax.f32 %v5908_v34, 0.0  ;;  %v6896_v19 = vld [vmem:[%s8398_s14 + $0x48] sm:$0xff]   ;;  %v6895_v6 = vld [vmem:[%s8398_s14 + $0x40] sm:$0xff]  }
 0x44e   : > { %v6782_v41 = vunpack.c.l.bf16 %v6896_v19 }
 0x44f   : > { %v5943_v29 = vmax.f32 %v5911_v32, 0.0  ;;  %v5909_v4 = vadd.f32 %v6755_v59, %v5733_v23  ;;  %v6778_v23 = vunpack.c.l.bf16 %v6895_v6 }
 0x451   : > { %v6826_v54 = vpack.c.bf16 %v5943_v29, %v5942_v22  ;;  %v5941_v30 = vmax.f32 %v5909_v4, 0.0  ;;  %v6783_v22 = vunpack.c.h.bf16 %v6896_v19 }
 0x453   : > { %6905 = vst [vmem:[%s10012_s16 + $0x18] sm:$0xff] %v6826_v54   ;;  %v6821_v45 = vpack.c.bf16 %v5941_v30, %v5940_v43  ;;  %v6779_v54 = vunpack.c.h.bf16 %v6895_v6  ;;  %v6898_v30 = vld [vmem:[%s8398_s14 + $0x58] sm:$0xff]  }
 0x455   : > { %6904 = vst [vmem:[%s10012_s16 + $0x10] sm:$0xff] %v6821_v45  }
 0x456   : > { %v7904_v24 = vpop.f32.mrf.mxu0 }
 0x457   : > { %v5754_v63 = vadd.f32 %v7904_v24, %v9997_v52 }
 0x458   : > { %v5745_v39 = vpop.f32.mrf.mxu0 }
 0x459   : > { %v5746_v31 = vadd.f32 %v9997_v52, %v5745_v39  ;;  %v5914_v14 = vadd.f32 %v6766_v2, %v5754_v63  ;;  %v6897_v63 = vld [vmem:[%s8398_s14 + $0x50] sm:$0xff]   ;;  %v6790_v39 = vunpack.c.l.bf16 %v6898_v30 }
 0x45a   : > { %v7905_v18 = vpop.f32.mrf.mxu0 }
 0x45b   : > { %v5757_v46 = vadd.f32 %v7905_v18, %v9997_v52  ;;  %v5912_v48 = vadd.f32 %v6762_v47, %v5746_v31  ;;  %v5946_v35 = vmax.f32 %v5914_v14, 0.0 }
 0x45c   : > { %v5748_v17 = vpop.f32.mrf.mxu0 }
 0x45d   : > { %v5915_v1 = vadd.f32 %v6767_v25, %v5757_v46  ;;  %v5749_v42 = vadd.f32 %v9997_v52, %v5748_v17  ;;  %v5944_v20 = vmax.f32 %v5912_v48, 0.0  ;;  %v6786_v46 = vunpack.c.l.bf16 %v6897_v63 }
 0x45e   : > { %v7908_v8 = vpop.f32.mrf.mxu0 }
 0x45f   : > { %v5947_v61 = vmax.f32 %v5915_v1, 0.0  ;;  %v5913_v27 = vadd.f32 %v6763_v16, %v5749_v42  ;;  %v5770_v56 = vadd.f32 %v7908_v8, %v9997_v52  ;;  %v6791_v16 = vunpack.c.h.bf16 %v6898_v30 }
 0x460   : > { %v5761_v50 = vpop.f32.mrf.mxu0 }
 0x461   : > { %v6836_v55 = vpack.c.bf16 %v5947_v61, %v5946_v35  ;;  %v5945_v60 = vmax.f32 %v5913_v27, 0.0  ;;  %v5762_v28 = vadd.f32 %v9997_v52, %v5761_v50  ;;  %v5918_v44 = vadd.f32 %v6774_v12, %v5770_v56 }
 0x462   : > { %v7909_v53 = vpop.f32.mrf.mxu0  ;;  %v6787_v35 = vunpack.c.h.bf16 %v6897_v63 }
 0x463   : > { %6907 = vst [vmem:[%s10012_s16 + $0x28] sm:$0xff] %v6836_v55   ;;  %v6831_v5 = vpack.c.bf16 %v5945_v60, %v5944_v20  ;;  %v5773_v49 = vadd.f32 %v7909_v53, %v9997_v52  ;;  %v5916_v36 = vadd.f32 %v6770_v3, %v5762_v28  ;;  %v5950_v33 = vmax.f32 %v5918_v44, 0.0 }
 0x464   : > { %v5764_v13 = vpop.f32.mrf.mxu0 }
 0x465   : > { %6906 = vst [vmem:[%s10012_s16 + $0x20] sm:$0xff] %v6831_v5   ;;  %v5919_v26 = vadd.f32 %v6775_v57, %v5773_v49  ;;  %v5765_v21 = vadd.f32 %v9997_v52, %v5764_v13  ;;  %v5948_v0 = vmax.f32 %v5916_v36, 0.0  ;;  %v6900_v5 = vld [vmem:[%s8398_s14 + $0x68] sm:$0xff]   ;;  %v6899_v49 = vld [vmem:[%s8398_s14 + $0x60] sm:$0xff]  }
 0x466   : > { %v6798_v13 = vunpack.c.l.bf16 %v6900_v5 }
 0x467   : > { %v5951_v37 = vmax.f32 %v5919_v26, 0.0  ;;  %v5917_v62 = vadd.f32 %v6771_v51, %v5765_v21  ;;  %v6794_v21 = vunpack.c.l.bf16 %v6899_v49 }
 0x469   : > { %v6846_v7 = vpack.c.bf16 %v5951_v37, %v5950_v33  ;;  %v5949_v10 = vmax.f32 %v5917_v62, 0.0  ;;  %v6799_v33 = vunpack.c.h.bf16 %v6900_v5 }
 0x46b   : > { %6909 = vst [vmem:[%s10012_s16 + $0x38] sm:$0xff] %v6846_v7   ;;  %v6841_v38 = vpack.c.bf16 %v5949_v10, %v5948_v0  ;;  %v6795_v7 = vunpack.c.h.bf16 %v6899_v49  ;;  %v6902_v10 = vld [vmem:[%s8398_s14 + $0x78] sm:$0xff]  }
 0x46d   : > { %6908 = vst [vmem:[%s10012_s16 + $0x30] sm:$0xff] %v6841_v38  }
 0x46e   : > { %v7912_v15 = vpop.f32.mrf.mxu0 }
 0x46f   : > { %v5786_v59 = vadd.f32 %v7912_v15, %v9997_v52 }
 0x470   : > { %v5777_v34 = vpop.f32.mrf.mxu0 }
 0x471   : > { %v5778_v32 = vadd.f32 %v9997_v52, %v5777_v34  ;;  %v5922_v4 = vadd.f32 %v6782_v41, %v5786_v59  ;;  %v6901_v59 = vld [vmem:[%s8398_s14 + $0x70] sm:$0xff]   ;;  %v6806_v34 = vunpack.c.l.bf16 %v6902_v10  ;;  %s6743_s14 = sshll.u32 %s8265_s10, 11  ;;  %s8197_s10 = scalar_lea.vmem %s10073_s18, 2048 }
 0x472   : > { %v7913_v29 = vpop.f32.mrf.mxu0  ;;  %s10071_s23 = scalar_lea.hbm %s10133_s9, %s6743_s14  ;;  %p8198_p12 = scmp.ne.s32.totalorder %s10073_s18, %s8197_s10 }
 0x473   : > { %v5789_v43 = vadd.f32 %v7913_v29, %v9997_v52  ;;  %v5920_v40 = vadd.f32 %v6778_v23, %v5778_v32  ;;  %v5954_v31 = vmax.f32 %v5922_v4, 0.0  ;;  %p8205_p2 = scmp.lt.s32.totalorder %s8203_s1, %s8197_s10 }
 0x474   : > { %v5780_v45 = vpop.f32.mrf.mxu0  ;;  %p8199_p13 = pnand %p8198_p12, %p8369_p4 }
 0x475   : > { %v5923_v24 = vadd.f32 %v6783_v22, %v5789_v43  ;;  %v5781_v11 = vadd.f32 %v9997_v52, %v5780_v45  ;;  %v5952_v58 = vmax.f32 %v5920_v40, 0.0  ;;  %v6802_v43 = vunpack.c.l.bf16 %v6901_v59  ;;  %p8206_p3 = por %p8205_p2, %p8204_p1 }
 0x476   : > { %v7916_v2 = vpop.f32.mrf.mxu0  ;;  %p8200_p0 = pneg %p8199_p13 }
 0x477   : > { %v5955_v47 = vmax.f32 %v5923_v24, 0.0  ;;  %v5921_v25 = vadd.f32 %v6779_v54, %v5781_v11  ;;  %v5802_v18 = vadd.f32 %v7916_v2, %v9997_v52  ;;  %v6807_v54 = vunpack.c.h.bf16 %v6902_v10 }
 0x478   : > { %v5793_v14 = vpop.f32.mrf.mxu0  ;;  %p8207_p5 = pnand %p8206_p3, %p8200_p0 }
 0x479   : > { %v6856_v17 = vpack.c.bf16 %v5955_v47, %v5954_v31  ;;  %v5953_v48 = vmax.f32 %v5921_v25, 0.0  ;;  %v5794_v1 = vadd.f32 %v9997_v52, %v5793_v14  ;;  %v5926_v8 = vadd.f32 %v6790_v39, %v5802_v18 }
 0x47a   : > { %v7917_v42 = vpop.f32.mrf.mxu0  ;;  %v6803_v31 = vunpack.c.h.bf16 %v6901_v59 }
 0x47b   : > { %6911 = vst [vmem:[%s10012_s16 + $0x48] sm:$0xff] %v6856_v17   ;;  %v6851_v9 = vpack.c.bf16 %v5953_v48, %v5952_v58  ;;  %v5805_v12 = vadd.f32 %v7917_v42, %v9997_v52  ;;  %v5924_v27 = vadd.f32 %v6786_v46, %v5794_v1  ;;  %v5958_v3 = vmax.f32 %v5926_v8, 0.0 }
 0x47c   : > { %v5796_v61 = vpop.f32.mrf.mxu0 }
 0x47d   : > { %6910 = vst [vmem:[%s10012_s16 + $0x40] sm:$0xff] %v6851_v9   ;;  %v5927_v56 = vadd.f32 %v6791_v16, %v5805_v12  ;;  %v5797_v50 = vadd.f32 %v9997_v52, %v5796_v61  ;;  %v5956_v55 = vmax.f32 %v5924_v27, 0.0 }
 0x47f   : > { %v5959_v57 = vmax.f32 %v5927_v56, 0.0  ;;  %v5925_v20 = vadd.f32 %v6787_v35, %v5797_v50 }
 0x481   : > { %v6866_v60 = vpack.c.bf16 %v5959_v57, %v5958_v3  ;;  %v5957_v28 = vmax.f32 %v5925_v20, 0.0 }
 0x483   : > { %6913 = vst [vmem:[%s10012_s16 + $0x58] sm:$0xff] %v6866_v60   ;;  %v6861_v53 = vpack.c.bf16 %v5957_v28, %v5956_v55 }
 0x485   : > { %6912 = vst [vmem:[%s10012_s16 + $0x50] sm:$0xff] %v6861_v53  }
 0x486   : > { %v7920_v44 = vpop.f32.mrf.mxu1 }
 0x487   : > { %v5818_v51 = vadd.f32 %v7920_v44, %v9997_v52 }
 0x488   : > { %v5809_v36 = vpop.f32.mrf.mxu1 }
 0x489   : > { %v5810_v26 = vadd.f32 %v9997_v52, %v5809_v36  ;;  %v5930_v62 = vadd.f32 %v6798_v13, %v5818_v51 }
 0x48a   : > { %v7921_v37 = vpop.f32.mrf.mxu1 }
 0x48b   : > { %v5821_v0 = vadd.f32 %v7921_v37, %v9997_v52  ;;  %v5928_v19 = vadd.f32 %v6794_v21, %v5810_v26  ;;  %v5962_v32 = vmax.f32 %v5930_v62, 0.0 }
 0x48c   : > { %v5812_v38 = vpop.f32.mrf.mxu1 }
 0x48d   : > { %v5931_v15 = vadd.f32 %v6799_v33, %v5821_v0  ;;  %v5813_v6 = vadd.f32 %v9997_v52, %v5812_v38  ;;  %v5960_v30 = vmax.f32 %v5928_v19, 0.0 }
 0x48e   : > { %v7924_v41 = vpop.f32.mrf.mxu1 }
 0x48f   : > { %v5963_v23 = vmax.f32 %v5931_v15, 0.0  ;;  %v5929_v22 = vadd.f32 %v6795_v7, %v5813_v6  ;;  %v5834_v29 = vadd.f32 %v7924_v41, %v9997_v52 }
 0x490   : > { %v5825_v4 = vpop.f32.mrf.mxu1 }
 0x491   : > { %v6876_v45 = vpack.c.bf16 %v5963_v23, %v5962_v32  ;;  %v5961_v40 = vmax.f32 %v5929_v22, 0.0  ;;  %v5826_v24 = vadd.f32 %v9997_v52, %v5825_v4  ;;  %v5934_v2 = vadd.f32 %v6806_v34, %v5834_v29 }
 0x492   : > { %v7925_v11 = vpop.f32.mrf.mxu1 }
 0x493   : > { %6915 = vst [vmem:[%s10012_s16 + $0x68] sm:$0xff] %v6876_v45   ;;  %v6871_v63 = vpack.c.bf16 %v5961_v40, %v5960_v30  ;;  %v5837_v39 = vadd.f32 %v7925_v11, %v9997_v52  ;;  %v5932_v25 = vadd.f32 %v6802_v43, %v5826_v24  ;;  %v5966_v46 = vmax.f32 %v5934_v2, 0.0 }
 0x494   : > { %v5828_v47 = vpop.f32.mrf.mxu1 }
 0x495   : > { %6914 = vst [vmem:[%s10012_s16 + $0x60] sm:$0xff] %v6871_v63   ;;  %v5935_v18 = vadd.f32 %v6807_v54, %v5837_v39  ;;  %v5829_v14 = vadd.f32 %v9997_v52, %v5828_v47  ;;  %v5964_v17 = vmax.f32 %v5932_v25, 0.0 }
 0x497   : > { %v5967_v16 = vmax.f32 %v5935_v18, 0.0  ;;  %v5933_v58 = vadd.f32 %v6803_v31, %v5829_v14 }
 0x499   : > { %v6886_v48 = vpack.c.bf16 %v5967_v16, %v5966_v46  ;;  %v5965_v1 = vmax.f32 %v5933_v58, 0.0 }
 0x49b   : > { %6917 = vst [vmem:[%s10012_s16 + $0x78] sm:$0xff] %v6886_v48   ;;  %v6881_v52 = vpack.c.bf16 %v5965_v1, %v5964_v17 }
 0x49d   : > { %6916 = vst [vmem:[%s10012_s16 + $0x70] sm:$0xff] %v6881_v52  }
 0x49e   : > { %8210 = shalt.err (!%p8207_p5)
}
 0x49f   : > { %s8211_s27 = scalar_lea.hbm %s10071_s23, 2048  ;;  %s8215_s16 = scalar_lea.hbm %s10133_s9, 4096 }
 0x4a0   : > { %p8212_p6 = scmp.ne.s32.totalorder %s10071_s23, %s8211_s27  ;;  %p8216_p10 = scmp.lt.s32.totalorder %s10071_s23, %s10133_s9 }
 0x4a1   : > { %p8217_p11 = scmp.lt.s32.totalorder %s8215_s16, %s8211_s27 }
 0x4a2   : > { %p8213_p7 = pnand %p8212_p6, %p8369_p4 }
 0x4a3   : > { %p8218_p12 = por %p8217_p11, %p8216_p10 }
 0x4a4   : > { %p8214_p9 = pneg %p8213_p7 }
 0x4a6   : > { %p8219_p13 = pnand %p8218_p12, %p8214_p9 }
 0x4a8   : > { %8222 = shalt.err (!%p8219_p13)
}
 0x4a9   : > { %s8277_s22 = smov 64   ;;  %s8278_s10 = smov 4  }
 0x4aa   : > { %7942 = dma.vmem_to_hbm [thread:$0]  (%p8369_p4), %s10073_s18, 2048, %s10071_s23, %s10079_s24, %s8277_s22, %s8277_s22, %s8278_s10  }
 0x4ab PF: > { %p7948_p0 = scmp.ge.s32.totalorder %s8273_s12, 2  ;;  %s6159_s25 = sand.u32 1, %s8253_s28  }
 0x4ac   : > { %s6160_s26 = scalar_lea.sflag [#allocation4], %s6159_s25 }
 0x4ad   : > { %p7945_p1 = pnand %p7948_p0, %p8376_p8 }
 0x4af   : > { %p7946_p2 = pneg %p7945_p1 }
 0x4b1   : > { %8248 = dma.done.wait (%p7946_p2), %s6160_s26, 2048  }
 0x4b2   : > { %8250 = vsyncadd (%p7946_p2), %s6160_s26, 4294965248  ;;  %s22_s12 = sadd.s32 1, %s8273_s12   ;;  %s10342_s28 = smov %s8257_s29 }
 0x4b3   : > { %p19_p3 = scmp.ge.s32.totalorder %s22_s12, 4   ;;  %s10343_s29 = smov %s8261_s30 }
 0x4b4   : > { %s10344_s30 = smov %s8382_s20  ;;  %s10345_s10 = smov %s8269_s11 }
 0x4b5   : > { %s10346_s11 = smov %s10348_s15  ;;  %21 = sbr.rel (!%p19_p3) target bundleno = 4 (0x4), region = 125 }
 0x4ba   :  { %6165 = vsyncpa [#allocation4], 1 }
 0x4bb   :  { %6167 = vsyncpa [#allocation4 + $0x1], 1 }

</bundles_post_ra>
